<compile_context>
chip_gen: v7x
topology: tpu7x:2x2x1
jax: 0.10.0
libtpu: 0.0.40
codegen_flags: <defaults>
</compile_context>

<pallas_src>
import functools

import jax
import jax.numpy as jnp
from jax.experimental import pallas as pl
from jax.experimental.pallas import tpu as pltpu

EPS = 1e-5
_PAD = 1.0e6  # padding coordinate: far from any real point, still safe in f32


def _round_up(x, m):
    return (x + m - 1) // m * m


def _arcosh1p(d):
    # arcosh(1 + d) with the reference clamp (1 + d >= 1 + EPS), rewritten so
    # only one sqrt + one log hit the EUP.
    d = jnp.maximum(d, EPS)
    return jnp.log(1.0 + d + jnp.sqrt(d * (d + 2.0)))


def _make_kernel(tn, tm, cw):
    """Builds the chunked, fully-fused chamfer tile kernel."""
    n_chunks = tm // cw
    lane_groups = cw // 128

    def kernel(x1_ref, x2_ref, dd1_ref, d2p_ref, d1_acc):
        # x1_ref : (1, tn, 3)  xyz1 tile, points on sublanes
        # x2_ref : (1, 3, tm)  xyz2 tile, points lane-dense
        # dd1_ref: (1, tn, 1)  arcosh(1 + min_j dist), written at the last M tile
        # d2p_ref: (1, 1, tm)  min_i dist over this N tile (finished in JAX glue)
        # d1_acc : (tn, 128)   lane-folded running min across M tiles
        m = pl.program_id(2)

        @pl.when(m == 0)
        def _init():
            d1_acc[...] = jnp.full(d1_acc.shape, jnp.inf, dtype=d1_acc.dtype)

        # Hoisted lane-broadcasts of this tile's query coordinates: they are
        # reused by every chunk below (JAX does not CSE broadcast_in_dim, so
        # hoisting keeps this to ~3*tn/8 ops per grid step).
        p = x1_ref[0]                                       # (tn, 3) f32
        px = jnp.broadcast_to(p[:, 0:1], (tn, cw))
        py = jnp.broadcast_to(p[:, 1:2], (tn, cw))
        pz = jnp.broadcast_to(p[:, 2:3], (tn, cw))

        # Chunked over the lane axis: the (tn, tm) dist tile never exists in
        # VMEM; each (tn, cw) chunk is produced and immediately consumed by
        # both mins (pure VPU elementwise work, exact f32).
        for c in range(n_chunks):                           # static unrolled
            sl = pl.ds(c * cw, cw)                          # static 128-aligned
            qx = x2_ref[0, 0:1, sl]                         # (1, cw), sublane-bcast
            qy = x2_ref[0, 1:2, sl]
            qz = x2_ref[0, 2:3, sl]
            dx = px - qx
            dy = py - qy
            dz = pz - qz
            dist = dx * dx + dy * dy + dz * dz              # (tn, cw) exact ||p-q||^2

            # d2 partial: min over this tile's rows (sublane direction, cheap;
            # result is naturally lane-oriented for the lane-dense store).
            d2p_ref[0, :, sl] = jnp.min(dist, axis=0, keepdims=True)

            # d1: fold the chunk to 128 lanes with elementwise mins, then
            # update the running-min accumulator in place (bounded live range).
            fold = dist[:, 0:128]
            for g in range(1, lane_groups):
                fold = jnp.minimum(fold, dist[:, g * 128:(g + 1) * 128])
            d1_acc[...] = jnp.minimum(d1_acc[...], fold)

        @pl.when(m == pl.num_programs(2) - 1)
        def _finalize():
            d1 = jnp.min(d1_acc[...], axis=1, keepdims=True)   # (tn, 1): one xlane reduce
            dd1_ref[...] = _arcosh1p(d1)[None]                  # (1, tn, 1)

    return kernel


def hyper_cdl2(xyz1, xyz2, *, tn=512, tm=2048):
    """Forward of HyperCDL2: mean(arcosh(1 + d1)) + mean(arcosh(1 + d2))."""
    B, N, c1 = xyz1.shape
    B2, M, c2 = xyz2.shape
    if c1 != 3 or c2 != 3 or B != B2:
        raise ValueError("expected xyz1 (B, N, 3) and xyz2 (B, M, 3)")
    # TODO(synk): ignore_zeros (batch==1 zero-point filtering) needs dynamic
    # shapes; not implemented (PyTorch default is ignore_zeros=False).

    xyz1 = xyz1.astype(jnp.float32)
    xyz2 = xyz2.astype(jnp.float32)

    # N tile: multiple of 128; when B == 1 ensure n_t >= 2 so both v7x
    # TensorCores get a "parallel" grid step.
    n_lane = _round_up(N, 128)
    tn = min(tn, n_lane)
    if B == 1 and n_lane >= 256:
        tn = min(tn, _round_up(n_lane // 2, 128))
    np_ = _round_up(N, tn)

    # M tile: clamp to a multiple of 256 (full 256-wide lane-group / MXU
    # width) so chunks stay 256 lanes wide whenever possible.
    tm = max(min(tm, _round_up(M, 256)), 128)
    mp_ = _round_up(M, tm)
    cw = 256 if tm % 256 == 0 else 128                      # in-kernel chunk width

    # Pad with far-away points; padded rows/cols are sliced off before the
    # means and can never win a nearest-neighbor min against a real point.
    if np_ != N:
        xyz1 = jnp.concatenate(
            [xyz1, jnp.full((B, np_ - N, 3), _PAD, jnp.float32)], axis=1)
    if mp_ != M:
        xyz2 = jnp.concatenate(
            [xyz2, jnp.full((B, mp_ - M, 3), _PAD, jnp.float32)], axis=1)

    # xyz2 is presented lane-dense (points on the 128-lane axis); xyz1 keeps
    # points on sublanes so the distance tile has N on sublanes / M on lanes.
    x2t = jnp.transpose(xyz2, (0, 2, 1))                    # (B, 3, mp_)

    n_t, m_t = np_ // tn, mp_ // tm

    dd1, d2p = pl.pallas_call(
        _make_kernel(tn, tm, cw),
        out_shape=(
            jax.ShapeDtypeStruct((B, np_, 1), jnp.float32),    # arcosh(1 + d1)
            jax.ShapeDtypeStruct((B, n_t, mp_), jnp.float32),  # per-N-tile partial d2 mins
        ),
        grid_spec=pltpu.PrefetchScalarGridSpec(
            num_scalar_prefetch=0,
            grid=(B, n_t, m_t),
            in_specs=[
                pl.BlockSpec((1, tn, 3), lambda b, i, m: (b, i, 0)),
                pl.BlockSpec((1, 3, tm), lambda b, i, m: (b, 0, m)),
            ],
            out_specs=[
                pl.BlockSpec((1, tn, 1), lambda b, i, m: (b, i, 0)),
                pl.BlockSpec((1, 1, tm), lambda b, i, m: (b, i, m)),
            ],
            scratch_shapes=[pltpu.VMEM((tn, 128), jnp.float32)],
        ),
        # (b, i) parallel keeps both v7x TensorCores busy; the M axis is the
        # in-kernel reduction. Per-step working set is ~2-4 MiB, so the
        # default scoped VMEM limit suffices on v5e/v6e/v7x (no override).
        compiler_params=pltpu.CompilerParams(
            dimension_semantics=("parallel", "parallel", "arbitrary")),
    )(xyz1, x2t)

    dd1 = dd1[:, :N, 0]                   # (B, N), already arcosh'd in-kernel
    d2 = jnp.min(d2p, axis=1)[:, :M]      # (B, M), raw squared distances
    return jnp.mean(dd1) + jnp.mean(_arcosh1p(d2))


def hyper_cdl2_ref(xyz1, xyz2):
    """Pure-JAX reference mirroring the PyTorch module exactly."""
    diff = xyz1[:, :, None, :] - xyz2[:, None, :, :]       # (B, N, M, 3)
    dist = jnp.sum(diff * diff, axis=-1)                   # (B, N, M)
    d1 = jnp.min(dist, axis=2)                             # (B, N)
    d2 = jnp.min(dist, axis=1)                             # (B, M)

    def arcosh(x):
        x = jnp.maximum(x, 1.0 + EPS)
        return jnp.log(x + jnp.sqrt(1.0 + x) * jnp.sqrt(x - 1.0))

    return jnp.mean(arcosh(1.0 + d1)) + jnp.mean(arcosh(1.0 + d2))


def _check(out, ref, name):
    # The kernel now computes (p-q)^2 directly in f32 (same form as the
    # reference), so the tolerance is tightened vs. v2's expansion form.
    if not jnp.allclose(out, ref, atol=1e-4, rtol=1e-4):
        raise AssertionError(f"{name} mismatch: kernel={out} ref={ref}")


if __name__ == "__main__":
    key = jax.random.PRNGKey(0)
    k1, k2, k3, k4, k5, k6 = jax.random.split(key, 6)

    # Case 1: tile-aligned sizes, defaults -> single M tile, two 256-lane chunks.
    B, N, M = 2, 256, 512
    xyz1 = jax.random.normal(k1, (B, N, 3), dtype=jnp.float32)
    xyz2 = jax.random.normal(k2, (B, M, 3), dtype=jnp.float32)
    out1 = jax.block_until_ready(jax.jit(hyper_cdl2)(xyz1, xyz2))
    ref1 = jax.block_until_ready(hyper_cdl2_ref(xyz1, xyz2))
    _check(out1, ref1, "case1")

    # Case 2: ragged sizes (wrapper pads) + small tiles -> multi-tile grid on
    # both axes, exercising the running-min accumulator init/finalize.
    B, N, M = 2, 320, 300
    xyz1 = jax.random.normal(k3, (B, N, 3), dtype=jnp.float32)
    xyz2 = jax.random.normal(k4, (B, M, 3), dtype=jnp.float32)
    small = jax.jit(functools.partial(hyper_cdl2, tn=128, tm=128))
    out2 = jax.block_until_ready(small(xyz1, xyz2))
    ref2 = jax.block_until_ready(hyper_cdl2_ref(xyz1, xyz2))
    _check(out2, ref2, "case2")

    # Case 3: B == 1 (megacore split caps tn so n_t == 2) + ragged M with
    # default tiles -> three 256-lane chunks inside one M tile.
    B, N, M = 1, 512, 700
    xyz1 = jax.random.normal(k5, (B, N, 3), dtype=jnp.float32)
    xyz2 = jax.random.normal(k6, (B, M, 3), dtype=jnp.float32)
    out3 = jax.block_until_ready(jax.jit(hyper_cdl2)(xyz1, xyz2))
    ref3 = jax.block_until_ready(hyper_cdl2_ref(xyz1, xyz2))
    _check(out3, ref3, "case3")

    print("KERNEL_OK")
</pallas_src>

<mosaic_0001>
module attributes {stable_mosaic.version = 11 : i64} {
  func.func @kernel(%arg0: i32, %arg1: i32, %arg2: i32, %arg3: memref<1x256x3xf32, #tpu.memory_space<vmem>>, %arg4: memref<1x3x512xf32, #tpu.memory_space<vmem>>, %arg5: memref<1x256x1xf32, #tpu.memory_space<vmem>>, %arg6: memref<1x1x512xf32, #tpu.memory_space<vmem>>, %arg7: memref<256x128xf32, #tpu.memory_space<vmem>>) attributes {dimension_semantics = [#tpu.dimension_semantics<parallel>, #tpu.dimension_semantics<parallel>, #tpu.dimension_semantics<arbitrary>], iteration_bounds = array<i64: 2, 1, 1>, scalar_prefetch = 0 : i64, scratch_operands = 1 : i64, tpu.core_type = #tpu.core_type<tc>, window_params = [{transform_indices = @transform_0, window_bounds = array<i64: 1, 256, 3>}, {transform_indices = @transform_1, window_bounds = array<i64: 1, 3, 512>}, {transform_indices = @transform_2, window_bounds = array<i64: 1, 256, 1>}, {transform_indices = @transform_3, window_bounds = array<i64: 1, 1, 512>}]} {
    %c0_i32 = arith.constant 0 : i32
    %0 = arith.cmpi eq, %arg2, %c0_i32 : i32
    %1 = arith.extui %0 : i1 to i32
    %c0_i32_0 = arith.constant 0 : i32
    %2 = arith.cmpi ne, %1, %c0_i32_0 : i32
    scf.if %2 {
      %cst_35 = arith.constant 0x7F800000 : f32
      %73 = vector.broadcast %cst_35 : f32 to vector<256x128xf32>
      %c0_36 = arith.constant 0 : index
      %c0_37 = arith.constant 0 : index
      %74 = vector.load %arg7[%c0_36, %c0_37] : memref<256x128xf32, #tpu.memory_space<vmem>>, vector<256x128xf32>
      tpu.vector_store %arg7[%c0_36, %c0_37], %73 {strides = array<i32>} : memref<256x128xf32, #tpu.memory_space<vmem>>, vector<256x128xf32>,
    } else {
    }
    %c0 = arith.constant 0 : index
    %c0_1 = arith.constant 0 : index
    %c0_2 = arith.constant 0 : index
    %3 = vector.load %arg3[%c0, %c0_1, %c0_2] : memref<1x256x3xf32, #tpu.memory_space<vmem>>, vector<1x256x3xf32>
    %4 = vector.shape_cast %3 : vector<1x256x3xf32> to vector<256x3xf32>
    %5 = vector.extract_strided_slice %4 {offsets = [0, 0], sizes = [256, 1], strides = [1, 1]} : vector<256x3xf32> to vector<256x1xf32>
    %6 = vector.shape_cast %5 : vector<256x1xf32> to vector<256x1xf32>
    %7 = vector.broadcast %6 : vector<256x1xf32> to vector<256x256xf32>
    %8 = vector.extract_strided_slice %4 {offsets = [0, 1], sizes = [256, 1], strides = [1, 1]} : vector<256x3xf32> to vector<256x1xf32>
    %9 = vector.shape_cast %8 : vector<256x1xf32> to vector<256x1xf32>
    %10 = vector.broadcast %9 : vector<256x1xf32> to vector<256x256xf32>
    %11 = vector.extract_strided_slice %4 {offsets = [0, 2], sizes = [256, 1], strides = [1, 1]} : vector<256x3xf32> to vector<256x1xf32>
    %12 = vector.shape_cast %11 : vector<256x1xf32> to vector<256x1xf32>
    %13 = vector.broadcast %12 : vector<256x1xf32> to vector<256x256xf32>
    %c0_3 = arith.constant 0 : index
    %c0_4 = arith.constant 0 : index
    %c0_5 = arith.constant 0 : index
    %14 = vector.load %arg4[%c0_3, %c0_4, %c0_5] : memref<1x3x512xf32, #tpu.memory_space<vmem>>, vector<1x1x256xf32>
    %15 = vector.shape_cast %14 : vector<1x1x256xf32> to vector<1x256xf32>
    %c0_6 = arith.constant 0 : index
    %c1 = arith.constant 1 : index
    %c0_7 = arith.constant 0 : index
    %16 = vector.load %arg4[%c0_6, %c1, %c0_7] : memref<1x3x512xf32, #tpu.memory_space<vmem>>, vector<1x1x256xf32>
    %17 = vector.shape_cast %16 : vector<1x1x256xf32> to vector<1x256xf32>
    %c0_8 = arith.constant 0 : index
    %c2 = arith.constant 2 : index
    %c0_9 = arith.constant 0 : index
    %18 = vector.load %arg4[%c0_8, %c2, %c0_9] : memref<1x3x512xf32, #tpu.memory_space<vmem>>, vector<1x1x256xf32>
    %19 = vector.shape_cast %18 : vector<1x1x256xf32> to vector<1x256xf32>
    %20 = vector.broadcast %15 : vector<1x256xf32> to vector<256x256xf32>
    %21 = arith.subf %7, %20 : vector<256x256xf32>
    %22 = vector.broadcast %17 : vector<1x256xf32> to vector<256x256xf32>
    %23 = arith.subf %10, %22 : vector<256x256xf32>
    %24 = vector.broadcast %19 : vector<1x256xf32> to vector<256x256xf32>
    %25 = arith.subf %13, %24 : vector<256x256xf32>
    %26 = arith.mulf %21, %21 : vector<256x256xf32>
    %27 = arith.mulf %23, %23 : vector<256x256xf32>
    %28 = arith.addf %26, %27 : vector<256x256xf32>
    %29 = arith.mulf %25, %25 : vector<256x256xf32>
    %30 = arith.addf %28, %29 : vector<256x256xf32>
    %cst = arith.constant dense<0x7F800000> : vector<256xf32>
    %31 = vector.multi_reduction <minimumf>, %30, %cst [0] : vector<256x256xf32> to vector<256xf32>
    %32 = vector.shape_cast %31 : vector<256xf32> to vector<1x256xf32>
    %c0_10 = arith.constant 0 : index
    %c0_11 = arith.constant 0 : index
    %c0_12 = arith.constant 0 : index
    %33 = vector.load %arg6[%c0_10, %c0_11, %c0_12] : memref<1x1x512xf32, #tpu.memory_space<vmem>>, vector<1x1x256xf32>
    %34 = vector.shape_cast %33 : vector<1x1x256xf32> to vector<1x256xf32>
    %35 = vector.shape_cast %32 : vector<1x256xf32> to vector<1x1x256xf32>
    tpu.vector_store %arg6[%c0_10, %c0_11, %c0_12], %35 {strides = array<i32>} : memref<1x1x512xf32, #tpu.memory_space<vmem>>, vector<1x1x256xf32>,
    %36 = vector.extract_strided_slice %30 {offsets = [0, 0], sizes = [256, 128], strides = [1, 1]} : vector<256x256xf32> to vector<256x128xf32>
    %37 = vector.extract_strided_slice %30 {offsets = [0, 128], sizes = [256, 128], strides = [1, 1]} : vector<256x256xf32> to vector<256x128xf32>
    %38 = arith.minimumf %36, %37 : vector<256x128xf32>
    %c0_13 = arith.constant 0 : index
    %c0_14 = arith.constant 0 : index
    %39 = vector.load %arg7[%c0_13, %c0_14] : memref<256x128xf32, #tpu.memory_space<vmem>>, vector<256x128xf32>
    %40 = arith.minimumf %39, %38 : vector<256x128xf32>
    %c0_15 = arith.constant 0 : index
    %c0_16 = arith.constant 0 : index
    %41 = vector.load %arg7[%c0_15, %c0_16] : memref<256x128xf32, #tpu.memory_space<vmem>>, vector<256x128xf32>
    tpu.vector_store %arg7[%c0_15, %c0_16], %40 {strides = array<i32>} : memref<256x128xf32, #tpu.memory_space<vmem>>, vector<256x128xf32>,
    %c0_17 = arith.constant 0 : index
    %c0_18 = arith.constant 0 : index
    %c256 = arith.constant 256 : index
    %42 = vector.load %arg4[%c0_17, %c0_18, %c256] : memref<1x3x512xf32, #tpu.memory_space<vmem>>, vector<1x1x256xf32>
    %43 = vector.shape_cast %42 : vector<1x1x256xf32> to vector<1x256xf32>
    %c0_19 = arith.constant 0 : index
    %c1_20 = arith.constant 1 : index
    %c256_21 = arith.constant 256 : index
    %44 = vector.load %arg4[%c0_19, %c1_20, %c256_21] : memref<1x3x512xf32, #tpu.memory_space<vmem>>, vector<1x1x256xf32>
    %45 = vector.shape_cast %44 : vector<1x1x256xf32> to vector<1x256xf32>
    %c0_22 = arith.constant 0 : index
    %c2_23 = arith.constant 2 : index
    %c256_24 = arith.constant 256 : index
    %46 = vector.load %arg4[%c0_22, %c2_23, %c256_24] : memref<1x3x512xf32, #tpu.memory_space<vmem>>, vector<1x1x256xf32>
    %47 = vector.shape_cast %46 : vector<1x1x256xf32> to vector<1x256xf32>
    %48 = vector.broadcast %43 : vector<1x256xf32> to vector<256x256xf32>
    %49 = arith.subf %7, %48 : vector<256x256xf32>
    %50 = vector.broadcast %45 : vector<1x256xf32> to vector<256x256xf32>
    %51 = arith.subf %10, %50 : vector<256x256xf32>
    %52 = vector.broadcast %47 : vector<1x256xf32> to vector<256x256xf32>
    %53 = arith.subf %13, %52 : vector<256x256xf32>
    %54 = arith.mulf %49, %49 : vector<256x256xf32>
    %55 = arith.mulf %51, %51 : vector<256x256xf32>
    %56 = arith.addf %54, %55 : vector<256x256xf32>
    %57 = arith.mulf %53, %53 : vector<256x256xf32>
    %58 = arith.addf %56, %57 : vector<256x256xf32>
    %cst_25 = arith.constant dense<0x7F800000> : vector<256xf32>
    %59 = vector.multi_reduction <minimumf>, %58, %cst_25 [0] : vector<256x256xf32> to vector<256xf32>
    %60 = vector.shape_cast %59 : vector<256xf32> to vector<1x256xf32>
    %c0_26 = arith.constant 0 : index
    %c0_27 = arith.constant 0 : index
    %c256_28 = arith.constant 256 : index
    %61 = vector.load %arg6[%c0_26, %c0_27, %c256_28] : memref<1x1x512xf32, #tpu.memory_space<vmem>>, vector<1x1x256xf32>
    %62 = vector.shape_cast %61 : vector<1x1x256xf32> to vector<1x256xf32>
    %63 = vector.shape_cast %60 : vector<1x256xf32> to vector<1x1x256xf32>
    tpu.vector_store %arg6[%c0_26, %c0_27, %c256_28], %63 {strides = array<i32>} : memref<1x1x512xf32, #tpu.memory_space<vmem>>, vector<1x1x256xf32>,
    %64 = vector.extract_strided_slice %58 {offsets = [0, 0], sizes = [256, 128], strides = [1, 1]} : vector<256x256xf32> to vector<256x128xf32>
    %65 = vector.extract_strided_slice %58 {offsets = [0, 128], sizes = [256, 128], strides = [1, 1]} : vector<256x256xf32> to vector<256x128xf32>
    %66 = arith.minimumf %64, %65 : vector<256x128xf32>
    %c0_29 = arith.constant 0 : index
    %c0_30 = arith.constant 0 : index
    %67 = vector.load %arg7[%c0_29, %c0_30] : memref<256x128xf32, #tpu.memory_space<vmem>>, vector<256x128xf32>
    %68 = arith.minimumf %67, %66 : vector<256x128xf32>
    %c0_31 = arith.constant 0 : index
    %c0_32 = arith.constant 0 : index
    %69 = vector.load %arg7[%c0_31, %c0_32] : memref<256x128xf32, #tpu.memory_space<vmem>>, vector<256x128xf32>
    tpu.vector_store %arg7[%c0_31, %c0_32], %68 {strides = array<i32>} : memref<256x128xf32, #tpu.memory_space<vmem>>, vector<256x128xf32>,
    %c0_i32_33 = arith.constant 0 : i32
    %70 = arith.cmpi eq, %arg2, %c0_i32_33 : i32
    %71 = arith.extui %70 : i1 to i32
    %c0_i32_34 = arith.constant 0 : i32
    %72 = arith.cmpi ne, %71, %c0_i32_34 : i32
    scf.if %72 {
      %c0_35 = arith.constant 0 : index
      %c0_36 = arith.constant 0 : index
      %73 = vector.load %arg7[%c0_35, %c0_36] : memref<256x128xf32, #tpu.memory_space<vmem>>, vector<256x128xf32>
      %cst_37 = arith.constant dense<0x7F800000> : vector<256xf32>
      %74 = vector.multi_reduction <minimumf>, %73, %cst_37 [1] : vector<256x128xf32> to vector<256xf32>
      %75 = vector.shape_cast %74 : vector<256xf32> to vector<256x1xf32>
      %cst_38 = arith.constant 9.99999974E-6 : f32
      %76 = vector.broadcast %cst_38 : f32 to vector<256x1xf32>
      %77 = arith.maximumf %75, %76 : vector<256x1xf32>
      %cst_39 = arith.constant 1.000000e+00 : f32
      %78 = vector.broadcast %cst_39 : f32 to vector<256x1xf32>
      %79 = arith.addf %78, %77 : vector<256x1xf32>
      %cst_40 = arith.constant 2.000000e+00 : f32
      %80 = vector.broadcast %cst_40 : f32 to vector<256x1xf32>
      %81 = arith.addf %77, %80 : vector<256x1xf32>
      %82 = arith.mulf %77, %81 : vector<256x1xf32>
      %83 = math.sqrt %82 : vector<256x1xf32>
      %84 = arith.addf %79, %83 : vector<256x1xf32>
      %85 = math.log %84 : vector<256x1xf32>
      %86 = vector.shape_cast %85 : vector<256x1xf32> to vector<1x256x1xf32>
      %c0_41 = arith.constant 0 : index
      %c0_42 = arith.constant 0 : index
      %c0_43 = arith.constant 0 : index
      %87 = vector.load %arg5[%c0_41, %c0_42, %c0_43] : memref<1x256x1xf32, #tpu.memory_space<vmem>>, vector<1x256x1xf32>
      tpu.vector_store %arg5[%c0_41, %c0_42, %c0_43], %86 {strides = array<i32>} : memref<1x256x1xf32, #tpu.memory_space<vmem>>, vector<1x256x1xf32>,
    } else {
    }
    return
  }
  func.func @transform_0(%arg0: i32, %arg1: i32, %arg2: i32) -> (i32, i32, i32) {
    %c0_i32 = arith.constant 0 : i32
    %c0_i32_0 = arith.constant 0 : i32
    return %arg0, %arg1, %c0_i32 : i32, i32, i32
  }
  func.func @transform_1(%arg0: i32, %arg1: i32, %arg2: i32) -> (i32, i32, i32) {
    %c0_i32 = arith.constant 0 : i32
    %c0_i32_0 = arith.constant 0 : i32
    return %arg0, %c0_i32, %arg2 : i32, i32, i32
  }
  func.func @transform_2(%arg0: i32, %arg1: i32, %arg2: i32) -> (i32, i32, i32) {
    %c0_i32 = arith.constant 0 : i32
    %c0_i32_0 = arith.constant 0 : i32
    return %arg0, %arg1, %c0_i32 : i32, i32, i32
  }
  func.func @transform_3(%arg0: i32, %arg1: i32, %arg2: i32) -> (i32, i32, i32) {
    %c0_i32 = arith.constant 0 : i32
    return %arg0, %arg1, %arg2 : i32, i32, i32
  }
}

</mosaic_0001>

<bundles_post_ra>
// kernel: hyper_cdl2.1
= control target key start
LH: loop header
LB: loop body
LE: loop exit
PB: predicated region body
PF: predicated region fallthrough
CT: control target
= control target key end

     0   :  { %s3296_s12 = smov 0   ;;  %s3298_s13 = smov 0   ;;  %s5521_s0 = inlined_call_operand.vmem [shape: f32[2,256,3], index: 0, kind: input, shape index: {}]   ;;  %s5522_s1 = inlined_call_operand.vmem [shape: f32[2,3,512], index: 1, kind: input, shape index: {}]   ;;  %s5523_s2 = inlined_call_operand.vmem [shape: f32[2,256,1], index: 2, kind: output, shape index: {0}]   ;;  %s5524_s3 = inlined_call_operand.vmem [shape: f32[2,1,512], index: 3, kind: output, shape index: {1}]  }
   0x1   :  { %s3300_s14 = smov 0  }
   0x2 LB: > { %s33_s15 = sadd.s32 1, %s3266_s13  ;;  %p3068_p0 = scmp.ge.s32.totalorder %s3270_s14, 1  ;;  %s3270_s14 = sphi %s3300_s14, %s14_s14   ;;  %s3266_s13 = sphi %s3298_s13, %s5947_s13   ;;  %s3262_s12 = sphi %s3296_s12, %s5946_s12  }
   0x3   : > { %p35_p1 = scmp.ge.s32.totalorder %s33_s15, 2  ;;  %p189_p2 = scmp.lt.s32.totalorder %s3270_s14, 3 }
   0x5   : > { %s5949_s15 = smov (%p35_p1, %s33_s15), 0  ;;  %p190_p3 = pnand %p3068_p0, %p189_p2 }
   0x7   : > { %193 = sbr.rel (%p190_p3) target bundleno = 666 (0x29a), region = 28 }
   0xe   : > { %p243_p4 = scmp.lt.s32.totalorder %s3262_s12, 1  ;;  %v3272_v0 = vmov 0   ;;  %v3273_v33 = vmov 1   ;;  %v5525_v34 = vlaneseq  ;;  %v3274_v62 = vmov 2  }
   0xf   : > { %3115 = vset.pattern.permute.xlu1 %v3272_v0  ;;  %3114 = vset.pattern.permute.xlu0 %v3272_v0  ;;  %vm2863_vm9 = vcmask 7168  }
  0x10   : > { %s5951_s12 = smov (!%p243_p4, %s3262_s12), 1  ;;  %v3480_v35 = vshrl.u32 %v5525_v34, 7 }
  0x11   : > { %s3083_s16 = sshll.u32 %s5951_s12, 8  ;;  %s3084_s20 = sshll.u32 %s5951_s12, 4 }
  0x12   : > { %s3322_s19 = scalar_lea.vmem %s5521_s0, %s3083_s16  ;;  %5531 = vst [vmem:[#allocation3_spill] sm:$0xff] %v3480_v35  ;;  %s260_s23 = scalar_lea.vmem %s5522_s1, %s3084_s20  ;;  %v777_v36 = vsub.s32 0, %v3480_v35  ;;  %v781_v37 = vsub.s32 1, %v3480_v35 }
  0x13   : > { %v3325_v1 = vld [vmem:[%s3322_s19 + $0x10] sm:$0xff]  ;;  %v3328_v2 = vld [vmem:[%s3322_s19] sm:$0xff]  ;;  %v3333_v3 = vld [vmem:[%s3322_s19 + $0x18] sm:$0xff]  ;;  %s3075_s24 = sshll.u32 %s5951_s12, 2  ;;  %s5205_s30 = scalar_lea.vmem %s5523_s2, %s3083_s16 }
  0x14   : > { %365 = vperm.xlu1 %3115, %v3325_v1   ;;  %355 = vperm.xlu0 %3114, %v3328_v2   ;;  %v3336_v4 = vld [vmem:[%s3322_s19 + $0x8] sm:$0xff]  ;;  %v3344_v6 = vld [vmem:[%s3322_s19 + $0x20] sm:$0xff]  ;;  %v3349_v7 = vld [vmem:[%s3322_s19 + $0x38] sm:$0xff]  ;;  %s283_s27 = scalar_lea.vmem %s5524_s3, %s3075_s24 }
  0x15   : > { %v3341_v5 = vld [vmem:[%s3322_s19 + $0x28] sm:$0xff]  ;;  %v3352_v8 = vld [vmem:[%s3322_s19 + $0x30] sm:$0xff]  ;;  %v3360_v10 = vld [vmem:[%s3322_s19 + $0x40] sm:$0xff] }
  0x16   : > { %v3357_v9 = vld [vmem:[%s3322_s19 + $0x48] sm:$0xff]  ;;  %v3365_v11 = vld [vmem:[%s3322_s19 + $0x58] sm:$0xff]  ;;  %v3368_v12 = vld [vmem:[%s3322_s19 + $0x50] sm:$0xff] }
  0x17   : > { %v3373_v13 = vld [vmem:[%s3322_s19 + $0x68] sm:$0xff]  ;;  %v3376_v14 = vld [vmem:[%s3322_s19 + $0x60] sm:$0xff]  ;;  %v3381_v15 = vld [vmem:[%s3322_s19 + $0x78] sm:$0xff] }
  0x18   : > { %370 = vperm.xlu1 %3115, %v3333_v3   ;;  %360 = vperm.xlu0 %3114, %v3336_v4   ;;  %v3384_v16 = vld [vmem:[%s3322_s19 + $0x70] sm:$0xff]  ;;  %v3389_v17 = vld [vmem:[%s3322_s19 + $0x88] sm:$0xff]  ;;  %v3392_v18 = vld [vmem:[%s3322_s19 + $0x80] sm:$0xff] }
  0x19   : > { %v3397_v19 = vld [vmem:[%s3322_s19 + $0x98] sm:$0xff]  ;;  %v3400_v20 = vld [vmem:[%s3322_s19 + $0x90] sm:$0xff]  ;;  %v3405_v21 = vld [vmem:[%s3322_s19 + $0xa8] sm:$0xff] }
  0x1a   : > { %v3408_v22 = vld [vmem:[%s3322_s19 + $0xa0] sm:$0xff]  ;;  %v3413_v23 = vld [vmem:[%s3322_s19 + $0xb8] sm:$0xff]  ;;  %v3416_v24 = vld [vmem:[%s3322_s19 + $0xb0] sm:$0xff] }
  0x1b   : > { %v3421_v25 = vld [vmem:[%s3322_s19 + $0xc8] sm:$0xff]  ;;  %v3424_v26 = vld [vmem:[%s3322_s19 + $0xc0] sm:$0xff]  ;;  %v3429_v27 = vld [vmem:[%s3322_s19 + $0xd8] sm:$0xff] }
  0x1c   : > { %380 = vperm.xlu1 %3115, %v3341_v5   ;;  %375 = vperm.xlu0 %3114, %v3344_v6   ;;  %v3432_v28 = vld [vmem:[%s3322_s19 + $0xd0] sm:$0xff]  ;;  %v3437_v29 = vld [vmem:[%s3322_s19 + $0xe8] sm:$0xff]  ;;  %v3440_v30 = vld [vmem:[%s3322_s19 + $0xe0] sm:$0xff] }
  0x1d   : > { %v3445_v31 = vld [vmem:[%s3322_s19 + $0xf8] sm:$0xff]  ;;  %v3448_v32 = vld [vmem:[%s3322_s19 + $0xf0] sm:$0xff]  ;;  %v769_v38 = vld [vmem:[%s260_s23] ss:$4 sm:$0x3] }
  0x1e   : > { %v3078_v39 = vld [vmem:[%s260_s23 + $0x8] ss:$4 sm:$0x3]  ;;  %v3076_v40 = vld [vmem:[%s260_s23 + $0x1] ss:$4 sm:$0x3]  ;;  %v3491_v42 = vrot.slane %v769_v38, %v777_v36  ;;  %v3493_v43 = vrot.slane %v769_v38, %v781_v37 }
  0x1f   : > { %v3077_v41 = vld [vmem:[%s260_s23 + $0x2] ss:$4 sm:$0x3]  ;;  %v3495_v44 = vrot.slane %v3078_v39, %v777_v36  ;;  %v3497_v45 = vrot.slane %v3078_v39, %v781_v37  ;;  %v3079_v46 = vld [vmem:[%s260_s23 + $0x9] ss:$4 sm:$0x3]  ;;  %v3501_v48 = vrot.slane %v3076_v40, %v777_v36  ;;  %v3503_v49 = vrot.slane %v3076_v40, %v781_v37 }
  0x20   : > { %390 = vperm.xlu1 %3115, %v3349_v7   ;;  %385 = vperm.xlu0 %3114, %v3352_v8   ;;  %v3080_v47 = vld [vmem:[%s260_s23 + $0xa] ss:$4 sm:$0x3]  ;;  %v3505_v50 = vrot.slane %v3077_v41, %v777_v36  ;;  %v3507_v51 = vrot.slane %v3077_v41, %v781_v37  ;;  %v3513_v58 = vrot.slane %v3079_v46, %v777_v36 }
  0x21   : > { %v3515_v59 = vrot.slane %v3079_v46, %v781_v37  ;;  %v3517_v60 = vrot.slane %v3080_v47, %v777_v36  ;;  %v3519_v61 = vrot.slane %v3080_v47, %v781_v37 }
  0x22   : > { %5532 = vst [vmem:[#allocation4_spill] sm:$0xff] %v3505_v50  ;;  %5533 = vst [vmem:[#allocation5_spill] sm:$0xff] %v3507_v51 }
  0x23   : > { %5534 = vst [vmem:[#allocation6_spill] sm:$0xff] %v3517_v60  ;;  %5535 = vst [vmem:[#allocation7_spill] sm:$0xff] %v3519_v61 }
  0x24   : > { %400 = vperm.xlu1 %3115, %v3357_v9   ;;  %395 = vperm.xlu0 %3114, %v3360_v10  }
  0x28   : > { %410 = vperm.xlu1 %3115, %v3365_v11   ;;  %405 = vperm.xlu0 %3114, %v3368_v12  }
  0x2c   : > { %420 = vperm.xlu1 %3115, %v3373_v13   ;;  %415 = vperm.xlu0 %3114, %v3376_v14  }
  0x30   : > { %430 = vperm.xlu1 %3115, %v3381_v15   ;;  %425 = vperm.xlu0 %3114, %v3384_v16  }
  0x34   : > { %440 = vperm.xlu1 %3115, %v3389_v17   ;;  %435 = vperm.xlu0 %3114, %v3392_v18  }
  0x38   : > { %450 = vperm.xlu1 %3115, %v3397_v19   ;;  %445 = vperm.xlu0 %3114, %v3400_v20  }
  0x3c   : > { %460 = vperm.xlu1 %3115, %v3405_v21   ;;  %455 = vperm.xlu0 %3114, %v3408_v22  }
  0x40   : > { %470 = vperm.xlu1 %3115, %v3413_v23   ;;  %465 = vperm.xlu0 %3114, %v3416_v24  }
  0x44   : > { %480 = vperm.xlu1 %3115, %v3421_v25   ;;  %475 = vperm.xlu0 %3114, %v3424_v26  }
  0x48   : > { %490 = vperm.xlu1 %3115, %v3429_v27   ;;  %485 = vperm.xlu0 %3114, %v3432_v28  }
  0x4c   : > { %500 = vperm.xlu1 %3115, %v3437_v29   ;;  %495 = vperm.xlu0 %3114, %v3440_v30  }
  0x50   : > { %510 = vperm.xlu1 %3115, %v3445_v31   ;;  %505 = vperm.xlu0 %3114, %v3448_v32  }
  0x54   : > { %3117 = vset.pattern.permute.xlu1 %v3273_v33  ;;  %3116 = vset.pattern.permute.xlu0 %v3273_v33 }
  0x55   : > { %518 = vperm.xlu1 %3117, %v3336_v4   ;;  %514 = vperm.xlu0 %3116, %v3328_v2  }
  0x59   : > { %522 = vperm.xlu1 %3117, %v3325_v1   ;;  %526 = vperm.xlu0 %3116, %v3333_v3  }
  0x5d   : > { %530 = vperm.xlu1 %3117, %v3344_v6   ;;  %534 = vperm.xlu0 %3116, %v3341_v5  }
  0x61   : > { %538 = vperm.xlu1 %3117, %v3352_v8   ;;  %542 = vperm.xlu0 %3116, %v3349_v7  }
  0x65   : > { %546 = vperm.xlu1 %3117, %v3360_v10   ;;  %550 = vperm.xlu0 %3116, %v3357_v9  }
  0x69   : > { %554 = vperm.xlu1 %3117, %v3368_v12   ;;  %558 = vperm.xlu0 %3116, %v3365_v11  }
  0x6d   : > { %562 = vperm.xlu1 %3117, %v3376_v14   ;;  %566 = vperm.xlu0 %3116, %v3373_v13  }
  0x71   : > { %570 = vperm.xlu1 %3117, %v3384_v16   ;;  %574 = vperm.xlu0 %3116, %v3381_v15  }
  0x75   : > { %578 = vperm.xlu1 %3117, %v3392_v18   ;;  %582 = vperm.xlu0 %3116, %v3389_v17  }
  0x79   : > { %586 = vperm.xlu1 %3117, %v3400_v20   ;;  %590 = vperm.xlu0 %3116, %v3397_v19  }
  0x7d   : > { %594 = vperm.xlu1 %3117, %v3408_v22   ;;  %598 = vperm.xlu0 %3116, %v3405_v21  }
  0x81   : > { %602 = vperm.xlu1 %3117, %v3416_v24   ;;  %606 = vperm.xlu0 %3116, %v3413_v23  }
  0x85   : > { %610 = vperm.xlu1 %3117, %v3424_v26   ;;  %614 = vperm.xlu0 %3116, %v3421_v25  }
  0x89   : > { %618 = vperm.xlu1 %3117, %v3432_v28   ;;  %622 = vperm.xlu0 %3116, %v3429_v27  }
  0x8d   : > { %626 = vperm.xlu1 %3117, %v3440_v30   ;;  %630 = vperm.xlu0 %3116, %v3437_v29  }
  0x91   : > { %634 = vperm.xlu1 %3117, %v3448_v32   ;;  %638 = vperm.xlu0 %3116, %v3445_v31  }
  0x93   : > { %v366_v52 = vpop.permute.xlu1 %365  ;;  %v356_v53 = vpop.permute.xlu0 %355 }
  0x94   : > { %v789_v54 = vsub.f32 %v366_v52, %v3491_v42  ;;  %v790_v55 = vsub.f32 %v366_v52, %v3493_v43  ;;  %v1565_v56 = vsub.f32 %v366_v52, %v3495_v44  ;;  %v1566_v57 = vsub.f32 %v366_v52, %v3497_v45 }
  0x95   : > { %3118 = vset.pattern.permute.xlu1 %v3274_v62  ;;  %v785_v63 = vsub.f32 %v356_v53, %v3491_v42  ;;  %v786_v0 = vsub.f32 %v356_v53, %v3493_v43  ;;  %v1561_v33 = vsub.f32 %v356_v53, %v3495_v44  ;;  %v1562_v38 = vsub.f32 %v356_v53, %v3497_v45 }
  0x96   : > { %3119 = vset.pattern.permute.xlu0 %v3274_v62  ;;  %v3525_v39 = vmul.f32 %v789_v54, %v789_v54  ;;  %v3527_v40 = vmul.f32 %v790_v55, %v790_v55  ;;  %v3529_v41 = vmul.f32 %v1565_v56, %v1565_v56  ;;  %v3531_v36 = vmul.f32 %v1566_v57, %v1566_v57 }
  0x97   : > { %642 = vperm.xlu1 %3118, %v3328_v2   ;;  %v371_v37 = vpop.permute.xlu1 %370  ;;  %v361_v46 = vpop.permute.xlu0 %360  ;;  %646 = vperm.xlu0 %3119, %v3336_v4   ;;  %v3543_v62 = vmul.f32 %v785_v63, %v785_v63  ;;  %v3545_v34 = vmul.f32 %v786_v0, %v786_v0  ;;  %v3547_v4 = vmul.f32 %v1561_v33, %v1561_v33 }
  0x98   : > { %5536 = vst [vmem:[#allocation8_spill] sm:$0xff] %v3525_v39  ;;  %5537 = vst [vmem:[#allocation9_spill] sm:$0xff] %v3527_v40  ;;  %v791_v47 = vsub.f32 %v371_v37, %v3491_v42  ;;  %v792_v52 = vsub.f32 %v371_v37, %v3493_v43  ;;  %v1567_v53 = vsub.f32 %v371_v37, %v3495_v44 }
  0x99   : > { %5538 = vst [vmem:[#allocation10_spill] sm:$0xff] %v3529_v41  ;;  %5539 = vst [vmem:[#allocation11_spill] sm:$0xff] %v3531_v36  ;;  %v1568_v54 = vsub.f32 %v371_v37, %v3497_v45  ;;  %v787_v55 = vsub.f32 %v361_v46, %v3491_v42  ;;  %v788_v56 = vsub.f32 %v361_v46, %v3493_v43 }
  0x9a   : > { %v1563_v57 = vsub.f32 %v361_v46, %v3495_v44  ;;  %v1564_v2 = vsub.f32 %v361_v46, %v3497_v45  ;;  %5540 = vst [vmem:[#allocation12_spill] sm:$0xff] %v3543_v62  ;;  %5541 = vst [vmem:[#allocation13_spill] sm:$0xff] %v3545_v34  ;;  %v3549_v35 = vmul.f32 %v1562_v38, %v1562_v38 }
  0x9b   : > { %5542 = vst [vmem:[#allocation14_spill] sm:$0xff] %v3547_v4  ;;  %v3551_v36 = vmul.f32 %v791_v47, %v791_v47  ;;  %v3553_v41 = vmul.f32 %v792_v52, %v792_v52  ;;  %v3555_v37 = vmul.f32 %v1567_v53, %v1567_v53  ;;  %v3557_v40 = vmul.f32 %v1568_v54, %v1568_v54  ;;  %v381_v39 = vpop.permute.xlu1 %380  ;;  %v376_v46 = vpop.permute.xlu0 %375 }
  0x9c   : > { %5543 = vst [vmem:[#allocation15_spill] sm:$0xff] %v3549_v35  ;;  %650 = vperm.xlu1 %3118, %v3325_v1   ;;  %658 = vperm.xlu0 %3119, %v3344_v6   ;;  %v795_v63 = vsub.f32 %v381_v39, %v3491_v42  ;;  %v796_v0 = vsub.f32 %v381_v39, %v3493_v43 }
  0x9d   : > { %v1571_v33 = vsub.f32 %v381_v39, %v3495_v44  ;;  %v1572_v38 = vsub.f32 %v381_v39, %v3497_v45  ;;  %v3565_v47 = vmul.f32 %v787_v55, %v787_v55  ;;  %v3567_v52 = vmul.f32 %v788_v56, %v788_v56 }
  0x9e   : > { %v3569_v53 = vmul.f32 %v1563_v57, %v1563_v57  ;;  %v3571_v54 = vmul.f32 %v1564_v2, %v1564_v2  ;;  %v793_v1 = vsub.f32 %v376_v46, %v3491_v42  ;;  %v794_v6 = vsub.f32 %v376_v46, %v3493_v43 }
  0x9f   : > { %v1569_v35 = vsub.f32 %v376_v46, %v3495_v44  ;;  %v1570_v4 = vsub.f32 %v376_v46, %v3497_v45  ;;  %v3577_v34 = vmul.f32 %v795_v63, %v795_v63  ;;  %v3579_v62 = vmul.f32 %v796_v0, %v796_v0  ;;  %v391_v56 = vpop.permute.xlu1 %390  ;;  %v386_v57 = vpop.permute.xlu0 %385 }
  0xa0   : > { %v3581_v39 = vmul.f32 %v1571_v33, %v1571_v33  ;;  %v3583_v55 = vmul.f32 %v1572_v38, %v1572_v38  ;;  %654 = vperm.xlu1 %3118, %v3333_v3   ;;  %666 = vperm.xlu0 %3119, %v3352_v8   ;;  %v799_v2 = vsub.f32 %v391_v56, %v3491_v42 }
  0xa1   : > { %5544 = vst [vmem:[#allocation16_spill] sm:$0xff] %v3577_v34  ;;  %5545 = vst [vmem:[#allocation17_spill] sm:$0xff] %v3579_v62  ;;  %v800_v61 = vsub.f32 %v391_v56, %v3493_v43  ;;  %v1575_v46 = vsub.f32 %v391_v56, %v3495_v44  ;;  %v1576_v63 = vsub.f32 %v391_v56, %v3497_v45 }
  0xa2   : > { %5546 = vst [vmem:[#allocation18_spill] sm:$0xff] %v3581_v39  ;;  %5547 = vst [vmem:[#allocation19_spill] sm:$0xff] %v3583_v55  ;;  %v797_v0 = vsub.f32 %v386_v57, %v3491_v42  ;;  %v798_v33 = vsub.f32 %v386_v57, %v3493_v43  ;;  %v1573_v38 = vsub.f32 %v386_v57, %v3495_v44 }
  0xa3   : > { %v1574_v3 = vsub.f32 %v386_v57, %v3497_v45  ;;  %v3595_v60 = vmul.f32 %v793_v1, %v793_v1  ;;  %v3597_v51 = vmul.f32 %v794_v6, %v794_v6  ;;  %v3599_v8 = vmul.f32 %v1569_v35, %v1569_v35  ;;  %v401_v34 = vpop.permute.xlu1 %400  ;;  %v396_v57 = vpop.permute.xlu0 %395 }
  0xa4   : > { %v3601_v50 = vmul.f32 %v1570_v4, %v1570_v4  ;;  %v3603_v55 = vmul.f32 %v799_v2, %v799_v2  ;;  %v3605_v39 = vmul.f32 %v800_v61, %v800_v61  ;;  %v3607_v56 = vmul.f32 %v1575_v46, %v1575_v46  ;;  %662 = vperm.xlu1 %3118, %v3341_v5  }
  0xa5   : > { %v3609_v62 = vmul.f32 %v1576_v63, %v1576_v63  ;;  %674 = vperm.xlu0 %3119, %v3360_v10   ;;  %v803_v1 = vsub.f32 %v401_v34, %v3491_v42  ;;  %v804_v35 = vsub.f32 %v401_v34, %v3493_v43  ;;  %v1579_v4 = vsub.f32 %v401_v34, %v3495_v44 }
  0xa6   : > { %5548 = vst [vmem:[#allocation20_spill] sm:$0xff] %v3603_v55  ;;  %5549 = vst [vmem:[#allocation21_spill] sm:$0xff] %v3605_v39  ;;  %v1580_v6 = vsub.f32 %v401_v34, %v3497_v45  ;;  %v3617_v61 = vmul.f32 %v797_v0, %v797_v0  ;;  %v3619_v2 = vmul.f32 %v798_v33, %v798_v33 }
  0xa7   : > { %5550 = vst [vmem:[#allocation22_spill] sm:$0xff] %v3607_v56  ;;  %5551 = vst [vmem:[#allocation23_spill] sm:$0xff] %v3609_v62  ;;  %v3621_v46 = vmul.f32 %v1573_v38, %v1573_v38  ;;  %v3623_v63 = vmul.f32 %v1574_v3, %v1574_v3  ;;  %v801_v5 = vsub.f32 %v396_v57, %v3491_v42  ;;  %v411_v33 = vpop.permute.xlu1 %410  ;;  %v406_v38 = vpop.permute.xlu0 %405 }
  0xa8   : > { %5552 = vst [vmem:[#allocation24_spill] sm:$0xff] %v3617_v61  ;;  %5553 = vst [vmem:[#allocation25_spill] sm:$0xff] %v3619_v2  ;;  %v802_v10 = vsub.f32 %v396_v57, %v3493_v43  ;;  %v1577_v62 = vsub.f32 %v396_v57, %v3495_v44  ;;  %v1578_v56 = vsub.f32 %v396_v57, %v3497_v45  ;;  %670 = vperm.xlu1 %3118, %v3349_v7  }
  0xa9   : > { %5554 = vst [vmem:[#allocation26_spill] sm:$0xff] %v3621_v46  ;;  %5555 = vst [vmem:[#allocation27_spill] sm:$0xff] %v3623_v63  ;;  %v3629_v39 = vmul.f32 %v803_v1, %v803_v1  ;;  %v3631_v55 = vmul.f32 %v804_v35, %v804_v35  ;;  %v3633_v34 = vmul.f32 %v1579_v4, %v1579_v4  ;;  %682 = vperm.xlu0 %3119, %v3368_v12  }
  0xaa   : > { %v3635_v0 = vmul.f32 %v1580_v6, %v1580_v6  ;;  %v807_v3 = vsub.f32 %v411_v33, %v3491_v42  ;;  %v808_v63 = vsub.f32 %v411_v33, %v3493_v43  ;;  %v1583_v57 = vsub.f32 %v411_v33, %v3495_v44 }
  0xab   : > { %5556 = vst [vmem:[#allocation28_spill] sm:$0xff] %v3629_v39  ;;  %5557 = vst [vmem:[#allocation29_spill] sm:$0xff] %v3631_v55  ;;  %v1584_v1 = vsub.f32 %v411_v33, %v3497_v45  ;;  %v805_v35 = vsub.f32 %v406_v38, %v3491_v42  ;;  %v806_v4 = vsub.f32 %v406_v38, %v3493_v43  ;;  %v421_v61 = vpop.permute.xlu1 %420 }
  0xac   : > { %5558 = vst [vmem:[#allocation30_spill] sm:$0xff] %v3633_v34  ;;  %5559 = vst [vmem:[#allocation31_spill] sm:$0xff] %v3635_v0  ;;  %v1581_v6 = vsub.f32 %v406_v38, %v3495_v44  ;;  %v1582_v7 = vsub.f32 %v406_v38, %v3497_v45  ;;  %v3647_v0 = vmul.f32 %v801_v5, %v801_v5  ;;  %678 = vperm.xlu1 %3118, %v3357_v9   ;;  %v416_v38 = vpop.permute.xlu0 %415 }
  0xad   : > { %v3649_v34 = vmul.f32 %v802_v10, %v802_v10  ;;  %v3651_v12 = vmul.f32 %v1577_v62, %v1577_v62  ;;  %v3653_v55 = vmul.f32 %v1578_v56, %v1578_v56  ;;  %v3655_v39 = vmul.f32 %v807_v3, %v807_v3  ;;  %690 = vperm.xlu0 %3119, %v3376_v14  }
  0xae   : > { %v3657_v46 = vmul.f32 %v808_v63, %v808_v63  ;;  %v3659_v33 = vmul.f32 %v1583_v57, %v1583_v57  ;;  %v3661_v2 = vmul.f32 %v1584_v1, %v1584_v1  ;;  %v811_v5 = vsub.f32 %v421_v61, %v3491_v42 }
  0xaf   : > { %5560 = vst [vmem:[#allocation32_spill] sm:$0xff] %v3655_v39  ;;  %v812_v62 = vsub.f32 %v421_v61, %v3493_v43  ;;  %v1587_v56 = vsub.f32 %v421_v61, %v3495_v44  ;;  %v1588_v10 = vsub.f32 %v421_v61, %v3497_v45  ;;  %v3669_v63 = vmul.f32 %v805_v35, %v805_v35 }
  0xb0   : > { %5561 = vst [vmem:[#allocation33_spill] sm:$0xff] %v3657_v46  ;;  %5562 = vst [vmem:[#allocation34_spill] sm:$0xff] %v3659_v33  ;;  %v3671_v3 = vmul.f32 %v806_v4, %v806_v4  ;;  %v3673_v57 = vmul.f32 %v1581_v6, %v1581_v6  ;;  %v3675_v1 = vmul.f32 %v1582_v7, %v1582_v7  ;;  %686 = vperm.xlu1 %3118, %v3365_v11   ;;  %v431_v4 = vpop.permute.xlu1 %430  ;;  %v426_v6 = vpop.permute.xlu0 %425 }
  0xb1   : > { %5563 = vst [vmem:[#allocation35_spill] sm:$0xff] %v3661_v2  ;;  %5564 = vst [vmem:[#allocation36_spill] sm:$0xff] %v3669_v63  ;;  %v809_v9 = vsub.f32 %v416_v38, %v3491_v42  ;;  %v810_v14 = vsub.f32 %v416_v38, %v3493_v43  ;;  %v1585_v2 = vsub.f32 %v416_v38, %v3495_v44  ;;  %698 = vperm.xlu0 %3119, %v3384_v16  }
  0xb2   : > { %5565 = vst [vmem:[#allocation37_spill] sm:$0xff] %v3671_v3  ;;  %5566 = vst [vmem:[#allocation38_spill] sm:$0xff] %v3673_v57  ;;  %v1586_v33 = vsub.f32 %v416_v38, %v3497_v45  ;;  %v3681_v46 = vmul.f32 %v811_v5, %v811_v5  ;;  %v3683_v39 = vmul.f32 %v812_v62, %v812_v62 }
  0xb3   : > { %5567 = vst [vmem:[#allocation39_spill] sm:$0xff] %v3675_v1  ;;  %v3685_v61 = vmul.f32 %v1587_v56, %v1587_v56  ;;  %v3687_v35 = vmul.f32 %v1588_v10, %v1588_v10  ;;  %v815_v7 = vsub.f32 %v431_v4, %v3491_v42  ;;  %v816_v1 = vsub.f32 %v431_v4, %v3493_v43 }
  0xb4   : > { %5568 = vst [vmem:[#allocation40_spill] sm:$0xff] %v3681_v46  ;;  %5569 = vst [vmem:[#allocation41_spill] sm:$0xff] %v3683_v39  ;;  %v1591_v38 = vsub.f32 %v431_v4, %v3495_v44  ;;  %v1592_v5 = vsub.f32 %v431_v4, %v3497_v45  ;;  %v813_v62 = vsub.f32 %v426_v6, %v3491_v42  ;;  %694 = vperm.xlu1 %3118, %v3373_v13   ;;  %v441_v63 = vpop.permute.xlu1 %440 }
  0xb5   : > { %5570 = vst [vmem:[#allocation42_spill] sm:$0xff] %v3685_v61  ;;  %5571 = vst [vmem:[#allocation43_spill] sm:$0xff] %v3687_v35  ;;  %v814_v56 = vsub.f32 %v426_v6, %v3493_v43  ;;  %v1589_v10 = vsub.f32 %v426_v6, %v3495_v44  ;;  %v1590_v11 = vsub.f32 %v426_v6, %v3497_v45  ;;  %v436_v6 = vpop.permute.xlu0 %435  ;;  %706 = vperm.xlu0 %3119, %v3392_v18  }
  0xb6   : > { %v3699_v35 = vmul.f32 %v809_v9, %v809_v9  ;;  %v3701_v61 = vmul.f32 %v810_v14, %v810_v14  ;;  %v3703_v16 = vmul.f32 %v1585_v2, %v1585_v2  ;;  %v3705_v39 = vmul.f32 %v1586_v33, %v1586_v33 }
  0xb7   : > { %v3707_v46 = vmul.f32 %v815_v7, %v815_v7  ;;  %v3709_v57 = vmul.f32 %v816_v1, %v816_v1  ;;  %v3711_v4 = vmul.f32 %v1591_v38, %v1591_v38  ;;  %v3713_v3 = vmul.f32 %v1592_v5, %v1592_v5 }
  0xb8   : > { %v819_v9 = vsub.f32 %v441_v63, %v3491_v42  ;;  %v820_v2 = vsub.f32 %v441_v63, %v3493_v43  ;;  %v1595_v33 = vsub.f32 %v441_v63, %v3495_v44  ;;  %v1596_v14 = vsub.f32 %v441_v63, %v3497_v45  ;;  %702 = vperm.xlu1 %3118, %v3381_v15  }
  0xb9   : > { %5572 = vst [vmem:[#allocation44_spill] sm:$0xff] %v3707_v46  ;;  %5573 = vst [vmem:[#allocation45_spill] sm:$0xff] %v3709_v57  ;;  %v3721_v1 = vmul.f32 %v813_v62, %v813_v62  ;;  %v3723_v7 = vmul.f32 %v814_v56, %v814_v56  ;;  %v3725_v38 = vmul.f32 %v1589_v10, %v1589_v10  ;;  %v451_v56 = vpop.permute.xlu1 %450  ;;  %v446_v10 = vpop.permute.xlu0 %445  ;;  %714 = vperm.xlu0 %3119, %v3400_v20  }
  0xba   : > { %5574 = vst [vmem:[#allocation46_spill] sm:$0xff] %v3711_v4  ;;  %5575 = vst [vmem:[#allocation47_spill] sm:$0xff] %v3713_v3  ;;  %v3727_v5 = vmul.f32 %v1590_v11, %v1590_v11  ;;  %v817_v13 = vsub.f32 %v436_v6, %v3491_v42  ;;  %v818_v18 = vsub.f32 %v436_v6, %v3493_v43 }
  0xbb   : > { %5576 = vst [vmem:[#allocation48_spill] sm:$0xff] %v3721_v1  ;;  %5577 = vst [vmem:[#allocation49_spill] sm:$0xff] %v3723_v7  ;;  %v1593_v3 = vsub.f32 %v436_v6, %v3495_v44  ;;  %v1594_v4 = vsub.f32 %v436_v6, %v3497_v45  ;;  %v3733_v57 = vmul.f32 %v819_v9, %v819_v9 }
  0xbc   : > { %5578 = vst [vmem:[#allocation50_spill] sm:$0xff] %v3725_v38  ;;  %5579 = vst [vmem:[#allocation51_spill] sm:$0xff] %v3727_v5  ;;  %v3735_v46 = vmul.f32 %v820_v2, %v820_v2  ;;  %v3737_v63 = vmul.f32 %v1595_v33, %v1595_v33  ;;  %v3739_v62 = vmul.f32 %v1596_v14, %v1596_v14  ;;  %710 = vperm.xlu1 %3118, %v3389_v17  }
  0xbd   : > { %5580 = vst [vmem:[#allocation52_spill] sm:$0xff] %v3733_v57  ;;  %v823_v11 = vsub.f32 %v451_v56, %v3491_v42  ;;  %v824_v5 = vsub.f32 %v451_v56, %v3493_v43  ;;  %v1599_v6 = vsub.f32 %v451_v56, %v3495_v44  ;;  %v1600_v9 = vsub.f32 %v451_v56, %v3497_v45  ;;  %v461_v1 = vpop.permute.xlu1 %460 }
  0xbe   : > { %5581 = vst [vmem:[#allocation53_spill] sm:$0xff] %v3735_v46  ;;  %5582 = vst [vmem:[#allocation54_spill] sm:$0xff] %v3737_v63  ;;  %v821_v2 = vsub.f32 %v446_v10, %v3491_v42  ;;  %v822_v33 = vsub.f32 %v446_v10, %v3493_v43  ;;  %v1597_v14 = vsub.f32 %v446_v10, %v3495_v44  ;;  %722 = vperm.xlu0 %3119, %v3408_v22  }
  0xbf   : > { %5583 = vst [vmem:[#allocation55_spill] sm:$0xff] %v3739_v62  ;;  %v1598_v15 = vsub.f32 %v446_v10, %v3497_v45  ;;  %v3751_v62 = vmul.f32 %v817_v13, %v817_v13  ;;  %v3753_v63 = vmul.f32 %v818_v18, %v818_v18  ;;  %v3755_v20 = vmul.f32 %v1593_v3, %v1593_v3  ;;  %v456_v10 = vpop.permute.xlu0 %455 }
  0xc0   : > { %v3757_v46 = vmul.f32 %v1594_v4, %v1594_v4  ;;  %v3759_v57 = vmul.f32 %v823_v11, %v823_v11  ;;  %v3761_v38 = vmul.f32 %v824_v5, %v824_v5  ;;  %v3763_v56 = vmul.f32 %v1599_v6, %v1599_v6  ;;  %718 = vperm.xlu1 %3118, %v3397_v19  }
  0xc1   : > { %v3765_v7 = vmul.f32 %v1600_v9, %v1600_v9  ;;  %v827_v13 = vsub.f32 %v461_v1, %v3491_v42  ;;  %v828_v3 = vsub.f32 %v461_v1, %v3493_v43  ;;  %v1603_v4 = vsub.f32 %v461_v1, %v3495_v44 }
  0xc2   : > { %5584 = vst [vmem:[#allocation56_spill] sm:$0xff] %v3759_v57  ;;  %5585 = vst [vmem:[#allocation57_spill] sm:$0xff] %v3761_v38  ;;  %v1604_v18 = vsub.f32 %v461_v1, %v3497_v45  ;;  %v3773_v5 = vmul.f32 %v821_v2, %v821_v2  ;;  %v3775_v11 = vmul.f32 %v822_v33, %v822_v33  ;;  %v471_v33 = vpop.permute.xlu1 %470  ;;  %730 = vperm.xlu0 %3119, %v3416_v24  }
  0xc3   : > { %5586 = vst [vmem:[#allocation58_spill] sm:$0xff] %v3763_v56  ;;  %5587 = vst [vmem:[#allocation59_spill] sm:$0xff] %v3765_v7  ;;  %v3777_v6 = vmul.f32 %v1597_v14, %v1597_v14  ;;  %v3779_v9 = vmul.f32 %v1598_v15, %v1598_v15  ;;  %v825_v17 = vsub.f32 %v456_v10, %v3491_v42  ;;  %v466_v14 = vpop.permute.xlu0 %465 }
  0xc4   : > { %5588 = vst [vmem:[#allocation60_spill] sm:$0xff] %v3773_v5  ;;  %5589 = vst [vmem:[#allocation61_spill] sm:$0xff] %v3775_v11  ;;  %v826_v22 = vsub.f32 %v456_v10, %v3493_v43  ;;  %v1601_v7 = vsub.f32 %v456_v10, %v3495_v44  ;;  %v1602_v56 = vsub.f32 %v456_v10, %v3497_v45  ;;  %726 = vperm.xlu1 %3118, %v3405_v21  }
  0xc5   : > { %5590 = vst [vmem:[#allocation62_spill] sm:$0xff] %v3777_v6  ;;  %5591 = vst [vmem:[#allocation63_spill] sm:$0xff] %v3779_v9  ;;  %v3785_v38 = vmul.f32 %v827_v13, %v827_v13  ;;  %v3787_v57 = vmul.f32 %v828_v3, %v828_v3  ;;  %v3789_v1 = vmul.f32 %v1603_v4, %v1603_v4 }
  0xc6   : > { %v3791_v2 = vmul.f32 %v1604_v18, %v1604_v18  ;;  %v831_v15 = vsub.f32 %v471_v33, %v3491_v42  ;;  %v832_v9 = vsub.f32 %v471_v33, %v3493_v43  ;;  %v1607_v10 = vsub.f32 %v471_v33, %v3495_v44  ;;  %v481_v5 = vpop.permute.xlu1 %480  ;;  %738 = vperm.xlu0 %3119, %v3424_v26  }
  0xc7   : > { %5592 = vst [vmem:[#allocation64_spill] sm:$0xff] %v3785_v38  ;;  %5593 = vst [vmem:[#allocation65_spill] sm:$0xff] %v3787_v57  ;;  %v1608_v13 = vsub.f32 %v471_v33, %v3497_v45  ;;  %v829_v3 = vsub.f32 %v466_v14, %v3491_v42  ;;  %v830_v4 = vsub.f32 %v466_v14, %v3493_v43 }
  0xc8   : > { %5594 = vst [vmem:[#allocation66_spill] sm:$0xff] %v3789_v1  ;;  %5595 = vst [vmem:[#allocation67_spill] sm:$0xff] %v3791_v2  ;;  %v1605_v18 = vsub.f32 %v466_v14, %v3495_v44  ;;  %v1606_v19 = vsub.f32 %v466_v14, %v3497_v45  ;;  %v3803_v2 = vmul.f32 %v825_v17, %v825_v17  ;;  %v476_v14 = vpop.permute.xlu0 %475  ;;  %734 = vperm.xlu1 %3118, %v3413_v23  }
  0xc9   : > { %v3805_v1 = vmul.f32 %v826_v22, %v826_v22  ;;  %v3807_v24 = vmul.f32 %v1601_v7, %v1601_v7  ;;  %v3809_v57 = vmul.f32 %v1602_v56, %v1602_v56  ;;  %v3811_v38 = vmul.f32 %v831_v15, %v831_v15 }
  0xca   : > { %v3813_v6 = vmul.f32 %v832_v9, %v832_v9  ;;  %v3815_v33 = vmul.f32 %v1607_v10, %v1607_v10  ;;  %v3817_v11 = vmul.f32 %v1608_v13, %v1608_v13  ;;  %v835_v17 = vsub.f32 %v481_v5, %v3491_v42  ;;  %746 = vperm.xlu0 %3119, %v3432_v28  }
  0xcb   : > { %5596 = vst [vmem:[#allocation68_spill] sm:$0xff] %v3811_v38  ;;  %v836_v7 = vsub.f32 %v481_v5, %v3493_v43  ;;  %v1611_v56 = vsub.f32 %v481_v5, %v3495_v44  ;;  %v1612_v22 = vsub.f32 %v481_v5, %v3497_v45  ;;  %v3825_v9 = vmul.f32 %v829_v3, %v829_v3 }
  0xcc   : > { %5597 = vst [vmem:[#allocation69_spill] sm:$0xff] %v3813_v6  ;;  %5598 = vst [vmem:[#allocation70_spill] sm:$0xff] %v3815_v33  ;;  %v3827_v15 = vmul.f32 %v830_v4, %v830_v4  ;;  %v3829_v10 = vmul.f32 %v1605_v18, %v1605_v18  ;;  %v3831_v13 = vmul.f32 %v1606_v19, %v1606_v19  ;;  %v491_v4 = vpop.permute.xlu1 %490  ;;  %v486_v18 = vpop.permute.xlu0 %485  ;;  %742 = vperm.xlu1 %3118, %v3421_v25  }
  0xcd   : > { %5599 = vst [vmem:[#allocation71_spill] sm:$0xff] %v3817_v11  ;;  %5600 = vst [vmem:[#allocation72_spill] sm:$0xff] %v3825_v9  ;;  %v833_v21 = vsub.f32 %v476_v14, %v3491_v42  ;;  %v834_v26 = vsub.f32 %v476_v14, %v3493_v43  ;;  %v1609_v11 = vsub.f32 %v476_v14, %v3495_v44 }
  0xce   : > { %5601 = vst [vmem:[#allocation73_spill] sm:$0xff] %v3827_v15  ;;  %5602 = vst [vmem:[#allocation74_spill] sm:$0xff] %v3829_v10  ;;  %v1610_v33 = vsub.f32 %v476_v14, %v3497_v45  ;;  %v3837_v6 = vmul.f32 %v835_v17, %v835_v17  ;;  %v3839_v38 = vmul.f32 %v836_v7, %v836_v7  ;;  %754 = vperm.xlu0 %3119, %v3440_v30  }
  0xcf   : > { %5603 = vst [vmem:[#allocation75_spill] sm:$0xff] %v3831_v13  ;;  %v3841_v5 = vmul.f32 %v1611_v56, %v1611_v56  ;;  %v3843_v3 = vmul.f32 %v1612_v22, %v1612_v22  ;;  %v839_v19 = vsub.f32 %v491_v4, %v3491_v42  ;;  %v840_v13 = vsub.f32 %v491_v4, %v3493_v43 }
  0xd0   : > { %5604 = vst [vmem:[#allocation76_spill] sm:$0xff] %v3837_v6  ;;  %5605 = vst [vmem:[#allocation77_spill] sm:$0xff] %v3839_v38  ;;  %v1615_v14 = vsub.f32 %v491_v4, %v3495_v44  ;;  %v1616_v17 = vsub.f32 %v491_v4, %v3497_v45  ;;  %v837_v7 = vsub.f32 %v486_v18, %v3491_v42  ;;  %v501_v9 = vpop.permute.xlu1 %500  ;;  %750 = vperm.xlu1 %3118, %v3429_v27  }
  0xd1   : > { %5606 = vst [vmem:[#allocation78_spill] sm:$0xff] %v3841_v5  ;;  %5607 = vst [vmem:[#allocation79_spill] sm:$0xff] %v3843_v3  ;;  %v838_v56 = vsub.f32 %v486_v18, %v3493_v43  ;;  %v1613_v22 = vsub.f32 %v486_v18, %v3495_v44  ;;  %v1614_v23 = vsub.f32 %v486_v18, %v3497_v45  ;;  %v496_v18 = vpop.permute.xlu0 %495 }
  0xd2   : > { %v3855_v3 = vmul.f32 %v833_v21, %v833_v21  ;;  %v3857_v5 = vmul.f32 %v834_v26, %v834_v26  ;;  %v3859_v28 = vmul.f32 %v1609_v11, %v1609_v11  ;;  %v3861_v38 = vmul.f32 %v1610_v33, %v1610_v33  ;;  %762 = vperm.xlu0 %3119, %v3448_v32  }
  0xd3   : > { %v3863_v6 = vmul.f32 %v839_v19, %v839_v19  ;;  %v3865_v10 = vmul.f32 %v840_v13, %v840_v13  ;;  %v3867_v4 = vmul.f32 %v1615_v14, %v1615_v14  ;;  %v3869_v15 = vmul.f32 %v1616_v17, %v1616_v17 }
  0xd4   : > { %v843_v21 = vsub.f32 %v501_v9, %v3491_v42  ;;  %v844_v11 = vsub.f32 %v501_v9, %v3493_v43  ;;  %v1619_v33 = vsub.f32 %v501_v9, %v3495_v44  ;;  %v1620_v26 = vsub.f32 %v501_v9, %v3497_v45  ;;  %758 = vperm.xlu1 %3118, %v3437_v29  }
  0xd5   : > { %5608 = vst [vmem:[#allocation80_spill] sm:$0xff] %v3863_v6  ;;  %5609 = vst [vmem:[#allocation81_spill] sm:$0xff] %v3865_v10  ;;  %v3877_v13 = vmul.f32 %v837_v7, %v837_v7  ;;  %v3879_v19 = vmul.f32 %v838_v56, %v838_v56  ;;  %v3881_v14 = vmul.f32 %v1613_v22, %v1613_v22  ;;  %v511_v56 = vpop.permute.xlu1 %510  ;;  %v506_v22 = vpop.permute.xlu0 %505 }
  0xd6   : > { %5610 = vst [vmem:[#allocation82_spill] sm:$0xff] %v3867_v4  ;;  %5611 = vst [vmem:[#allocation83_spill] sm:$0xff] %v3869_v15  ;;  %v3883_v17 = vmul.f32 %v1614_v23, %v1614_v23  ;;  %v841_v25 = vsub.f32 %v496_v18, %v3491_v42  ;;  %v842_v30 = vsub.f32 %v496_v18, %v3493_v43 }
  0xd7   : > { %5612 = vst [vmem:[#allocation84_spill] sm:$0xff] %v3881_v14  ;;  %v1617_v15 = vsub.f32 %v496_v18, %v3495_v44  ;;  %v1618_v4 = vsub.f32 %v496_v18, %v3497_v45  ;;  %v3889_v10 = vmul.f32 %v843_v21, %v843_v21  ;;  %v3891_v6 = vmul.f32 %v844_v11, %v844_v11 }
  0xd8   : > { %5613 = vst [vmem:[#allocation85_spill] sm:$0xff] %v3883_v17  ;;  %v3893_v9 = vmul.f32 %v1619_v33, %v1619_v33  ;;  %v3895_v7 = vmul.f32 %v1620_v26, %v1620_v26  ;;  %v847_v23 = vsub.f32 %v511_v56, %v3491_v42  ;;  %v848_v17 = vsub.f32 %v511_v56, %v3493_v43 }
  0xd9   : > { %5614 = vst [vmem:[#allocation86_spill] sm:$0xff] %v3889_v10  ;;  %5615 = vst [vmem:[#allocation87_spill] sm:$0xff] %v3891_v6  ;;  %v1623_v18 = vsub.f32 %v511_v56, %v3495_v44  ;;  %v1624_v21 = vsub.f32 %v511_v56, %v3497_v45  ;;  %v845_v11 = vsub.f32 %v506_v22, %v3491_v42  ;;  %766 = vperm.xlu1 %3118, %v3445_v31  }
  0xda   : > { %5616 = vst [vmem:[#allocation88_spill] sm:$0xff] %v3893_v9  ;;  %5617 = vst [vmem:[#allocation89_spill] sm:$0xff] %v3895_v7  ;;  %v846_v33 = vsub.f32 %v506_v22, %v3493_v43  ;;  %v1621_v26 = vsub.f32 %v506_v22, %v3495_v44  ;;  %v1622_v27 = vsub.f32 %v506_v22, %v3497_v45 }
  0xdb   : > { %v3907_v7 = vmul.f32 %v841_v25, %v841_v25  ;;  %v3909_v9 = vmul.f32 %v842_v30, %v842_v30  ;;  %v3911_v32 = vmul.f32 %v1617_v15, %v1617_v15  ;;  %v3913_v6 = vmul.f32 %v1618_v4, %v1618_v4  ;;  %v519_v4 = vpop.permute.xlu1 %518  ;;  %v515_v25 = vpop.permute.xlu0 %514 }
  0xdc   : > { %v3915_v10 = vmul.f32 %v847_v23, %v847_v23  ;;  %v3917_v14 = vmul.f32 %v848_v17, %v848_v17  ;;  %v3919_v56 = vmul.f32 %v1623_v18, %v1623_v18  ;;  %v3921_v42 = vmul.f32 %v1624_v21, %v1624_v21 }
  0xdd   : > { %v3924_v43 = vmul.f32 %v845_v11, %v845_v11  ;;  %v3926_v44 = vmul.f32 %v846_v33, %v846_v33  ;;  %v3928_v45 = vmul.f32 %v1621_v26, %v1621_v26  ;;  %v3930_v15 = vmul.f32 %v1622_v27, %v1622_v27 }
  0xde   : > { %5618 = vst [vmem:[#allocation90_spill] sm:$0xff] %v3915_v10  ;;  %5619 = vst [vmem:[#allocation91_spill] sm:$0xff] %v3917_v14  ;;  %v862_v30 = vsub.f32 %v519_v4, %v3501_v48  ;;  %v863_v17 = vsub.f32 %v519_v4, %v3503_v49  ;;  %v1638_v22 = vsub.f32 %v519_v4, %v3513_v58 }
  0xdf   : > { %5620 = vst [vmem:[#allocation92_spill] sm:$0xff] %v3919_v56  ;;  %5621 = vst [vmem:[#allocation93_spill] sm:$0xff] %v3921_v42  ;;  %v1639_v23 = vsub.f32 %v519_v4, %v3515_v59  ;;  %v860_v29 = vsub.f32 %v515_v25, %v3501_v48  ;;  %v861_v18 = vsub.f32 %v515_v25, %v3503_v49 }
  0xe0   : > { %5622 = vst [vmem:[#allocation94_spill] sm:$0xff] %v3926_v44  ;;  %5623 = vst [vmem:[#allocation95_spill] sm:$0xff] %v3928_v45  ;;  %v1636_v21 = vsub.f32 %v515_v25, %v3513_v58  ;;  %v1637_v11 = vsub.f32 %v515_v25, %v3515_v59  ;;  %v1065_v33 = vmul.f32 %v862_v30, %v862_v30  ;;  %v527_v45 = vpop.permute.xlu0 %526 }
  0xe1   : > { %5624 = vst [vmem:[#allocation96_spill] sm:$0xff] %v3930_v15  ;;  %v1066_v26 = vmul.f32 %v863_v17, %v863_v17  ;;  %v1841_v27 = vmul.f32 %v1638_v22, %v1638_v22  ;;  %v1842_v42 = vmul.f32 %v1639_v23, %v1639_v23  ;;  %v3941_v56 = vmul.f32 %v860_v29, %v860_v29  ;;  %v523_v15 = vpop.permute.xlu1 %522 }
  0xe2   : > { %v3943_v14 = vmul.f32 %v861_v18, %v861_v18  ;;  %v3945_v10 = vmul.f32 %v1636_v21, %v1636_v21  ;;  %v3947_v4 = vmul.f32 %v1637_v11, %v1637_v11  ;;  %v3950_v44 = vadd.f32 %v1065_v33, %v3565_v47 }
  0xe3   : > { %v3953_v25 = vadd.f32 %v1066_v26, %v3567_v52  ;;  %v3956_v30 = vadd.f32 %v1841_v27, %v3569_v53  ;;  %v3959_v31 = vadd.f32 %v1842_v42, %v3571_v54  ;;  %v864_v17 = vsub.f32 %v523_v15, %v3501_v48 }
  0xe4   : > { %5625 = vst [vmem:[#allocation97_spill] sm:$0xff] %v3950_v44  ;;  %v865_v22 = vsub.f32 %v523_v15, %v3503_v49  ;;  %v1640_v23 = vsub.f32 %v523_v15, %v3513_v58  ;;  %v1641_v29 = vsub.f32 %v523_v15, %v3515_v59  ;;  %v866_v47 = vsub.f32 %v527_v45, %v3501_v48  ;;  %v535_v26 = vpop.permute.xlu0 %534 }
  0xe5   : > { %5626 = vst [vmem:[#allocation98_spill] sm:$0xff] %v3953_v25  ;;  %5627 = vst [vmem:[#allocation99_spill] sm:$0xff] %v3956_v30  ;;  %v867_v18 = vsub.f32 %v527_v45, %v3503_v49  ;;  %v1642_v52 = vsub.f32 %v527_v45, %v3513_v58  ;;  %v1643_v53 = vsub.f32 %v527_v45, %v3515_v59  ;;  %v531_v33 = vpop.permute.xlu1 %530 }
  0xe6   : > { %5628 = vst [vmem:[#allocation100_spill] sm:$0xff] %v3959_v31  ;;  %v3969_v21 = vmul.f32 %v864_v17, %v864_v17  ;;  %v3971_v54 = vmul.f32 %v865_v22, %v865_v22  ;;  %v3973_v42 = vmul.f32 %v1640_v23, %v1640_v23  ;;  %v3975_v11 = vmul.f32 %v1641_v29, %v1641_v29 }
  0xe7   : > { %v1069_v27 = vmul.f32 %v866_v47, %v866_v47  ;;  %v1070_v15 = vmul.f32 %v867_v18, %v867_v18  ;;  %v1845_v31 = vmul.f32 %v1642_v52, %v1642_v52  ;;  %v1846_v30 = vmul.f32 %v1643_v53, %v1643_v53 }
  0xe8   : > { %5629 = vst [vmem:[#allocation101_spill] sm:$0xff] %v3971_v54  ;;  %5630 = vst [vmem:[#allocation102_spill] sm:$0xff] %v3973_v42  ;;  %v868_v25 = vsub.f32 %v531_v33, %v3501_v48  ;;  %v869_v44 = vsub.f32 %v531_v33, %v3503_v49  ;;  %v1644_v45 = vsub.f32 %v531_v33, %v3513_v58  ;;  %v543_v54 = vpop.permute.xlu0 %542 }
  0xe9   : > { %5631 = vst [vmem:[#allocation103_spill] sm:$0xff] %v3975_v11  ;;  %v1645_v17 = vsub.f32 %v531_v33, %v3515_v59  ;;  %v3982_v22 = vadd.f32 %v1069_v27, %v3551_v36  ;;  %v3985_v23 = vadd.f32 %v1070_v15, %v3553_v41  ;;  %v3988_v29 = vadd.f32 %v1845_v31, %v3555_v37  ;;  %v539_v42 = vpop.permute.xlu1 %538 }
  0xea   : > { %v3991_v47 = vadd.f32 %v1846_v30, %v3557_v40  ;;  %v1071_v18 = vmul.f32 %v868_v25, %v868_v25  ;;  %v1072_v52 = vmul.f32 %v869_v44, %v869_v44  ;;  %v1847_v53 = vmul.f32 %v1644_v45, %v1644_v45 }
  0xeb   : > { %5632 = vst [vmem:[#allocation104_spill] sm:$0xff] %v3982_v22  ;;  %5633 = vst [vmem:[#allocation105_spill] sm:$0xff] %v3985_v23  ;;  %v1848_v11 = vmul.f32 %v1645_v17, %v1645_v17  ;;  %v870_v33 = vsub.f32 %v535_v26, %v3501_v48  ;;  %v871_v36 = vsub.f32 %v535_v26, %v3503_v49 }
  0xec   : > { %5634 = vst [vmem:[#allocation106_spill] sm:$0xff] %v3988_v29  ;;  %5635 = vst [vmem:[#allocation107_spill] sm:$0xff] %v3991_v47  ;;  %v1646_v27 = vsub.f32 %v535_v26, %v3513_v58  ;;  %v1647_v41 = vsub.f32 %v535_v26, %v3515_v59  ;;  %v3998_v37 = vadd.f32 %v1071_v18, %v3595_v60  ;;  %v551_v22 = vpop.permute.xlu0 %550 }
  0xed   : > { %v4001_v40 = vadd.f32 %v1072_v52, %v3597_v51  ;;  %v4004_v44 = vadd.f32 %v1847_v53, %v3599_v8  ;;  %v4007_v25 = vadd.f32 %v1848_v11, %v3601_v50  ;;  %v1073_v30 = vmul.f32 %v870_v33, %v870_v33  ;;  %v547_v51 = vpop.permute.xlu1 %546  ;;  %v5637_v52 = vld [vmem:[#allocation16_spill] sm:$0xff]  ;;  %v5639_v8 = vld [vmem:[#allocation17_spill] sm:$0xff]  ;;  %v5641_v50 = vld [vmem:[#allocation18_spill] sm:$0xff] }
  0xee   : > { %v1074_v31 = vmul.f32 %v871_v36, %v871_v36  ;;  %v1849_v15 = vmul.f32 %v1646_v27, %v1646_v27  ;;  %v1850_v45 = vmul.f32 %v1647_v41, %v1647_v41  ;;  %v872_v17 = vsub.f32 %v539_v42, %v3501_v48  ;;  %v5643_v33 = vld [vmem:[#allocation19_spill] sm:$0xff] }
  0xef   : > { %5636 = vst [vmem:[#allocation108_spill] sm:$0xff] %v4007_v25  ;;  %v873_v26 = vsub.f32 %v539_v42, %v3503_v49  ;;  %v1648_v60 = vsub.f32 %v539_v42, %v3513_v58  ;;  %v1649_v18 = vsub.f32 %v539_v42, %v3515_v59  ;;  %v4014_v47 = vadd.f32 %v1073_v30, %v5637_v52  ;;  %v5645_v52 = vld [vmem:[#allocation24_spill] sm:$0xff] }
  0xf0   : > { %v4017_v53 = vadd.f32 %v1074_v31, %v5639_v8  ;;  %v4020_v11 = vadd.f32 %v1849_v15, %v5641_v50  ;;  %v4023_v36 = vadd.f32 %v1850_v45, %v5643_v33  ;;  %v1075_v27 = vmul.f32 %v872_v17, %v872_v17  ;;  %v5647_v15 = vld [vmem:[#allocation25_spill] sm:$0xff]  ;;  %v5649_v45 = vld [vmem:[#allocation26_spill] sm:$0xff] }
  0xf1   : > { %5638 = vst [vmem:[#allocation16_spill] sm:$0xff] %v4014_v47  ;;  %v1076_v41 = vmul.f32 %v873_v26, %v873_v26  ;;  %v1851_v29 = vmul.f32 %v1648_v60, %v1648_v60  ;;  %v1852_v23 = vmul.f32 %v1649_v18, %v1649_v18  ;;  %v874_v42 = vsub.f32 %v543_v54, %v3501_v48  ;;  %v5651_v26 = vld [vmem:[#allocation27_spill] sm:$0xff] }
  0xf2   : > { %5640 = vst [vmem:[#allocation17_spill] sm:$0xff] %v4017_v53  ;;  %5642 = vst [vmem:[#allocation18_spill] sm:$0xff] %v4020_v11  ;;  %v875_v25 = vsub.f32 %v543_v54, %v3503_v49  ;;  %v1650_v30 = vsub.f32 %v543_v54, %v3513_v58  ;;  %v1651_v31 = vsub.f32 %v543_v54, %v3515_v59  ;;  %v555_v53 = vpop.permute.xlu1 %554 }
  0xf3   : > { %5644 = vst [vmem:[#allocation19_spill] sm:$0xff] %v4023_v36  ;;  %v4030_v8 = vadd.f32 %v1075_v27, %v5645_v52  ;;  %v4033_v50 = vadd.f32 %v1076_v41, %v5647_v15  ;;  %v4036_v17 = vadd.f32 %v1851_v29, %v5649_v45  ;;  %v4039_v60 = vadd.f32 %v1852_v23, %v5651_v26  ;;  %v5653_v52 = vld [vmem:[#allocation20_spill] sm:$0xff]  ;;  %v5655_v29 = vld [vmem:[#allocation21_spill] sm:$0xff]  ;;  %v5657_v23 = vld [vmem:[#allocation22_spill] sm:$0xff] }
  0xf4   : > { %v1077_v18 = vmul.f32 %v874_v42, %v874_v42  ;;  %v1078_v33 = vmul.f32 %v875_v25, %v875_v25  ;;  %v1853_v36 = vmul.f32 %v1650_v30, %v1650_v30  ;;  %v1854_v11 = vmul.f32 %v1651_v31, %v1651_v31  ;;  %v5659_v25 = vld [vmem:[#allocation23_spill] sm:$0xff] }
  0xf5   : > { %5646 = vst [vmem:[#allocation24_spill] sm:$0xff] %v4030_v8  ;;  %5648 = vst [vmem:[#allocation25_spill] sm:$0xff] %v4033_v50  ;;  %v876_v47 = vsub.f32 %v547_v51, %v3501_v48  ;;  %v877_v54 = vsub.f32 %v547_v51, %v3503_v49  ;;  %v1652_v27 = vsub.f32 %v547_v51, %v3513_v58  ;;  %v559_v50 = vpop.permute.xlu0 %558 }
  0xf6   : > { %5650 = vst [vmem:[#allocation26_spill] sm:$0xff] %v4036_v17  ;;  %5652 = vst [vmem:[#allocation27_spill] sm:$0xff] %v4039_v60  ;;  %v1653_v41 = vsub.f32 %v547_v51, %v3515_v59  ;;  %v4046_v15 = vadd.f32 %v1077_v18, %v5653_v52  ;;  %v4049_v45 = vadd.f32 %v1078_v33, %v5655_v29 }
  0xf7   : > { %v4052_v42 = vadd.f32 %v1853_v36, %v5657_v23  ;;  %v4055_v30 = vadd.f32 %v1854_v11, %v5659_v25  ;;  %v1079_v31 = vmul.f32 %v876_v47, %v876_v47  ;;  %v1080_v26 = vmul.f32 %v877_v54, %v877_v54  ;;  %v563_v23 = vpop.permute.xlu1 %562 }
  0xf8   : > { %5654 = vst [vmem:[#allocation20_spill] sm:$0xff] %v4046_v15  ;;  %5656 = vst [vmem:[#allocation21_spill] sm:$0xff] %v4049_v45  ;;  %v1855_v60 = vmul.f32 %v1652_v27, %v1652_v27  ;;  %v1856_v17 = vmul.f32 %v1653_v41, %v1653_v41  ;;  %v878_v8 = vsub.f32 %v551_v22, %v3501_v48 }
  0xf9   : > { %5658 = vst [vmem:[#allocation22_spill] sm:$0xff] %v4052_v42  ;;  %5660 = vst [vmem:[#allocation23_spill] sm:$0xff] %v4055_v30  ;;  %v879_v51 = vsub.f32 %v551_v22, %v3503_v49  ;;  %v1654_v18 = vsub.f32 %v551_v22, %v3513_v58  ;;  %v1655_v33 = vsub.f32 %v551_v22, %v3515_v59  ;;  %v567_v45 = vpop.permute.xlu0 %566 }
  0xfa   : > { %v4062_v52 = vadd.f32 %v1079_v31, %v3647_v0  ;;  %v4065_v36 = vadd.f32 %v1080_v26, %v3649_v34  ;;  %v4068_v47 = vadd.f32 %v1855_v60, %v3651_v12  ;;  %v4071_v11 = vadd.f32 %v1856_v17, %v3653_v55  ;;  %v5661_v31 = vld [vmem:[#allocation28_spill] sm:$0xff]  ;;  %v5663_v12 = vld [vmem:[#allocation29_spill] sm:$0xff]  ;;  %v5665_v55 = vld [vmem:[#allocation30_spill] sm:$0xff] }
  0xfb   : > { %v1081_v54 = vmul.f32 %v878_v8, %v878_v8  ;;  %v1082_v27 = vmul.f32 %v879_v51, %v879_v51  ;;  %v1857_v41 = vmul.f32 %v1654_v18, %v1654_v18  ;;  %v1858_v29 = vmul.f32 %v1655_v33, %v1655_v33  ;;  %v5667_v17 = vld [vmem:[#allocation31_spill] sm:$0xff] }
  0xfc   : > { %v880_v25 = vsub.f32 %v555_v53, %v3501_v48  ;;  %v881_v22 = vsub.f32 %v555_v53, %v3503_v49  ;;  %v1656_v0 = vsub.f32 %v555_v53, %v3513_v58  ;;  %v1657_v34 = vsub.f32 %v555_v53, %v3515_v59 }
  0xfd   : > { %v4078_v26 = vadd.f32 %v1081_v54, %v5661_v31  ;;  %v4081_v60 = vadd.f32 %v1082_v27, %v5663_v12  ;;  %v4084_v8 = vadd.f32 %v1857_v41, %v5665_v55  ;;  %v4087_v51 = vadd.f32 %v1858_v29, %v5667_v17  ;;  %v5669_v31 = vld [vmem:[#allocation36_spill] sm:$0xff]  ;;  %v5671_v41 = vld [vmem:[#allocation37_spill] sm:$0xff]  ;;  %v5673_v29 = vld [vmem:[#allocation38_spill] sm:$0xff] }
  0xfe   : > { %v1083_v18 = vmul.f32 %v880_v25, %v880_v25  ;;  %v1084_v33 = vmul.f32 %v881_v22, %v881_v22  ;;  %v1859_v30 = vmul.f32 %v1656_v0, %v1656_v0  ;;  %v1860_v42 = vmul.f32 %v1657_v34, %v1657_v34  ;;  %v5675_v22 = vld [vmem:[#allocation39_spill] sm:$0xff] }
  0xff   : > { %5662 = vst [vmem:[#allocation28_spill] sm:$0xff] %v4078_v26  ;;  %5664 = vst [vmem:[#allocation29_spill] sm:$0xff] %v4081_v60  ;;  %v882_v15 = vsub.f32 %v559_v50, %v3501_v48  ;;  %v883_v53 = vsub.f32 %v559_v50, %v3503_v49  ;;  %v1658_v54 = vsub.f32 %v559_v50, %v3513_v58  ;;  %v571_v60 = vpop.permute.xlu1 %570 }
 0x100   : > { %5666 = vst [vmem:[#allocation30_spill] sm:$0xff] %v4084_v8  ;;  %5668 = vst [vmem:[#allocation31_spill] sm:$0xff] %v4087_v51  ;;  %v1659_v27 = vsub.f32 %v559_v50, %v3515_v59  ;;  %v4094_v12 = vadd.f32 %v1083_v18, %v5669_v31  ;;  %v4097_v55 = vadd.f32 %v1084_v33, %v5671_v41  ;;  %v5677_v31 = vld [vmem:[#allocation32_spill] sm:$0xff] }
 0x101   : > { %v4100_v25 = vadd.f32 %v1859_v30, %v5673_v29  ;;  %v4103_v0 = vadd.f32 %v1860_v42, %v5675_v22  ;;  %v1085_v34 = vmul.f32 %v882_v15, %v882_v15  ;;  %v1086_v17 = vmul.f32 %v883_v53, %v883_v53  ;;  %v5679_v30 = vld [vmem:[#allocation33_spill] sm:$0xff]  ;;  %v5681_v42 = vld [vmem:[#allocation34_spill] sm:$0xff]  ;;  %v5683_v53 = vld [vmem:[#allocation35_spill] sm:$0xff] }
 0x102   : > { %5670 = vst [vmem:[#allocation36_spill] sm:$0xff] %v4094_v12  ;;  %5672 = vst [vmem:[#allocation37_spill] sm:$0xff] %v4097_v55  ;;  %v1861_v51 = vmul.f32 %v1658_v54, %v1658_v54  ;;  %v1862_v8 = vmul.f32 %v1659_v27, %v1659_v27  ;;  %v884_v26 = vsub.f32 %v563_v23, %v3501_v48  ;;  %v575_v55 = vpop.permute.xlu0 %574 }
 0x103   : > { %5674 = vst [vmem:[#allocation38_spill] sm:$0xff] %v4100_v25  ;;  %5676 = vst [vmem:[#allocation39_spill] sm:$0xff] %v4103_v0  ;;  %v885_v50 = vsub.f32 %v563_v23, %v3503_v49  ;;  %v1660_v18 = vsub.f32 %v563_v23, %v3513_v58  ;;  %v1661_v33 = vsub.f32 %v563_v23, %v3515_v59 }
 0x104   : > { %v4110_v41 = vadd.f32 %v1085_v34, %v5677_v31  ;;  %v4113_v29 = vadd.f32 %v1086_v17, %v5679_v30  ;;  %v4116_v15 = vadd.f32 %v1861_v51, %v5681_v42  ;;  %v4119_v54 = vadd.f32 %v1862_v8, %v5683_v53  ;;  %v579_v42 = vpop.permute.xlu1 %578 }
 0x105   : > { %v1087_v27 = vmul.f32 %v884_v26, %v884_v26  ;;  %v1088_v22 = vmul.f32 %v885_v50, %v885_v50  ;;  %v1863_v0 = vmul.f32 %v1660_v18, %v1660_v18  ;;  %v1864_v25 = vmul.f32 %v1661_v33, %v1661_v33 }
 0x106   : > { %5678 = vst [vmem:[#allocation32_spill] sm:$0xff] %v4110_v41  ;;  %5680 = vst [vmem:[#allocation33_spill] sm:$0xff] %v4113_v29  ;;  %v886_v12 = vsub.f32 %v567_v45, %v3501_v48  ;;  %v887_v23 = vsub.f32 %v567_v45, %v3503_v49  ;;  %v1662_v34 = vsub.f32 %v567_v45, %v3513_v58  ;;  %v583_v29 = vpop.permute.xlu0 %582 }
 0x107   : > { %5682 = vst [vmem:[#allocation34_spill] sm:$0xff] %v4116_v15  ;;  %5684 = vst [vmem:[#allocation35_spill] sm:$0xff] %v4119_v54  ;;  %v1663_v17 = vsub.f32 %v567_v45, %v3515_v59  ;;  %v4126_v31 = vadd.f32 %v1087_v27, %v3699_v35  ;;  %v4129_v51 = vadd.f32 %v1088_v22, %v3701_v61  ;;  %v5686_v27 = vld [vmem:[#allocation40_spill] sm:$0xff] }
 0x108   : > { %v4132_v26 = vadd.f32 %v1863_v0, %v3703_v16  ;;  %v4135_v8 = vadd.f32 %v1864_v25, %v3705_v39  ;;  %v1089_v50 = vmul.f32 %v886_v12, %v886_v12  ;;  %v1090_v18 = vmul.f32 %v887_v23, %v887_v23  ;;  %v5688_v16 = vld [vmem:[#allocation41_spill] sm:$0xff]  ;;  %v5690_v39 = vld [vmem:[#allocation42_spill] sm:$0xff]  ;;  %v5692_v25 = vld [vmem:[#allocation43_spill] sm:$0xff] }
 0x109   : > { %v1865_v33 = vmul.f32 %v1662_v34, %v1662_v34  ;;  %v1866_v30 = vmul.f32 %v1663_v17, %v1663_v17  ;;  %v888_v53 = vsub.f32 %v571_v60, %v3501_v48  ;;  %v889_v45 = vsub.f32 %v571_v60, %v3503_v49 }
 0x10a   : > { %5685 = vst [vmem:[#allocation109_spill] sm:$0xff] %v4135_v8  ;;  %v1664_v35 = vsub.f32 %v571_v60, %v3513_v58  ;;  %v1665_v61 = vsub.f32 %v571_v60, %v3515_v59  ;;  %v4142_v22 = vadd.f32 %v1089_v50, %v5686_v27  ;;  %v4145_v0 = vadd.f32 %v1090_v18, %v5688_v16  ;;  %v5694_v27 = vld [vmem:[#allocation48_spill] sm:$0xff] }
 0x10b   : > { %v4148_v12 = vadd.f32 %v1865_v33, %v5690_v39  ;;  %v4151_v23 = vadd.f32 %v1866_v30, %v5692_v25  ;;  %v1091_v34 = vmul.f32 %v888_v53, %v888_v53  ;;  %v1092_v17 = vmul.f32 %v889_v45, %v889_v45  ;;  %v5696_v33 = vld [vmem:[#allocation49_spill] sm:$0xff]  ;;  %v5698_v30 = vld [vmem:[#allocation50_spill] sm:$0xff]  ;;  %v5700_v45 = vld [vmem:[#allocation51_spill] sm:$0xff] }
 0x10c   : > { %5687 = vst [vmem:[#allocation40_spill] sm:$0xff] %v4142_v22  ;;  %5689 = vst [vmem:[#allocation41_spill] sm:$0xff] %v4145_v0  ;;  %v1867_v54 = vmul.f32 %v1664_v35, %v1664_v35  ;;  %v1868_v15 = vmul.f32 %v1665_v61, %v1665_v61  ;;  %v890_v41 = vsub.f32 %v575_v55, %v3501_v48  ;;  %v587_v0 = vpop.permute.xlu1 %586 }
 0x10d   : > { %5691 = vst [vmem:[#allocation42_spill] sm:$0xff] %v4148_v12  ;;  %5693 = vst [vmem:[#allocation43_spill] sm:$0xff] %v4151_v23  ;;  %v891_v60 = vsub.f32 %v575_v55, %v3503_v49  ;;  %v1666_v50 = vsub.f32 %v575_v55, %v3513_v58  ;;  %v1667_v18 = vsub.f32 %v575_v55, %v3515_v59 }
 0x10e   : > { %v4158_v16 = vadd.f32 %v1091_v34, %v5694_v27  ;;  %v4161_v39 = vadd.f32 %v1092_v17, %v5696_v33  ;;  %v4164_v53 = vadd.f32 %v1867_v54, %v5698_v30  ;;  %v4167_v35 = vadd.f32 %v1868_v15, %v5700_v45  ;;  %v5702_v27 = vld [vmem:[#allocation44_spill] sm:$0xff]  ;;  %v5704_v54 = vld [vmem:[#allocation45_spill] sm:$0xff]  ;;  %v5706_v15 = vld [vmem:[#allocation46_spill] sm:$0xff] }
 0x10f   : > { %v1093_v61 = vmul.f32 %v890_v41, %v890_v41  ;;  %v1094_v25 = vmul.f32 %v891_v60, %v891_v60  ;;  %v1869_v23 = vmul.f32 %v1666_v50, %v1666_v50  ;;  %v1870_v12 = vmul.f32 %v1667_v18, %v1667_v18  ;;  %v5708_v60 = vld [vmem:[#allocation47_spill] sm:$0xff] }
 0x110   : > { %5695 = vst [vmem:[#allocation48_spill] sm:$0xff] %v4158_v16  ;;  %5697 = vst [vmem:[#allocation49_spill] sm:$0xff] %v4161_v39  ;;  %v892_v22 = vsub.f32 %v579_v42, %v3501_v48  ;;  %v893_v55 = vsub.f32 %v579_v42, %v3503_v49  ;;  %v1668_v34 = vsub.f32 %v579_v42, %v3513_v58  ;;  %v591_v39 = vpop.permute.xlu0 %590 }
 0x111   : > { %5699 = vst [vmem:[#allocation50_spill] sm:$0xff] %v4164_v53  ;;  %5701 = vst [vmem:[#allocation51_spill] sm:$0xff] %v4167_v35  ;;  %v1669_v17 = vsub.f32 %v579_v42, %v3515_v59  ;;  %v4174_v33 = vadd.f32 %v1093_v61, %v5702_v27  ;;  %v4177_v30 = vadd.f32 %v1094_v25, %v5704_v54 }
 0x112   : > { %v4180_v41 = vadd.f32 %v1869_v23, %v5706_v15  ;;  %v4183_v50 = vadd.f32 %v1870_v12, %v5708_v60  ;;  %v1095_v18 = vmul.f32 %v892_v22, %v892_v22  ;;  %v1096_v45 = vmul.f32 %v893_v55, %v893_v55  ;;  %v595_v15 = vpop.permute.xlu1 %594 }
 0x113   : > { %5703 = vst [vmem:[#allocation44_spill] sm:$0xff] %v4174_v33  ;;  %5705 = vst [vmem:[#allocation45_spill] sm:$0xff] %v4177_v30  ;;  %v1871_v35 = vmul.f32 %v1668_v34, %v1668_v34  ;;  %v1872_v53 = vmul.f32 %v1669_v17, %v1669_v17  ;;  %v894_v16 = vsub.f32 %v583_v29, %v3501_v48 }
 0x114   : > { %5707 = vst [vmem:[#allocation46_spill] sm:$0xff] %v4180_v41  ;;  %5709 = vst [vmem:[#allocation47_spill] sm:$0xff] %v4183_v50  ;;  %v895_v42 = vsub.f32 %v583_v29, %v3503_v49  ;;  %v1670_v61 = vsub.f32 %v583_v29, %v3513_v58  ;;  %v1671_v25 = vsub.f32 %v583_v29, %v3515_v59  ;;  %v599_v30 = vpop.permute.xlu0 %598 }
 0x115   : > { %v4190_v27 = vadd.f32 %v1095_v18, %v3751_v62  ;;  %v4193_v23 = vadd.f32 %v1096_v45, %v3753_v63  ;;  %v4196_v22 = vadd.f32 %v1871_v35, %v3755_v20  ;;  %v4199_v12 = vadd.f32 %v1872_v53, %v3757_v46  ;;  %v5714_v18 = vld [vmem:[#allocation52_spill] sm:$0xff]  ;;  %v5716_v20 = vld [vmem:[#allocation53_spill] sm:$0xff]  ;;  %v5718_v46 = vld [vmem:[#allocation54_spill] sm:$0xff] }
 0x116   : > { %v1097_v55 = vmul.f32 %v894_v16, %v894_v16  ;;  %v1098_v34 = vmul.f32 %v895_v42, %v895_v42  ;;  %v1873_v17 = vmul.f32 %v1670_v61, %v1670_v61  ;;  %v1874_v54 = vmul.f32 %v1671_v25, %v1671_v25  ;;  %v5720_v53 = vld [vmem:[#allocation55_spill] sm:$0xff] }
 0x117   : > { %5710 = vst [vmem:[#allocation110_spill] sm:$0xff] %v4190_v27  ;;  %5711 = vst [vmem:[#allocation111_spill] sm:$0xff] %v4193_v23  ;;  %v896_v60 = vsub.f32 %v587_v0, %v3501_v48  ;;  %v897_v29 = vsub.f32 %v587_v0, %v3503_v49  ;;  %v1672_v62 = vsub.f32 %v587_v0, %v3513_v58 }
 0x118   : > { %5712 = vst [vmem:[#allocation112_spill] sm:$0xff] %v4196_v22  ;;  %5713 = vst [vmem:[#allocation113_spill] sm:$0xff] %v4199_v12  ;;  %v1673_v63 = vsub.f32 %v587_v0, %v3515_v59  ;;  %v4206_v45 = vadd.f32 %v1097_v55, %v5714_v18  ;;  %v4209_v35 = vadd.f32 %v1098_v34, %v5716_v20  ;;  %v5722_v18 = vld [vmem:[#allocation60_spill] sm:$0xff]  ;;  %v5836_v22 = vld [vmem:[#allocation11_spill] sm:$0xff] }
 0x119   : > { %v4212_v16 = vadd.f32 %v1873_v17, %v5718_v46  ;;  %v4215_v42 = vadd.f32 %v1874_v54, %v5720_v53  ;;  %v1099_v61 = vmul.f32 %v896_v60, %v896_v60  ;;  %v1100_v25 = vmul.f32 %v897_v29, %v897_v29  ;;  %v5724_v17 = vld [vmem:[#allocation61_spill] sm:$0xff]  ;;  %v5726_v54 = vld [vmem:[#allocation62_spill] sm:$0xff]  ;;  %v5728_v29 = vld [vmem:[#allocation63_spill] sm:$0xff] }
 0x11a   : > { %5715 = vst [vmem:[#allocation52_spill] sm:$0xff] %v4206_v45  ;;  %5717 = vst [vmem:[#allocation53_spill] sm:$0xff] %v4209_v35  ;;  %v1875_v50 = vmul.f32 %v1672_v62, %v1672_v62  ;;  %v1876_v41 = vmul.f32 %v1673_v63, %v1673_v63  ;;  %v898_v33 = vsub.f32 %v591_v39, %v3501_v48  ;;  %v603_v35 = vpop.permute.xlu1 %602 }
 0x11b   : > { %5719 = vst [vmem:[#allocation54_spill] sm:$0xff] %v4212_v16  ;;  %5721 = vst [vmem:[#allocation55_spill] sm:$0xff] %v4215_v42  ;;  %v899_v0 = vsub.f32 %v591_v39, %v3503_v49  ;;  %v1674_v55 = vsub.f32 %v591_v39, %v3513_v58  ;;  %v1675_v34 = vsub.f32 %v591_v39, %v3515_v59 }
 0x11c   : > { %v4222_v20 = vadd.f32 %v1099_v61, %v5722_v18  ;;  %v4225_v46 = vadd.f32 %v1100_v25, %v5724_v17  ;;  %v4228_v60 = vadd.f32 %v1875_v50, %v5726_v54  ;;  %v4231_v62 = vadd.f32 %v1876_v41, %v5728_v29  ;;  %v5730_v18 = vld [vmem:[#allocation56_spill] sm:$0xff]  ;;  %v5732_v50 = vld [vmem:[#allocation57_spill] sm:$0xff]  ;;  %v5734_v41 = vld [vmem:[#allocation58_spill] sm:$0xff] }
 0x11d   : > { %v1101_v63 = vmul.f32 %v898_v33, %v898_v33  ;;  %v1102_v53 = vmul.f32 %v899_v0, %v899_v0  ;;  %v1877_v42 = vmul.f32 %v1674_v55, %v1674_v55  ;;  %v1878_v16 = vmul.f32 %v1675_v34, %v1675_v34  ;;  %v5736_v0 = vld [vmem:[#allocation59_spill] sm:$0xff] }
 0x11e   : > { %5723 = vst [vmem:[#allocation60_spill] sm:$0xff] %v4222_v20  ;;  %5725 = vst [vmem:[#allocation61_spill] sm:$0xff] %v4225_v46  ;;  %v900_v45 = vsub.f32 %v595_v15, %v3501_v48  ;;  %v901_v39 = vsub.f32 %v595_v15, %v3503_v49  ;;  %v1676_v61 = vsub.f32 %v595_v15, %v3513_v58  ;;  %v607_v46 = vpop.permute.xlu0 %606 }
 0x11f   : > { %5727 = vst [vmem:[#allocation62_spill] sm:$0xff] %v4228_v60  ;;  %5729 = vst [vmem:[#allocation63_spill] sm:$0xff] %v4231_v62  ;;  %v1677_v25 = vsub.f32 %v595_v15, %v3515_v59  ;;  %v4238_v17 = vadd.f32 %v1101_v63, %v5730_v18  ;;  %v4241_v54 = vadd.f32 %v1102_v53, %v5732_v50 }
 0x120   : > { %v4244_v33 = vadd.f32 %v1877_v42, %v5734_v41  ;;  %v4247_v55 = vadd.f32 %v1878_v16, %v5736_v0  ;;  %v1103_v34 = vmul.f32 %v900_v45, %v900_v45  ;;  %v1104_v29 = vmul.f32 %v901_v39, %v901_v39  ;;  %v611_v41 = vpop.permute.xlu1 %610 }
 0x121   : > { %5731 = vst [vmem:[#allocation56_spill] sm:$0xff] %v4238_v17  ;;  %5733 = vst [vmem:[#allocation57_spill] sm:$0xff] %v4241_v54  ;;  %v1879_v62 = vmul.f32 %v1676_v61, %v1676_v61  ;;  %v1880_v60 = vmul.f32 %v1677_v25, %v1677_v25  ;;  %v902_v20 = vsub.f32 %v599_v30, %v3501_v48 }
 0x122   : > { %5735 = vst [vmem:[#allocation58_spill] sm:$0xff] %v4244_v33  ;;  %5737 = vst [vmem:[#allocation59_spill] sm:$0xff] %v4247_v55  ;;  %v903_v15 = vsub.f32 %v599_v30, %v3503_v49  ;;  %v1678_v63 = vsub.f32 %v599_v30, %v3513_v58  ;;  %v1679_v53 = vsub.f32 %v599_v30, %v3515_v59  ;;  %v615_v54 = vpop.permute.xlu0 %614 }
 0x123   : > { %v4254_v18 = vadd.f32 %v1103_v34, %v3803_v2  ;;  %v4257_v42 = vadd.f32 %v1104_v29, %v3805_v1  ;;  %v4260_v45 = vadd.f32 %v1879_v62, %v3807_v24  ;;  %v4263_v16 = vadd.f32 %v1880_v60, %v3809_v57  ;;  %v5742_v34 = vld [vmem:[#allocation64_spill] sm:$0xff]  ;;  %v5744_v24 = vld [vmem:[#allocation65_spill] sm:$0xff]  ;;  %v5746_v57 = vld [vmem:[#allocation66_spill] sm:$0xff] }
 0x124   : > { %v1105_v39 = vmul.f32 %v902_v20, %v902_v20  ;;  %v1106_v61 = vmul.f32 %v903_v15, %v903_v15  ;;  %v1881_v25 = vmul.f32 %v1678_v63, %v1678_v63  ;;  %v1882_v50 = vmul.f32 %v1679_v53, %v1679_v53  ;;  %v5748_v60 = vld [vmem:[#allocation67_spill] sm:$0xff] }
 0x125   : > { %5738 = vst [vmem:[#allocation114_spill] sm:$0xff] %v4254_v18  ;;  %5739 = vst [vmem:[#allocation115_spill] sm:$0xff] %v4257_v42  ;;  %v904_v0 = vsub.f32 %v603_v35, %v3501_v48  ;;  %v905_v30 = vsub.f32 %v603_v35, %v3503_v49  ;;  %v1680_v2 = vsub.f32 %v603_v35, %v3513_v58 }
 0x126   : > { %5740 = vst [vmem:[#allocation116_spill] sm:$0xff] %v4260_v45  ;;  %5741 = vst [vmem:[#allocation117_spill] sm:$0xff] %v4263_v16  ;;  %v1681_v1 = vsub.f32 %v603_v35, %v3515_v59  ;;  %v4270_v29 = vadd.f32 %v1105_v39, %v5742_v34  ;;  %v4273_v62 = vadd.f32 %v1106_v61, %v5744_v24  ;;  %v5750_v34 = vld [vmem:[#allocation72_spill] sm:$0xff] }
 0x127   : > { %v4276_v20 = vadd.f32 %v1881_v25, %v5746_v57  ;;  %v4279_v15 = vadd.f32 %v1882_v50, %v5748_v60  ;;  %v1107_v63 = vmul.f32 %v904_v0, %v904_v0  ;;  %v1108_v53 = vmul.f32 %v905_v30, %v905_v30  ;;  %v5752_v25 = vld [vmem:[#allocation73_spill] sm:$0xff]  ;;  %v5754_v50 = vld [vmem:[#allocation74_spill] sm:$0xff]  ;;  %v5756_v30 = vld [vmem:[#allocation75_spill] sm:$0xff] }
 0x128   : > { %5743 = vst [vmem:[#allocation64_spill] sm:$0xff] %v4270_v29  ;;  %5745 = vst [vmem:[#allocation65_spill] sm:$0xff] %v4273_v62  ;;  %v1883_v55 = vmul.f32 %v1680_v2, %v1680_v2  ;;  %v1884_v33 = vmul.f32 %v1681_v1, %v1681_v1  ;;  %v906_v17 = vsub.f32 %v607_v46, %v3501_v48  ;;  %v619_v62 = vpop.permute.xlu1 %618 }
 0x129   : > { %5747 = vst [vmem:[#allocation66_spill] sm:$0xff] %v4276_v20  ;;  %5749 = vst [vmem:[#allocation67_spill] sm:$0xff] %v4279_v15  ;;  %v907_v35 = vsub.f32 %v607_v46, %v3503_v49  ;;  %v1682_v39 = vsub.f32 %v607_v46, %v3513_v58  ;;  %v1683_v61 = vsub.f32 %v607_v46, %v3515_v59 }
 0x12a   : > { %v4286_v24 = vadd.f32 %v1107_v63, %v5750_v34  ;;  %v4289_v57 = vadd.f32 %v1108_v53, %v5752_v25  ;;  %v4292_v0 = vadd.f32 %v1883_v55, %v5754_v50  ;;  %v4295_v2 = vadd.f32 %v1884_v33, %v5756_v30  ;;  %v5758_v34 = vld [vmem:[#allocation68_spill] sm:$0xff]  ;;  %v5760_v55 = vld [vmem:[#allocation69_spill] sm:$0xff]  ;;  %v5762_v33 = vld [vmem:[#allocation70_spill] sm:$0xff] }
 0x12b   : > { %v1109_v1 = vmul.f32 %v906_v17, %v906_v17  ;;  %v1110_v60 = vmul.f32 %v907_v35, %v907_v35  ;;  %v1885_v15 = vmul.f32 %v1682_v39, %v1682_v39  ;;  %v1886_v20 = vmul.f32 %v1683_v61, %v1683_v61  ;;  %v5764_v35 = vld [vmem:[#allocation71_spill] sm:$0xff] }
 0x12c   : > { %5751 = vst [vmem:[#allocation72_spill] sm:$0xff] %v4286_v24  ;;  %5753 = vst [vmem:[#allocation73_spill] sm:$0xff] %v4289_v57  ;;  %v908_v29 = vsub.f32 %v611_v41, %v3501_v48  ;;  %v909_v46 = vsub.f32 %v611_v41, %v3503_v49  ;;  %v1684_v63 = vsub.f32 %v611_v41, %v3513_v58  ;;  %v623_v57 = vpop.permute.xlu0 %622 }
 0x12d   : > { %5755 = vst [vmem:[#allocation74_spill] sm:$0xff] %v4292_v0  ;;  %5757 = vst [vmem:[#allocation75_spill] sm:$0xff] %v4295_v2  ;;  %v1685_v53 = vsub.f32 %v611_v41, %v3515_v59  ;;  %v4302_v25 = vadd.f32 %v1109_v1, %v5758_v34  ;;  %v4305_v50 = vadd.f32 %v1110_v60, %v5760_v55 }
 0x12e   : > { %v4308_v17 = vadd.f32 %v1885_v15, %v5762_v33  ;;  %v4311_v39 = vadd.f32 %v1886_v20, %v5764_v35  ;;  %v1111_v61 = vmul.f32 %v908_v29, %v908_v29  ;;  %v1112_v30 = vmul.f32 %v909_v46, %v909_v46  ;;  %v627_v33 = vpop.permute.xlu1 %626 }
 0x12f   : > { %5759 = vst [vmem:[#allocation68_spill] sm:$0xff] %v4302_v25  ;;  %5761 = vst [vmem:[#allocation69_spill] sm:$0xff] %v4305_v50  ;;  %v1887_v2 = vmul.f32 %v1684_v63, %v1684_v63  ;;  %v1888_v0 = vmul.f32 %v1685_v53, %v1685_v53  ;;  %v910_v24 = vsub.f32 %v615_v54, %v3501_v48 }
 0x130   : > { %5763 = vst [vmem:[#allocation70_spill] sm:$0xff] %v4308_v17  ;;  %5765 = vst [vmem:[#allocation71_spill] sm:$0xff] %v4311_v39  ;;  %v911_v41 = vsub.f32 %v615_v54, %v3503_v49  ;;  %v1686_v1 = vsub.f32 %v615_v54, %v3513_v58  ;;  %v1687_v60 = vsub.f32 %v615_v54, %v3515_v59  ;;  %v631_v50 = vpop.permute.xlu0 %630 }
 0x131   : > { %v4318_v34 = vadd.f32 %v1111_v61, %v3855_v3  ;;  %v4321_v15 = vadd.f32 %v1112_v30, %v3857_v5  ;;  %v4324_v29 = vadd.f32 %v1887_v2, %v3859_v28  ;;  %v4327_v20 = vadd.f32 %v1888_v0, %v3861_v38  ;;  %v5770_v61 = vld [vmem:[#allocation76_spill] sm:$0xff]  ;;  %v5772_v28 = vld [vmem:[#allocation77_spill] sm:$0xff]  ;;  %v5774_v38 = vld [vmem:[#allocation78_spill] sm:$0xff] }
 0x132   : > { %v1113_v46 = vmul.f32 %v910_v24, %v910_v24  ;;  %v1114_v63 = vmul.f32 %v911_v41, %v911_v41  ;;  %v1889_v53 = vmul.f32 %v1686_v1, %v1686_v1  ;;  %v1890_v55 = vmul.f32 %v1687_v60, %v1687_v60  ;;  %v5776_v0 = vld [vmem:[#allocation79_spill] sm:$0xff] }
 0x133   : > { %5766 = vst [vmem:[#allocation118_spill] sm:$0xff] %v4318_v34  ;;  %5767 = vst [vmem:[#allocation119_spill] sm:$0xff] %v4321_v15  ;;  %v912_v35 = vsub.f32 %v619_v62, %v3501_v48  ;;  %v913_v54 = vsub.f32 %v619_v62, %v3503_v49  ;;  %v1688_v3 = vsub.f32 %v619_v62, %v3513_v58 }
 0x134   : > { %5768 = vst [vmem:[#allocation120_spill] sm:$0xff] %v4324_v29  ;;  %5769 = vst [vmem:[#allocation121_spill] sm:$0xff] %v4327_v20  ;;  %v1689_v5 = vsub.f32 %v619_v62, %v3515_v59  ;;  %v4334_v30 = vadd.f32 %v1113_v46, %v5770_v61  ;;  %v4337_v2 = vadd.f32 %v1114_v63, %v5772_v28  ;;  %v5826_v20 = vld [vmem:[#allocation15_spill] sm:$0xff] }
 0x135   : > { %v4340_v24 = vadd.f32 %v1889_v53, %v5774_v38  ;;  %v4343_v41 = vadd.f32 %v1890_v55, %v5776_v0  ;;  %v1115_v1 = vmul.f32 %v912_v35, %v912_v35  ;;  %v1116_v60 = vmul.f32 %v913_v54, %v913_v54  ;;  %v5780_v55 = vld [vmem:[#allocation84_spill] sm:$0xff]  ;;  %v5782_v54 = vld [vmem:[#allocation85_spill] sm:$0xff] }
 0x136   : > { %5771 = vst [vmem:[#allocation76_spill] sm:$0xff] %v4334_v30  ;;  %5773 = vst [vmem:[#allocation77_spill] sm:$0xff] %v4337_v2  ;;  %v1891_v39 = vmul.f32 %v1688_v3, %v1688_v3  ;;  %v1892_v17 = vmul.f32 %v1689_v5, %v1689_v5  ;;  %v914_v25 = vsub.f32 %v623_v57, %v3501_v48 }
 0x137   : > { %5775 = vst [vmem:[#allocation78_spill] sm:$0xff] %v4340_v24  ;;  %5777 = vst [vmem:[#allocation79_spill] sm:$0xff] %v4343_v41  ;;  %v915_v62 = vsub.f32 %v623_v57, %v3503_v49  ;;  %v1690_v46 = vsub.f32 %v623_v57, %v3513_v58  ;;  %v1691_v63 = vsub.f32 %v623_v57, %v3515_v59  ;;  %v635_v41 = vpop.permute.xlu1 %634 }
 0x138   : > { %v4350_v61 = vadd.f32 %v1115_v1, %v3877_v13  ;;  %v4353_v53 = vadd.f32 %v1116_v60, %v3879_v19  ;;  %v4356_v35 = vadd.f32 %v1891_v39, %v5780_v55  ;;  %v4359_v3 = vadd.f32 %v1892_v17, %v5782_v54  ;;  %v5784_v1 = vld [vmem:[#allocation80_spill] sm:$0xff]  ;;  %v5786_v39 = vld [vmem:[#allocation81_spill] sm:$0xff]  ;;  %v5788_v17 = vld [vmem:[#allocation82_spill] sm:$0xff] }
 0x139   : > { %v1117_v5 = vmul.f32 %v914_v25, %v914_v25  ;;  %v1118_v28 = vmul.f32 %v915_v62, %v915_v62  ;;  %v1893_v38 = vmul.f32 %v1690_v46, %v1690_v46  ;;  %v1894_v0 = vmul.f32 %v1691_v63, %v1691_v63  ;;  %v5790_v62 = vld [vmem:[#allocation83_spill] sm:$0xff] }
 0x13a   : > { %5778 = vst [vmem:[#allocation122_spill] sm:$0xff] %v4350_v61  ;;  %5779 = vst [vmem:[#allocation123_spill] sm:$0xff] %v4353_v53  ;;  %v916_v24 = vsub.f32 %v627_v33, %v3501_v48  ;;  %v917_v57 = vsub.f32 %v627_v33, %v3503_v49  ;;  %v1692_v13 = vsub.f32 %v627_v33, %v3513_v58  ;;  %v5824_v61 = vld [vmem:[#allocation13_spill] sm:$0xff] }
 0x13b   : > { %5781 = vst [vmem:[#allocation84_spill] sm:$0xff] %v4356_v35  ;;  %5783 = vst [vmem:[#allocation85_spill] sm:$0xff] %v4359_v3  ;;  %v1693_v19 = vsub.f32 %v627_v33, %v3515_v59  ;;  %v4366_v60 = vadd.f32 %v1117_v5, %v5784_v1  ;;  %v4369_v55 = vadd.f32 %v1118_v28, %v5786_v39  ;;  %v639_v3 = vpop.permute.xlu0 %638 }
 0x13c   : > { %v4372_v25 = vadd.f32 %v1893_v38, %v5788_v17  ;;  %v4375_v46 = vadd.f32 %v1894_v0, %v5790_v62  ;;  %v1119_v63 = vmul.f32 %v916_v24, %v916_v24  ;;  %v1120_v54 = vmul.f32 %v917_v57, %v917_v57  ;;  %v643_v17 = vpop.permute.xlu1 %642 }
 0x13d   : > { %5785 = vst [vmem:[#allocation80_spill] sm:$0xff] %v4366_v60  ;;  %5787 = vst [vmem:[#allocation81_spill] sm:$0xff] %v4369_v55  ;;  %v1895_v2 = vmul.f32 %v1692_v13, %v1692_v13  ;;  %v1896_v30 = vmul.f32 %v1693_v19, %v1693_v19  ;;  %v918_v35 = vsub.f32 %v631_v50, %v3501_v48 }
 0x13e   : > { %5789 = vst [vmem:[#allocation82_spill] sm:$0xff] %v4372_v25  ;;  %5791 = vst [vmem:[#allocation83_spill] sm:$0xff] %v4375_v46  ;;  %v919_v33 = vsub.f32 %v631_v50, %v3503_v49  ;;  %v1694_v5 = vsub.f32 %v631_v50, %v3513_v58  ;;  %v1695_v28 = vsub.f32 %v631_v50, %v3515_v59 }
 0x13f   : > { %v4382_v1 = vadd.f32 %v1119_v63, %v3907_v7  ;;  %v4385_v38 = vadd.f32 %v1120_v54, %v3909_v9  ;;  %v4388_v24 = vadd.f32 %v1895_v2, %v3911_v32  ;;  %v4391_v0 = vadd.f32 %v1896_v30, %v3913_v6  ;;  %v5796_v63 = vld [vmem:[#allocation86_spill] sm:$0xff]  ;;  %v5798_v32 = vld [vmem:[#allocation87_spill] sm:$0xff]  ;;  %v5800_v6 = vld [vmem:[#allocation88_spill] sm:$0xff]  ;;  %v647_v55 = vpop.permute.xlu0 %646 }
 0x140   : > { %v1121_v57 = vmul.f32 %v918_v35, %v918_v35  ;;  %v1122_v13 = vmul.f32 %v919_v33, %v919_v33  ;;  %v1897_v19 = vmul.f32 %v1694_v5, %v1694_v5  ;;  %v1898_v39 = vmul.f32 %v1695_v28, %v1695_v28  ;;  %v5802_v35 = vld [vmem:[#allocation89_spill] sm:$0xff] }
 0x141   : > { %5792 = vst [vmem:[#allocation124_spill] sm:$0xff] %v4382_v1  ;;  %5793 = vst [vmem:[#allocation125_spill] sm:$0xff] %v4385_v38  ;;  %v920_v62 = vsub.f32 %v635_v41, %v3501_v48  ;;  %v921_v50 = vsub.f32 %v635_v41, %v3503_v49  ;;  %v1696_v7 = vsub.f32 %v635_v41, %v3513_v58 }
 0x142   : > { %5794 = vst [vmem:[#allocation126_spill] sm:$0xff] %v4388_v24  ;;  %5795 = vst [vmem:[#allocation127_spill] sm:$0xff] %v4391_v0  ;;  %v1697_v9 = vsub.f32 %v635_v41, %v3515_v59  ;;  %v4398_v54 = vadd.f32 %v1121_v57, %v5796_v63  ;;  %v4401_v2 = vadd.f32 %v1122_v13, %v5798_v32 }
 0x143   : > { %v4404_v30 = vadd.f32 %v1897_v19, %v5800_v6  ;;  %v4407_v33 = vadd.f32 %v1898_v39, %v5802_v35  ;;  %v1123_v5 = vmul.f32 %v920_v62, %v920_v62  ;;  %v1124_v28 = vmul.f32 %v921_v50, %v921_v50  ;;  %v5805_v19 = vld [vmem:[#allocation94_spill] sm:$0xff]  ;;  %v5807_v39 = vld [vmem:[#allocation95_spill] sm:$0xff]  ;;  %v5809_v50 = vld [vmem:[#allocation96_spill] sm:$0xff]  ;;  %v651_v35 = vpop.permute.xlu1 %650 }
 0x144   : > { %5797 = vst [vmem:[#allocation86_spill] sm:$0xff] %v4398_v54  ;;  %5799 = vst [vmem:[#allocation87_spill] sm:$0xff] %v4401_v2  ;;  %v1899_v46 = vmul.f32 %v1696_v7, %v1696_v7  ;;  %v1900_v25 = vmul.f32 %v1697_v9, %v1697_v9  ;;  %v922_v60 = vsub.f32 %v639_v3, %v3501_v48 }
 0x145   : > { %5801 = vst [vmem:[#allocation88_spill] sm:$0xff] %v4404_v30  ;;  %5803 = vst [vmem:[#allocation89_spill] sm:$0xff] %v4407_v33  ;;  %v923_v41 = vsub.f32 %v639_v3, %v3503_v49  ;;  %v1698_v57 = vsub.f32 %v639_v3, %v3513_v58  ;;  %v1699_v13 = vsub.f32 %v639_v3, %v3515_v59  ;;  %v5811_v58 = vld [vmem:[#allocation4_spill] sm:$0xff]  ;;  %v5812_v59 = vld [vmem:[#allocation5_spill] sm:$0xff] }
 0x146   : > { %v4414_v63 = vadd.f32 %v1123_v5, %v3924_v43  ;;  %v4417_v32 = vadd.f32 %v1124_v28, %v5805_v19  ;;  %v4420_v62 = vadd.f32 %v1899_v46, %v5807_v39  ;;  %v4423_v7 = vadd.f32 %v1900_v25, %v5809_v50  ;;  %v5813_v43 = vld [vmem:[#allocation6_spill] sm:$0xff]  ;;  %v5814_v30 = vld [vmem:[#allocation7_spill] sm:$0xff]  ;;  %v5819_v25 = vld [vmem:[#allocation92_spill] sm:$0xff] }
 0x147   : > { %v1125_v9 = vmul.f32 %v922_v60, %v922_v60  ;;  %v1126_v48 = vmul.f32 %v923_v41, %v923_v41  ;;  %v1901_v6 = vmul.f32 %v1698_v57, %v1698_v57  ;;  %v1902_v49 = vmul.f32 %v1699_v13, %v1699_v13  ;;  %v5815_v19 = vld [vmem:[#allocation90_spill] sm:$0xff]  ;;  %v5817_v46 = vld [vmem:[#allocation91_spill] sm:$0xff]  ;;  %v5821_v41 = vld [vmem:[#allocation93_spill] sm:$0xff] }
 0x148   : > { %5804 = vst [vmem:[#allocation128_spill] sm:$0xff] %v4414_v63  ;;  %5806 = vst [vmem:[#allocation94_spill] sm:$0xff] %v4417_v32  ;;  %v935_v33 = vsub.f32 %v643_v17, %v5811_v58  ;;  %v936_v3 = vsub.f32 %v643_v17, %v5812_v59  ;;  %v1711_v5 = vsub.f32 %v643_v17, %v5813_v43 }
 0x149   : > { %5808 = vst [vmem:[#allocation95_spill] sm:$0xff] %v4420_v62  ;;  %5810 = vst [vmem:[#allocation96_spill] sm:$0xff] %v4423_v7  ;;  %v1712_v28 = vsub.f32 %v643_v17, %v5814_v30  ;;  %v4430_v2 = vadd.f32 %v1125_v9, %v5815_v19  ;;  %v4433_v39 = vadd.f32 %v1126_v48, %v5817_v46  ;;  %v659_v62 = vpop.permute.xlu0 %658 }
 0x14a   : > { %v4436_v60 = vadd.f32 %v1901_v6, %v5819_v25  ;;  %v4439_v57 = vadd.f32 %v1902_v49, %v5821_v41  ;;  %v1191_v13 = vmul.f32 %v935_v33, %v935_v33  ;;  %v1192_v50 = vmul.f32 %v936_v3, %v936_v3  ;;  %v655_v25 = vpop.permute.xlu1 %654 }
 0x14b   : > { %5816 = vst [vmem:[#allocation4_spill] sm:$0xff] %v4430_v2  ;;  %5818 = vst [vmem:[#allocation5_spill] sm:$0xff] %v4433_v39  ;;  %v1967_v54 = vmul.f32 %v1711_v5, %v1711_v5  ;;  %v1968_v7 = vmul.f32 %v1712_v28, %v1712_v28  ;;  %v937_v32 = vsub.f32 %v647_v55, %v5811_v58 }
 0x14c   : > { %5820 = vst [vmem:[#allocation6_spill] sm:$0xff] %v4436_v60  ;;  %5822 = vst [vmem:[#allocation7_spill] sm:$0xff] %v4439_v57  ;;  %v938_v17 = vsub.f32 %v647_v55, %v5812_v59  ;;  %v1713_v9 = vsub.f32 %v647_v55, %v5813_v43  ;;  %v1714_v48 = vsub.f32 %v647_v55, %v5814_v30 }
 0x14d   : > { %v939_v19 = vsub.f32 %v651_v35, %v5811_v58  ;;  %v940_v6 = vsub.f32 %v651_v35, %v5812_v59  ;;  %v1715_v49 = vsub.f32 %v651_v35, %v5813_v43  ;;  %v1716_v33 = vsub.f32 %v651_v35, %v5814_v30 }
 0x14e   : > { %v1193_v3 = vmul.f32 %v937_v32, %v937_v32  ;;  %v1194_v5 = vmul.f32 %v938_v17, %v938_v17  ;;  %v1969_v28 = vmul.f32 %v1713_v9, %v1713_v9  ;;  %v1970_v46 = vmul.f32 %v1714_v48, %v1714_v48 }
 0x14f   : > { %v4449_v41 = vmul.f32 %v939_v19, %v939_v19  ;;  %v4451_v57 = vmul.f32 %v940_v6, %v940_v6  ;;  %v4453_v60 = vmul.f32 %v1715_v49, %v1715_v49  ;;  %v4455_v55 = vmul.f32 %v1716_v33, %v1716_v33  ;;  %v667_v19 = vpop.permute.xlu0 %666 }
 0x150   : > { %v943_v39 = vsub.f32 %v659_v62, %v5811_v58  ;;  %v944_v2 = vsub.f32 %v659_v62, %v5812_v59  ;;  %v1719_v63 = vsub.f32 %v659_v62, %v5813_v43  ;;  %v1720_v32 = vsub.f32 %v659_v62, %v5814_v30 }
 0x151   : > { %v941_v35 = vsub.f32 %v655_v25, %v5811_v58  ;;  %v942_v17 = vsub.f32 %v655_v25, %v5812_v59  ;;  %v1717_v9 = vsub.f32 %v655_v25, %v5813_v43  ;;  %v1718_v48 = vsub.f32 %v655_v25, %v5814_v30 }
 0x152   : > { %v1199_v6 = vmul.f32 %v943_v39, %v943_v39  ;;  %v4465_v49 = vmul.f32 %v944_v2, %v944_v2  ;;  %v4467_v33 = vmul.f32 %v1719_v63, %v1719_v63  ;;  %v4469_v0 = vmul.f32 %v1720_v32, %v1720_v32  ;;  %v5823_v63 = vld [vmem:[#allocation12_spill] sm:$0xff] }
 0x153   : > { %v4471_v24 = vmul.f32 %v941_v35, %v941_v35  ;;  %v4473_v38 = vmul.f32 %v942_v17, %v942_v17  ;;  %v4475_v62 = vmul.f32 %v1717_v9, %v1717_v9  ;;  %v4477_v1 = vmul.f32 %v1718_v48, %v1718_v48  ;;  %v5825_v17 = vld [vmem:[#allocation14_spill] sm:$0xff] }
 0x154   : > { %v947_v53 = vsub.f32 %v667_v19, %v5811_v58  ;;  %v948_v25 = vsub.f32 %v667_v19, %v5812_v59  ;;  %v1723_v39 = vsub.f32 %v667_v19, %v5813_v43  ;;  %v1724_v2 = vsub.f32 %v667_v19, %v5814_v30  ;;  %v663_v19 = vpop.permute.xlu1 %662 }
 0x155   : > { %v1127_v32 = vadd.f32 %v3941_v56, %v5823_v63  ;;  %v1128_v35 = vadd.f32 %v3943_v14, %v5824_v61  ;;  %v1903_v9 = vadd.f32 %v3945_v10, %v5825_v17  ;;  %v1904_v48 = vadd.f32 %v3947_v4, %v5826_v20  ;;  %v5827_v14 = vld [vmem:[#allocation97_spill] sm:$0xff]  ;;  %v5828_v10 = vld [vmem:[#allocation98_spill] sm:$0xff]  ;;  %v5829_v4 = vld [vmem:[#allocation99_spill] sm:$0xff] }
 0x156   : > { %v4491_v29 = vmul.f32 %v947_v53, %v947_v53  ;;  %v4493_v15 = vmul.f32 %v948_v25, %v948_v25  ;;  %v4495_v34 = vmul.f32 %v1723_v39, %v1723_v39  ;;  %v4497_v16 = vmul.f32 %v1724_v2, %v1724_v2  ;;  %v5830_v53 = vld [vmem:[#allocation100_spill] sm:$0xff]  ;;  %v675_v39 = vpop.permute.xlu0 %674 }
 0x157   : > { %v1255_v45 = vadd.f32 %v1191_v13, %v1127_v32  ;;  %v1256_v56 = vadd.f32 %v1192_v50, %v1128_v35  ;;  %v2031_v63 = vadd.f32 %v1967_v54, %v1903_v9  ;;  %v2032_v42 = vadd.f32 %v1968_v7, %v1904_v48 }
 0x158   : > { %v4500_v61 = vadd.f32 %v1193_v3, %v5827_v14  ;;  %v4503_v17 = vadd.f32 %v1194_v5, %v5828_v10  ;;  %v4506_v20 = vadd.f32 %v1969_v28, %v5829_v4  ;;  %v4509_v25 = vadd.f32 %v1970_v46, %v5830_v53  ;;  %v671_v23 = vpop.permute.xlu1 %670 }
 0x159   : > { %v1416_v2 = vmin.f32 %v1255_v45, %v1256_v56  ;;  %v2188_v18 = vmin.f32 %v2031_v63, %v2032_v42  ;;  %v945_v13 = vsub.f32 %v663_v19, %v5811_v58  ;;  %v946_v54 = vsub.f32 %v663_v19, %v5812_v59 }
 0x15a   : > { %v1417_v7 = vmin.f32 %v4500_v61, %v4503_v17  ;;  %v2189_v50 = vmin.f32 %v4506_v20, %v4509_v25  ;;  %v1721_v3 = vsub.f32 %v663_v19, %v5813_v43  ;;  %v1722_v5 = vsub.f32 %v663_v19, %v5814_v30  ;;  %v5831_v19 = vld [vmem:[#allocation8_spill] sm:$0xff] }
 0x15b   : > { %v2252_v28 = vmin.f32 %v1416_v2, %v2188_v18  ;;  %v4519_v46 = vmul.f32 %v945_v13, %v945_v13  ;;  %v4521_v32 = vmul.f32 %v946_v54, %v946_v54  ;;  %v951_v35 = vsub.f32 %v675_v39, %v5811_v58  ;;  %v5832_v54 = vld [vmem:[#allocation9_spill] sm:$0xff] }
 0x15c   : > { %v2253_v9 = vmin.f32 %v1417_v7, %v2189_v50  ;;  %v4524_v48 = vmul.f32 %v1721_v3, %v1721_v3  ;;  %v4526_v14 = vmul.f32 %v1722_v5, %v1722_v5  ;;  %v952_v10 = vsub.f32 %v675_v39, %v5812_v59  ;;  %v5833_v7 = vld [vmem:[#allocation101_spill] sm:$0xff]  ;;  %v5834_v3 = vld [vmem:[#allocation10_spill] sm:$0xff] }
 0x15d   : > { %2351 = vmin.xlane.f32.xlu0 %v2252_v28  ;;  %v4529_v4 = vmul.f32 %v951_v35, %v951_v35  ;;  %v1727_v53 = vsub.f32 %v675_v39, %v5813_v43  ;;  %v1728_v18 = vsub.f32 %v675_v39, %v5814_v30  ;;  %v1131_v2 = vadd.f32 %v3969_v21, %v5831_v19  ;;  %v5835_v5 = vld [vmem:[#allocation102_spill] sm:$0xff]  ;;  %v5837_v28 = vld [vmem:[#allocation103_spill] sm:$0xff] }
 0x15e   : > { %2353 = vmin.xlane.f32.xlu1 %v2253_v9  ;;  %v4535_v13 = vmul.f32 %v952_v10, %v952_v10  ;;  %v1132_v50 = vadd.f32 %v5833_v7, %v5832_v54  ;;  %v1907_v12 = vadd.f32 %v5835_v5, %v5834_v3  ;;  %v1908_v35 = vadd.f32 %v5837_v28, %v5836_v22  ;;  %v683_v3 = vpop.permute.xlu0 %682 }
 0x15f   : > { %v4543_v27 = vmul.f32 %v1727_v53, %v1727_v53  ;;  %v4545_v8 = vmul.f32 %v1728_v18, %v1728_v18  ;;  %v1259_v39 = vadd.f32 %v4449_v41, %v1131_v2  ;;  %v1263_v21 = vadd.f32 %v1199_v6, %v3998_v37  ;;  %v5838_v53 = vld [vmem:[#allocation108_spill] sm:$0xff] }
 0x160   : > { %v1260_v9 = vadd.f32 %v4451_v57, %v1132_v50  ;;  %v2035_v10 = vadd.f32 %v4453_v60, %v1907_v12  ;;  %v2036_v19 = vadd.f32 %v4455_v55, %v1908_v35  ;;  %v1264_v54 = vadd.f32 %v4465_v49, %v4001_v40 }
 0x161   : > { %v1319_v7 = vmin.f32 %v1255_v45, %v1259_v39  ;;  %v2039_v22 = vadd.f32 %v4467_v33, %v4004_v44  ;;  %v2040_v18 = vadd.f32 %v4469_v0, %v5838_v53  ;;  %v949_v41 = vsub.f32 %v671_v23, %v5811_v58 }
 0x162   : > { %v1356_v2 = vmin.f32 %v1256_v56, %v1260_v9  ;;  %v1418_v37 = vmin.f32 %v1259_v39, %v1260_v9  ;;  %v2095_v6 = vmin.f32 %v2031_v63, %v2035_v10  ;;  %v2132_v57 = vmin.f32 %v2032_v42, %v2036_v19 }
 0x163   : > { %v2190_v50 = vmin.f32 %v2035_v10, %v2036_v19  ;;  %v1420_v12 = vmin.f32 %v1263_v21, %v1264_v54  ;;  %v2192_v60 = vmin.f32 %v2039_v22, %v2040_v18  ;;  %v4559_v55 = vmin.f32 %v1319_v7, %v1263_v21  ;;  %v5839_v7 = vld [vmem:[#allocation104_spill] sm:$0xff] }
 0x164   : > { %v4561_v40 = vmin.f32 %v1356_v2, %v1264_v54  ;;  %v4563_v45 = vmin.f32 %v2095_v6, %v2039_v22  ;;  %v4565_v44 = vmin.f32 %v2132_v57, %v2040_v18  ;;  %v950_v0 = vsub.f32 %v671_v23, %v5812_v59  ;;  %v5840_v18 = vld [vmem:[#allocation105_spill] sm:$0xff]  ;;  %v5841_v2 = vld [vmem:[#allocation106_spill] sm:$0xff]  ;;  %v5842_v6 = vld [vmem:[#allocation107_spill] sm:$0xff] }
 0x165   : > { %v2254_v49 = vmin.f32 %v1418_v37, %v2190_v50  ;;  %v2256_v33 = vmin.f32 %v1420_v12, %v2192_v60  ;;  %v4568_v56 = vmul.f32 %v949_v41, %v949_v41  ;;  %v1725_v42 = vsub.f32 %v671_v23, %v5813_v43  ;;  %v5843_v12 = vld [vmem:[#allocation24_spill] sm:$0xff] }
 0x166   : > { %v4571_v63 = vmul.f32 %v950_v0, %v950_v0  ;;  %v1726_v5 = vsub.f32 %v671_v23, %v5814_v30  ;;  %v955_v28 = vsub.f32 %v683_v3, %v5811_v58  ;;  %v956_v35 = vsub.f32 %v683_v3, %v5812_v59  ;;  %v679_v0 = vpop.permute.xlu1 %678 }
 0x167   : > { %2355 = vmin.xlane.f32.xlu0 %v2254_v49  ;;  %2359 = vmin.xlane.f32.xlu1 %v2256_v33  ;;  %v4576_v39 = vmul.f32 %v1725_v42, %v1725_v42  ;;  %v1731_v21 = vsub.f32 %v683_v3, %v5813_v43  ;;  %v1732_v9 = vsub.f32 %v683_v3, %v5814_v30  ;;  %v5844_v3 = vld [vmem:[#allocation25_spill] sm:$0xff]  ;;  %v5845_v42 = vld [vmem:[#allocation26_spill] sm:$0xff] }
 0x168   : > { %v4580_v10 = vmul.f32 %v1726_v5, %v1726_v5  ;;  %v4582_v19 = vmul.f32 %v955_v28, %v955_v28  ;;  %v4584_v54 = vmul.f32 %v956_v35, %v956_v35  ;;  %v1261_v23 = vadd.f32 %v4471_v24, %v5839_v7  ;;  %v691_v35 = vpop.permute.xlu0 %690 }
 0x169   : > { %v4588_v22 = vmul.f32 %v1731_v21, %v1731_v21  ;;  %v4590_v53 = vmul.f32 %v1732_v9, %v1732_v9  ;;  %v1262_v41 = vadd.f32 %v4473_v38, %v5840_v18  ;;  %v2037_v37 = vadd.f32 %v4475_v62, %v5841_v2 }
 0x16a   : > { %v2038_v57 = vadd.f32 %v4477_v1, %v5842_v6  ;;  %v1320_v50 = vmin.f32 %v4500_v61, %v1261_v23  ;;  %v1267_v60 = vadd.f32 %v4491_v29, %v5843_v12  ;;  %v1268_v24 = vadd.f32 %v4493_v15, %v5844_v3  ;;  %v5846_v29 = vld [vmem:[#allocation27_spill] sm:$0xff] }
 0x16b   : > { %v1419_v49 = vmin.f32 %v1261_v23, %v1262_v41  ;;  %v1357_v33 = vmin.f32 %v4503_v17, %v1262_v41  ;;  %v2096_v38 = vmin.f32 %v4506_v20, %v2037_v37  ;;  %v2043_v62 = vadd.f32 %v4495_v34, %v5845_v42 }
 0x16c   : > { %v2191_v5 = vmin.f32 %v2037_v37, %v2038_v57  ;;  %v2133_v1 = vmin.f32 %v4509_v25, %v2038_v57  ;;  %v1360_v61 = vmin.f32 %v4561_v40, %v1268_v24  ;;  %v1422_v28 = vmin.f32 %v1267_v60, %v1268_v24  ;;  %v5848_v24 = vld [vmem:[#allocation17_spill] sm:$0xff] }
 0x16d   : > { %v2044_v21 = vadd.f32 %v4497_v16, %v5846_v29  ;;  %v2099_v15 = vmin.f32 %v4563_v45, %v2043_v62  ;;  %v1323_v9 = vmin.f32 %v4559_v55, %v1267_v60  ;;  %v953_v17 = vsub.f32 %v679_v0, %v5811_v58  ;;  %v5847_v60 = vld [vmem:[#allocation16_spill] sm:$0xff] }
 0x16e   : > { %v2255_v20 = vmin.f32 %v1419_v49, %v2191_v5  ;;  %v954_v7 = vsub.f32 %v679_v0, %v5812_v59  ;;  %v1729_v34 = vsub.f32 %v679_v0, %v5813_v43  ;;  %v1730_v25 = vsub.f32 %v679_v0, %v5814_v30  ;;  %v5849_v49 = vld [vmem:[#allocation18_spill] sm:$0xff] }
 0x16f   : > { %v2136_v40 = vmin.f32 %v4565_v44, %v2044_v21  ;;  %v2194_v23 = vmin.f32 %v2043_v62, %v2044_v21  ;;  %v4618_v18 = vmul.f32 %v953_v17, %v953_v17  ;;  %v959_v16 = vsub.f32 %v691_v35, %v5811_v58  ;;  %v687_v21 = vpop.permute.xlu1 %686 }
 0x170   : > { %2357 = vmin.xlane.f32.xlu0 %v2255_v20  ;;  %v4621_v45 = vmul.f32 %v954_v7, %v954_v7  ;;  %v4623_v55 = vmul.f32 %v1729_v34, %v1729_v34  ;;  %v4625_v41 = vmul.f32 %v1730_v25, %v1730_v25  ;;  %v960_v2 = vsub.f32 %v691_v35, %v5812_v59 }
 0x171   : > { %v2258_v37 = vmin.f32 %v1422_v28, %v2194_v23  ;;  %v4628_v6 = vmul.f32 %v959_v16, %v959_v16  ;;  %v1735_v57 = vsub.f32 %v691_v35, %v5813_v43  ;;  %v1736_v44 = vsub.f32 %v691_v35, %v5814_v30  ;;  %v5850_v28 = vld [vmem:[#allocation19_spill] sm:$0xff] }
 0x172   : > { %v4632_v12 = vmul.f32 %v960_v2, %v960_v2  ;;  %v1265_v3 = vadd.f32 %v4519_v46, %v5847_v60  ;;  %v1266_v0 = vadd.f32 %v4521_v32, %v5848_v24  ;;  %v2041_v42 = vadd.f32 %v4524_v48, %v5849_v49 }
 0x173   : > { %2363 = vmin.xlane.f32.xlu1 %v2258_v37  ;;  %v4640_v62 = vmul.f32 %v1735_v57, %v1735_v57  ;;  %v4642_v5 = vmul.f32 %v1736_v44, %v1736_v44  ;;  %v2042_v29 = vadd.f32 %v4526_v14, %v5850_v28  ;;  %v1271_v35 = vadd.f32 %v4529_v4, %v4062_v52  ;;  %v5851_v37 = vld [vmem:[#allocation20_spill] sm:$0xff] }
 0x174   : > { %v1421_v17 = vmin.f32 %v1265_v3, %v1266_v0  ;;  %v4648_v46 = vmin.f32 %v1320_v50, %v1265_v3  ;;  %v4650_v20 = vmin.f32 %v1357_v33, %v1266_v0  ;;  %v4652_v32 = vmin.f32 %v2096_v38, %v2041_v42  ;;  %v699_v38 = vpop.permute.xlu0 %698 }
 0x175   : > { %v2193_v48 = vmin.f32 %v2041_v42, %v2042_v29  ;;  %v4654_v7 = vmin.f32 %v2133_v1, %v2042_v29  ;;  %v1272_v34 = vadd.f32 %v4535_v13, %v4065_v36  ;;  %v2047_v14 = vadd.f32 %v4543_v27, %v4068_v47  ;;  %v5852_v42 = vld [vmem:[#allocation21_spill] sm:$0xff]  ;;  %v5853_v29 = vld [vmem:[#allocation22_spill] sm:$0xff] }
 0x176   : > { %v2048_v52 = vadd.f32 %v4545_v8, %v4071_v11  ;;  %v4662_v4 = vmin.f32 %v1323_v9, %v1271_v35  ;;  %v957_v50 = vsub.f32 %v687_v21, %v5811_v58  ;;  %v958_v33 = vsub.f32 %v687_v21, %v5812_v59 }
 0x177   : > { %v2257_v25 = vmin.f32 %v1421_v17, %v2193_v48  ;;  %v4666_v23 = vmin.f32 %v1360_v61, %v1272_v34  ;;  %v1424_v1 = vmin.f32 %v1271_v35, %v1272_v34  ;;  %v4668_v16 = vmin.f32 %v2099_v15, %v2047_v14  ;;  %v5855_v48 = vld [vmem:[#allocation36_spill] sm:$0xff] }
 0x178   : > { %v4670_v36 = vmin.f32 %v2136_v40, %v2048_v52  ;;  %v2196_v13 = vmin.f32 %v2047_v14, %v2048_v52  ;;  %v4672_v47 = vmul.f32 %v957_v50, %v957_v50  ;;  %v4674_v27 = vmul.f32 %v958_v33, %v958_v33  ;;  %v5856_v14 = vld [vmem:[#allocation37_spill] sm:$0xff]  ;;  %v695_v50 = vpop.permute.xlu1 %694 }
 0x179   : > { %2361 = vmin.xlane.f32.xlu0 %v2257_v25  ;;  %v1733_v11 = vsub.f32 %v687_v21, %v5813_v43  ;;  %v1734_v8 = vsub.f32 %v687_v21, %v5814_v30  ;;  %v963_v9 = vsub.f32 %v699_v38, %v5811_v58  ;;  %v964_v61 = vsub.f32 %v699_v38, %v5812_v59  ;;  %v5857_v25 = vld [vmem:[#allocation38_spill] sm:$0xff] }
 0x17a   : > { %v2260_v2 = vmin.f32 %v1424_v1, %v2196_v13  ;;  %v1739_v15 = vsub.f32 %v699_v38, %v5813_v43  ;;  %v1740_v40 = vsub.f32 %v699_v38, %v5814_v30  ;;  %v1269_v57 = vadd.f32 %v4568_v56, %v5851_v37  ;;  %v5854_v56 = vld [vmem:[#allocation23_spill] sm:$0xff] }
 0x17b   : > { %v4684_v44 = vmul.f32 %v1733_v11, %v1733_v11  ;;  %v4686_v60 = vmul.f32 %v1734_v8, %v1734_v8  ;;  %v4688_v3 = vmul.f32 %v963_v9, %v963_v9  ;;  %v4690_v24 = vmul.f32 %v964_v61, %v964_v61  ;;  %v707_v11 = vpop.permute.xlu0 %706 }
 0x17c   : > { %2367 = vmin.xlane.f32.xlu1 %v2260_v2  ;;  %v4692_v0 = vmul.f32 %v1739_v15, %v1739_v15  ;;  %v4694_v49 = vmul.f32 %v1740_v40, %v1740_v40  ;;  %v1270_v28 = vadd.f32 %v4571_v63, %v5852_v42  ;;  %v2045_v35 = vadd.f32 %v4576_v39, %v5853_v29 }
 0x17d   : > { %v2046_v21 = vadd.f32 %v4580_v10, %v5854_v56  ;;  %v1324_v17 = vmin.f32 %v4648_v46, %v1269_v57  ;;  %v1275_v34 = vadd.f32 %v4582_v19, %v5855_v48  ;;  %v1276_v52 = vadd.f32 %v4584_v54, %v5856_v14  ;;  %v5858_v19 = vld [vmem:[#allocation39_spill] sm:$0xff] }
 0x17e   : > { %v1423_v33 = vmin.f32 %v1269_v57, %v1270_v28  ;;  %v1361_v38 = vmin.f32 %v4650_v20, %v1270_v28  ;;  %v2100_v63 = vmin.f32 %v4652_v32, %v2045_v35  ;;  %v2051_v39 = vadd.f32 %v4588_v22, %v5857_v25 }
 0x17f   : > { %v2195_v1 = vmin.f32 %v2045_v35, %v2046_v21  ;;  %v2137_v10 = vmin.f32 %v4654_v7, %v2046_v21  ;;  %v1364_v46 = vmin.f32 %v4666_v23, %v1276_v52  ;;  %v1426_v13 = vmin.f32 %v1275_v34, %v1276_v52  ;;  %v5859_v35 = vld [vmem:[#allocation28_spill] sm:$0xff]  ;;  %v5860_v21 = vld [vmem:[#allocation29_spill] sm:$0xff] }
 0x180   : > { %v2052_v8 = vadd.f32 %v4590_v53, %v5858_v19  ;;  %v2103_v54 = vmin.f32 %v4668_v16, %v2051_v39  ;;  %v1327_v9 = vmin.f32 %v4662_v4, %v1275_v34  ;;  %v961_v20 = vsub.f32 %v695_v50, %v5811_v58  ;;  %v5861_v34 = vld [vmem:[#allocation30_spill] sm:$0xff] }
 0x181   : > { %v2259_v32 = vmin.f32 %v1423_v33, %v2195_v1  ;;  %v962_v61 = vsub.f32 %v695_v50, %v5812_v59  ;;  %v1737_v22 = vsub.f32 %v695_v50, %v5813_v43  ;;  %v1738_v7 = vsub.f32 %v695_v50, %v5814_v30  ;;  %v5862_v33 = vld [vmem:[#allocation31_spill] sm:$0xff]  ;;  %v703_v1 = vpop.permute.xlu1 %702 }
 0x182   : > { %v2140_v23 = vmin.f32 %v4670_v36, %v2052_v8  ;;  %v2198_v2 = vmin.f32 %v2051_v39, %v2052_v8  ;;  %v4722_v15 = vmul.f32 %v961_v20, %v961_v20  ;;  %v967_v53 = vsub.f32 %v707_v11, %v5811_v58  ;;  %v5863_v20 = vld [vmem:[#allocation109_spill] sm:$0xff] }
 0x183   : > { %2365 = vmin.xlane.f32.xlu0 %v2259_v32  ;;  %v4725_v16 = vmul.f32 %v962_v61, %v962_v61  ;;  %v4727_v4 = vmul.f32 %v1737_v22, %v1737_v22  ;;  %v4729_v40 = vmul.f32 %v1738_v7, %v1738_v7  ;;  %v968_v37 = vsub.f32 %v707_v11, %v5812_v59 }
 0x184   : > { %v2262_v57 = vmin.f32 %v1426_v13, %v2198_v2  ;;  %v4732_v42 = vmul.f32 %v967_v53, %v967_v53  ;;  %v1743_v28 = vsub.f32 %v707_v11, %v5813_v43  ;;  %v1744_v36 = vsub.f32 %v707_v11, %v5814_v30  ;;  %v5864_v53 = vld [vmem:[#allocation32_spill] sm:$0xff] }
 0x185   : > { %v4736_v29 = vmul.f32 %v968_v37, %v968_v37  ;;  %v1273_v56 = vadd.f32 %v4618_v18, %v5859_v35  ;;  %v1274_v48 = vadd.f32 %v4621_v45, %v5860_v21  ;;  %v2049_v14 = vadd.f32 %v4623_v55, %v5861_v34 }
 0x186   : > { %2371 = vmin.xlane.f32.xlu1 %v2262_v57  ;;  %v4744_v52 = vmul.f32 %v1743_v28, %v1743_v28  ;;  %v4746_v50 = vmul.f32 %v1744_v36, %v1744_v36  ;;  %v2050_v25 = vadd.f32 %v4625_v41, %v5862_v33  ;;  %v1279_v39 = vadd.f32 %v4628_v6, %v4126_v31 }
 0x187   : > { %v1425_v13 = vmin.f32 %v1273_v56, %v1274_v48  ;;  %v4752_v18 = vmin.f32 %v1324_v17, %v1273_v56  ;;  %v4754_v11 = vmin.f32 %v1361_v38, %v1274_v48  ;;  %v4756_v45 = vmin.f32 %v2100_v63, %v2049_v14  ;;  %v715_v63 = vpop.permute.xlu0 %714  ;;  %v5865_v48 = vld [vmem:[#allocation33_spill] sm:$0xff] }
 0x188   : > { %v2197_v55 = vmin.f32 %v2049_v14, %v2050_v25  ;;  %v4758_v19 = vmin.f32 %v2137_v10, %v2050_v25  ;;  %v1280_v8 = vadd.f32 %v4632_v12, %v4129_v51  ;;  %v2055_v41 = vadd.f32 %v4640_v62, %v4132_v26  ;;  %v5866_v14 = vld [vmem:[#allocation34_spill] sm:$0xff] }
 0x189   : > { %v2056_v31 = vadd.f32 %v4642_v5, %v5863_v20  ;;  %v4766_v6 = vmin.f32 %v1327_v9, %v1279_v39  ;;  %v965_v17 = vsub.f32 %v703_v1, %v5811_v58  ;;  %v966_v38 = vsub.f32 %v703_v1, %v5812_v59 }
 0x18a   : > { %v2261_v32 = vmin.f32 %v1425_v13, %v2197_v55  ;;  %v4770_v61 = vmin.f32 %v1364_v46, %v1280_v8  ;;  %v1428_v10 = vmin.f32 %v1279_v39, %v1280_v8  ;;  %v4772_v22 = vmin.f32 %v2103_v54, %v2055_v41  ;;  %v5869_v55 = vld [vmem:[#allocation49_spill] sm:$0xff] }
 0x18b   : > { %v4774_v51 = vmin.f32 %v2140_v23, %v2056_v31  ;;  %v2200_v12 = vmin.f32 %v2055_v41, %v2056_v31  ;;  %v4776_v26 = vmul.f32 %v965_v17, %v965_v17  ;;  %v4778_v62 = vmul.f32 %v966_v38, %v966_v38  ;;  %v711_v41 = vpop.permute.xlu1 %710  ;;  %v5870_v17 = vld [vmem:[#allocation50_spill] sm:$0xff] }
 0x18c   : > { %2369 = vmin.xlane.f32.xlu0 %v2261_v32  ;;  %v1741_v5 = vsub.f32 %v703_v1, %v5813_v43  ;;  %v1742_v9 = vsub.f32 %v703_v1, %v5814_v30  ;;  %v971_v7 = vsub.f32 %v715_v63, %v5811_v58  ;;  %v972_v46 = vsub.f32 %v715_v63, %v5812_v59  ;;  %v5868_v1 = vld [vmem:[#allocation48_spill] sm:$0xff]  ;;  %v723_v32 = vpop.permute.xlu0 %722 }
 0x18d   : > { %v2264_v2 = vmin.f32 %v1428_v10, %v2200_v12  ;;  %v1747_v54 = vsub.f32 %v715_v63, %v5813_v43  ;;  %v1748_v23 = vsub.f32 %v715_v63, %v5814_v30  ;;  %v1277_v37 = vadd.f32 %v4672_v47, %v5864_v53  ;;  %v5867_v47 = vld [vmem:[#allocation35_spill] sm:$0xff] }
 0x18e   : > { %v4788_v57 = vmul.f32 %v1741_v5, %v1741_v5  ;;  %v4790_v28 = vmul.f32 %v1742_v9, %v1742_v9  ;;  %v4792_v36 = vmul.f32 %v971_v7, %v971_v7  ;;  %v4794_v35 = vmul.f32 %v972_v46, %v972_v46 }
 0x18f   : > { %2375 = vmin.xlane.f32.xlu1 %v2264_v2  ;;  %v4796_v56 = vmul.f32 %v1747_v54, %v1747_v54  ;;  %v4798_v21 = vmul.f32 %v1748_v23, %v1748_v23  ;;  %v1278_v34 = vadd.f32 %v4674_v27, %v5865_v48  ;;  %v2053_v33 = vadd.f32 %v4684_v44, %v5866_v14  ;;  %v5872_v48 = vld [vmem:[#allocation40_spill] sm:$0xff]  ;;  %v5873_v14 = vld [vmem:[#allocation41_spill] sm:$0xff] }
 0x190   : > { %v2054_v25 = vadd.f32 %v4686_v60, %v5867_v47  ;;  %v1328_v39 = vmin.f32 %v4752_v18, %v1277_v37  ;;  %v1283_v13 = vadd.f32 %v4688_v3, %v5868_v1  ;;  %v1284_v8 = vadd.f32 %v4690_v24, %v5869_v55  ;;  %v5871_v3 = vld [vmem:[#allocation51_spill] sm:$0xff]  ;;  %v5874_v47 = vld [vmem:[#allocation42_spill] sm:$0xff] }
 0x191   : > { %v1427_v20 = vmin.f32 %v1277_v37, %v1278_v34  ;;  %v1365_v31 = vmin.f32 %v4754_v11, %v1278_v34  ;;  %v2104_v27 = vmin.f32 %v4756_v45, %v2053_v33  ;;  %v2059_v44 = vadd.f32 %v4692_v0, %v5870_v17  ;;  %v5875_v55 = vld [vmem:[#allocation43_spill] sm:$0xff]  ;;  %v719_v17 = vpop.permute.xlu1 %718 }
 0x192   : > { %v2199_v38 = vmin.f32 %v2053_v33, %v2054_v25  ;;  %v2141_v60 = vmin.f32 %v4758_v19, %v2054_v25  ;;  %v1368_v18 = vmin.f32 %v4770_v61, %v1284_v8  ;;  %v1430_v63 = vmin.f32 %v1283_v13, %v1284_v8 }
 0x193   : > { %v2060_v10 = vadd.f32 %v4694_v49, %v5871_v3  ;;  %v2107_v24 = vmin.f32 %v4772_v22, %v2059_v44  ;;  %v1331_v12 = vmin.f32 %v4766_v6, %v1283_v13  ;;  %v969_v11 = vsub.f32 %v711_v41, %v5811_v58 }
 0x194   : > { %v2263_v45 = vmin.f32 %v1427_v20, %v2199_v38  ;;  %v970_v5 = vsub.f32 %v711_v41, %v5812_v59  ;;  %v1745_v0 = vsub.f32 %v711_v41, %v5813_v43  ;;  %v1746_v19 = vsub.f32 %v711_v41, %v5814_v30  ;;  %v5876_v41 = vld [vmem:[#allocation110_spill] sm:$0xff] }
 0x195   : > { %v2144_v61 = vmin.f32 %v4774_v51, %v2060_v10  ;;  %v2202_v9 = vmin.f32 %v2059_v44, %v2060_v10  ;;  %v4826_v7 = vmul.f32 %v969_v11, %v969_v11  ;;  %v975_v49 = vsub.f32 %v723_v32, %v5811_v58  ;;  %v5878_v10 = vld [vmem:[#allocation112_spill] sm:$0xff]  ;;  %v5879_v11 = vld [vmem:[#allocation113_spill] sm:$0xff] }
 0x196   : > { %2373 = vmin.xlane.f32.xlu0 %v2263_v45  ;;  %v4829_v22 = vmul.f32 %v970_v5, %v970_v5  ;;  %v4831_v6 = vmul.f32 %v1745_v0, %v1745_v0  ;;  %v4833_v46 = vmul.f32 %v1746_v19, %v1746_v19  ;;  %v976_v2 = vsub.f32 %v723_v32, %v5812_v59 }
 0x197   : > { %v2266_v54 = vmin.f32 %v1430_v63, %v2202_v9  ;;  %v4836_v23 = vmul.f32 %v975_v49, %v975_v49  ;;  %v1751_v53 = vsub.f32 %v723_v32, %v5813_v43  ;;  %v1752_v51 = vsub.f32 %v723_v32, %v5814_v30  ;;  %v5877_v32 = vld [vmem:[#allocation111_spill] sm:$0xff] }
 0x198   : > { %v4840_v37 = vmul.f32 %v976_v2, %v976_v2  ;;  %v1281_v34 = vadd.f32 %v4722_v15, %v5872_v48  ;;  %v1282_v33 = vadd.f32 %v4725_v16, %v5873_v14  ;;  %v2057_v25 = vadd.f32 %v4727_v4, %v5874_v47 }
 0x199   : > { %2379 = vmin.xlane.f32.xlu1 %v2266_v54  ;;  %v4848_v1 = vmul.f32 %v1751_v53, %v1751_v53  ;;  %v4850_v13 = vmul.f32 %v1752_v51, %v1752_v51  ;;  %v2058_v8 = vadd.f32 %v4729_v40, %v5875_v55  ;;  %v1287_v20 = vadd.f32 %v4732_v42, %v5876_v41  ;;  %v5880_v53 = vld [vmem:[#allocation44_spill] sm:$0xff]  ;;  %v5881_v55 = vld [vmem:[#allocation45_spill] sm:$0xff]  ;;  %v5882_v41 = vld [vmem:[#allocation46_spill] sm:$0xff] }
 0x19a   : > { %v1429_v44 = vmin.f32 %v1281_v34, %v1282_v33  ;;  %v4856_v15 = vmin.f32 %v1328_v39, %v1281_v34  ;;  %v4858_v38 = vmin.f32 %v1365_v31, %v1282_v33  ;;  %v4860_v16 = vmin.f32 %v2104_v27, %v2057_v25  ;;  %v731_v27 = vpop.permute.xlu0 %730 }
 0x19b   : > { %v2201_v4 = vmin.f32 %v2057_v25, %v2058_v8  ;;  %v4862_v63 = vmin.f32 %v2141_v60, %v2058_v8  ;;  %v1288_v3 = vadd.f32 %v4736_v29, %v5877_v32  ;;  %v2063_v40 = vadd.f32 %v4744_v52, %v5878_v10 }
 0x19c   : > { %v2064_v42 = vadd.f32 %v4746_v50, %v5879_v11  ;;  %v4870_v45 = vmin.f32 %v1331_v12, %v1287_v20  ;;  %v973_v39 = vsub.f32 %v719_v17, %v5811_v58  ;;  %v974_v31 = vsub.f32 %v719_v17, %v5812_v59 }
 0x19d   : > { %v2265_v5 = vmin.f32 %v1429_v44, %v2201_v4  ;;  %v4874_v0 = vmin.f32 %v1368_v18, %v1288_v3  ;;  %v1432_v60 = vmin.f32 %v1287_v20, %v1288_v3  ;;  %v4876_v19 = vmin.f32 %v2107_v24, %v2063_v40  ;;  %v5884_v4 = vld [vmem:[#allocation60_spill] sm:$0xff]  ;;  %v5885_v3 = vld [vmem:[#allocation61_spill] sm:$0xff] }
 0x19e   : > { %v4878_v29 = vmin.f32 %v2144_v61, %v2064_v42  ;;  %v2204_v9 = vmin.f32 %v2063_v40, %v2064_v42  ;;  %v4880_v52 = vmul.f32 %v973_v39, %v973_v39  ;;  %v4882_v49 = vmul.f32 %v974_v31, %v974_v31  ;;  %v727_v40 = vpop.permute.xlu1 %726  ;;  %v5886_v39 = vld [vmem:[#allocation62_spill] sm:$0xff] }
 0x19f   : > { %2377 = vmin.xlane.f32.xlu0 %v2265_v5  ;;  %v1749_v50 = vsub.f32 %v719_v17, %v5813_v43  ;;  %v1750_v12 = vsub.f32 %v719_v17, %v5814_v30  ;;  %v979_v2 = vsub.f32 %v731_v27, %v5811_v58  ;;  %v980_v18 = vsub.f32 %v731_v27, %v5812_v59  ;;  %v739_v5 = vpop.permute.xlu0 %738 }
 0x1a0   : > { %v2268_v54 = vmin.f32 %v1432_v60, %v2204_v9  ;;  %v1755_v24 = vsub.f32 %v731_v27, %v5813_v43  ;;  %v1756_v61 = vsub.f32 %v731_v27, %v5814_v30  ;;  %v1285_v51 = vadd.f32 %v4776_v26, %v5880_v53  ;;  %v5883_v26 = vld [vmem:[#allocation47_spill] sm:$0xff] }
 0x1a1   : > { %v4892_v48 = vmul.f32 %v1749_v50, %v1749_v50  ;;  %v4894_v34 = vmul.f32 %v1750_v12, %v1750_v12  ;;  %v4896_v14 = vmul.f32 %v979_v2, %v979_v2  ;;  %v4898_v33 = vmul.f32 %v980_v18, %v980_v18 }
 0x1a2   : > { %2383 = vmin.xlane.f32.xlu1 %v2268_v54  ;;  %v4900_v47 = vmul.f32 %v1755_v24, %v1755_v24  ;;  %v4902_v25 = vmul.f32 %v1756_v61, %v1756_v61  ;;  %v1286_v8 = vadd.f32 %v4778_v62, %v5881_v55  ;;  %v2061_v20 = vadd.f32 %v4788_v57, %v5882_v41  ;;  %v5888_v55 = vld [vmem:[#allocation52_spill] sm:$0xff]  ;;  %v5889_v41 = vld [vmem:[#allocation53_spill] sm:$0xff] }
 0x1a3   : > { %v2062_v17 = vadd.f32 %v4790_v28, %v5883_v26  ;;  %v1332_v44 = vmin.f32 %v4856_v15, %v1285_v51  ;;  %v1291_v32 = vadd.f32 %v4792_v36, %v5884_v4  ;;  %v1292_v10 = vadd.f32 %v4794_v35, %v5885_v3  ;;  %v5887_v36 = vld [vmem:[#allocation63_spill] sm:$0xff]  ;;  %v5890_v26 = vld [vmem:[#allocation54_spill] sm:$0xff] }
 0x1a4   : > { %v1431_v11 = vmin.f32 %v1285_v51, %v1286_v8  ;;  %v1369_v42 = vmin.f32 %v4858_v38, %v1286_v8  ;;  %v2108_v62 = vmin.f32 %v4860_v16, %v2061_v20  ;;  %v2067_v57 = vadd.f32 %v4796_v56, %v5886_v39  ;;  %v5891_v3 = vld [vmem:[#allocation55_spill] sm:$0xff]  ;;  %v735_v39 = vpop.permute.xlu1 %734 }
 0x1a5   : > { %v2203_v31 = vmin.f32 %v2061_v20, %v2062_v17  ;;  %v2145_v28 = vmin.f32 %v4862_v63, %v2062_v17  ;;  %v1372_v15 = vmin.f32 %v4874_v0, %v1292_v10  ;;  %v1434_v27 = vmin.f32 %v1291_v32, %v1292_v10 }
 0x1a6   : > { %v2068_v60 = vadd.f32 %v4798_v21, %v5887_v36  ;;  %v2111_v35 = vmin.f32 %v4876_v19, %v2067_v57  ;;  %v1335_v9 = vmin.f32 %v4870_v45, %v1291_v32  ;;  %v977_v38 = vsub.f32 %v727_v40, %v5811_v58 }
 0x1a7   : > { %v2267_v16 = vmin.f32 %v1431_v11, %v2203_v31  ;;  %v978_v50 = vsub.f32 %v727_v40, %v5812_v59  ;;  %v1753_v56 = vsub.f32 %v727_v40, %v5813_v43  ;;  %v1754_v63 = vsub.f32 %v727_v40, %v5814_v30  ;;  %v5892_v40 = vld [vmem:[#allocation114_spill] sm:$0xff] }
 0x1a8   : > { %v2148_v0 = vmin.f32 %v4878_v29, %v2068_v60  ;;  %v2206_v12 = vmin.f32 %v2067_v57, %v2068_v60  ;;  %v4930_v2 = vmul.f32 %v977_v38, %v977_v38  ;;  %v983_v21 = vsub.f32 %v739_v5, %v5811_v58  ;;  %v5894_v60 = vld [vmem:[#allocation116_spill] sm:$0xff]  ;;  %v5895_v38 = vld [vmem:[#allocation117_spill] sm:$0xff] }
 0x1a9   : > { %2381 = vmin.xlane.f32.xlu0 %v2267_v16  ;;  %v4933_v19 = vmul.f32 %v978_v50, %v978_v50  ;;  %v4935_v45 = vmul.f32 %v1753_v56, %v1753_v56  ;;  %v4937_v18 = vmul.f32 %v1754_v63, %v1754_v63  ;;  %v984_v54 = vsub.f32 %v739_v5, %v5812_v59 }
 0x1aa   : > { %v2270_v24 = vmin.f32 %v1434_v27, %v2206_v12  ;;  %v4940_v61 = vmul.f32 %v983_v21, %v983_v21  ;;  %v1759_v53 = vsub.f32 %v739_v5, %v5813_v43  ;;  %v1760_v29 = vsub.f32 %v739_v5, %v5814_v30  ;;  %v5893_v5 = vld [vmem:[#allocation115_spill] sm:$0xff] }
 0x1ab   : > { %v4944_v51 = vmul.f32 %v984_v54, %v984_v54  ;;  %v1289_v8 = vadd.f32 %v4826_v7, %v5888_v55  ;;  %v1290_v20 = vadd.f32 %v4829_v22, %v5889_v41  ;;  %v2065_v17 = vadd.f32 %v4831_v6, %v5890_v26 }
 0x1ac   : > { %2387 = vmin.xlane.f32.xlu1 %v2270_v24  ;;  %v4952_v4 = vmul.f32 %v1759_v53, %v1759_v53  ;;  %v4954_v32 = vmul.f32 %v1760_v29, %v1760_v29  ;;  %v2066_v10 = vadd.f32 %v4833_v46, %v5891_v3  ;;  %v1295_v11 = vadd.f32 %v4836_v23, %v5892_v40  ;;  %v5896_v53 = vld [vmem:[#allocation56_spill] sm:$0xff]  ;;  %v5897_v3 = vld [vmem:[#allocation57_spill] sm:$0xff]  ;;  %v5898_v40 = vld [vmem:[#allocation58_spill] sm:$0xff] }
 0x1ad   : > { %v1433_v57 = vmin.f32 %v1289_v8, %v1290_v20  ;;  %v4960_v7 = vmin.f32 %v1332_v44, %v1289_v8  ;;  %v4962_v31 = vmin.f32 %v1369_v42, %v1290_v20  ;;  %v4964_v22 = vmin.f32 %v2108_v62, %v2065_v17  ;;  %v747_v62 = vpop.permute.xlu0 %746 }
 0x1ae   : > { %v2205_v6 = vmin.f32 %v2065_v17, %v2066_v10  ;;  %v4966_v27 = vmin.f32 %v2145_v28, %v2066_v10  ;;  %v1296_v36 = vadd.f32 %v4840_v37, %v5893_v5  ;;  %v2071_v46 = vadd.f32 %v4848_v1, %v5894_v60 }
 0x1af   : > { %v2072_v23 = vadd.f32 %v4850_v13, %v5895_v38  ;;  %v4974_v16 = vmin.f32 %v1335_v9, %v1295_v11  ;;  %v981_v44 = vsub.f32 %v735_v39, %v5811_v58  ;;  %v982_v42 = vsub.f32 %v735_v39, %v5812_v59 }
 0x1b0   : > { %v2269_v50 = vmin.f32 %v1433_v57, %v2205_v6  ;;  %v4978_v56 = vmin.f32 %v1372_v15, %v1296_v36  ;;  %v1436_v28 = vmin.f32 %v1295_v11, %v1296_v36  ;;  %v4980_v63 = vmin.f32 %v2111_v35, %v2071_v46  ;;  %v5900_v6 = vld [vmem:[#allocation72_spill] sm:$0xff]  ;;  %v5901_v36 = vld [vmem:[#allocation73_spill] sm:$0xff] }
 0x1b1   : > { %v4982_v37 = vmin.f32 %v2148_v0, %v2072_v23  ;;  %v2208_v12 = vmin.f32 %v2071_v46, %v2072_v23  ;;  %v4984_v1 = vmul.f32 %v981_v44, %v981_v44  ;;  %v4986_v21 = vmul.f32 %v982_v42, %v982_v42  ;;  %v743_v46 = vpop.permute.xlu1 %742  ;;  %v5902_v44 = vld [vmem:[#allocation74_spill] sm:$0xff] }
 0x1b2   : > { %2385 = vmin.xlane.f32.xlu0 %v2269_v50  ;;  %v1757_v13 = vsub.f32 %v735_v39, %v5813_v43  ;;  %v1758_v9 = vsub.f32 %v735_v39, %v5814_v30  ;;  %v987_v54 = vsub.f32 %v747_v62, %v5811_v58  ;;  %v988_v15 = vsub.f32 %v747_v62, %v5812_v59  ;;  %v755_v50 = vpop.permute.xlu0 %754 }
 0x1b3   : > { %v2272_v24 = vmin.f32 %v1436_v28, %v2208_v12  ;;  %v1763_v35 = vsub.f32 %v747_v62, %v5813_v43  ;;  %v1764_v0 = vsub.f32 %v747_v62, %v5814_v30  ;;  %v1293_v29 = vadd.f32 %v4880_v52, %v5896_v53  ;;  %v5899_v52 = vld [vmem:[#allocation59_spill] sm:$0xff] }
 0x1b4   : > { %v4996_v55 = vmul.f32 %v1757_v13, %v1757_v13  ;;  %v4998_v8 = vmul.f32 %v1758_v9, %v1758_v9  ;;  %v5000_v41 = vmul.f32 %v987_v54, %v987_v54  ;;  %v5002_v20 = vmul.f32 %v988_v15, %v988_v15 }
 0x1b5   : > { %2391 = vmin.xlane.f32.xlu1 %v2272_v24  ;;  %v5004_v26 = vmul.f32 %v1763_v35, %v1763_v35  ;;  %v5006_v17 = vmul.f32 %v1764_v0, %v1764_v0  ;;  %v1294_v10 = vadd.f32 %v4882_v49, %v5897_v3  ;;  %v2069_v11 = vadd.f32 %v4892_v48, %v5898_v40  ;;  %v5904_v3 = vld [vmem:[#allocation64_spill] sm:$0xff]  ;;  %v5905_v40 = vld [vmem:[#allocation65_spill] sm:$0xff] }
 0x1b6   : > { %v2070_v39 = vadd.f32 %v4894_v34, %v5899_v52  ;;  %v1336_v57 = vmin.f32 %v4960_v7, %v1293_v29  ;;  %v1299_v5 = vadd.f32 %v4896_v14, %v5900_v6  ;;  %v1300_v60 = vadd.f32 %v4898_v33, %v5901_v36  ;;  %v5903_v14 = vld [vmem:[#allocation75_spill] sm:$0xff]  ;;  %v5906_v52 = vld [vmem:[#allocation66_spill] sm:$0xff] }
 0x1b7   : > { %v1435_v38 = vmin.f32 %v1293_v29, %v1294_v10  ;;  %v1373_v23 = vmin.f32 %v4962_v31, %v1294_v10  ;;  %v2112_v49 = vmin.f32 %v4964_v22, %v2069_v11  ;;  %v2075_v48 = vadd.f32 %v4900_v47, %v5902_v44  ;;  %v5907_v36 = vld [vmem:[#allocation67_spill] sm:$0xff]  ;;  %v751_v44 = vpop.permute.xlu1 %750 }
 0x1b8   : > { %v2207_v42 = vmin.f32 %v2069_v11, %v2070_v39  ;;  %v2149_v34 = vmin.f32 %v4966_v27, %v2070_v39  ;;  %v1376_v7 = vmin.f32 %v4978_v56, %v1300_v60  ;;  %v1438_v62 = vmin.f32 %v1299_v5, %v1300_v60 }
 0x1b9   : > { %v2076_v28 = vadd.f32 %v4902_v25, %v5903_v14  ;;  %v2115_v33 = vmin.f32 %v4980_v63, %v2075_v48  ;;  %v1339_v12 = vmin.f32 %v4974_v16, %v1299_v5  ;;  %v985_v31 = vsub.f32 %v743_v46, %v5811_v58 }
 0x1ba   : > { %v2271_v22 = vmin.f32 %v1435_v38, %v2207_v42  ;;  %v986_v13 = vsub.f32 %v743_v46, %v5812_v59  ;;  %v1761_v47 = vsub.f32 %v743_v46, %v5813_v43  ;;  %v1762_v27 = vsub.f32 %v743_v46, %v5814_v30  ;;  %v5908_v46 = vld [vmem:[#allocation118_spill] sm:$0xff] }
 0x1bb   : > { %v2152_v56 = vmin.f32 %v4982_v37, %v2076_v28  ;;  %v2210_v9 = vmin.f32 %v2075_v48, %v2076_v28  ;;  %v5034_v54 = vmul.f32 %v985_v31, %v985_v31  ;;  %v991_v25 = vsub.f32 %v755_v50, %v5811_v58  ;;  %v5910_v28 = vld [vmem:[#allocation120_spill] sm:$0xff]  ;;  %v5911_v31 = vld [vmem:[#allocation121_spill] sm:$0xff] }
 0x1bc   : > { %2389 = vmin.xlane.f32.xlu0 %v2271_v22  ;;  %v5037_v63 = vmul.f32 %v986_v13, %v986_v13  ;;  %v5039_v16 = vmul.f32 %v1761_v47, %v1761_v47  ;;  %v5041_v15 = vmul.f32 %v1762_v27, %v1762_v27  ;;  %v992_v24 = vsub.f32 %v755_v50, %v5812_v59 }
 0x1bd   : > { %v2274_v35 = vmin.f32 %v1438_v62, %v2210_v9  ;;  %v5044_v0 = vmul.f32 %v991_v25, %v991_v25  ;;  %v1767_v53 = vsub.f32 %v755_v50, %v5813_v43  ;;  %v1768_v37 = vsub.f32 %v755_v50, %v5814_v30  ;;  %v5909_v50 = vld [vmem:[#allocation119_spill] sm:$0xff] }
 0x1be   : > { %v5048_v29 = vmul.f32 %v992_v24, %v992_v24  ;;  %v1297_v10 = vadd.f32 %v4930_v2, %v5904_v3  ;;  %v1298_v11 = vadd.f32 %v4933_v19, %v5905_v40  ;;  %v2073_v39 = vadd.f32 %v4935_v45, %v5906_v52 }
 0x1bf   : > { %2395 = vmin.xlane.f32.xlu1 %v2274_v35  ;;  %v5056_v6 = vmul.f32 %v1767_v53, %v1767_v53  ;;  %v5058_v5 = vmul.f32 %v1768_v37, %v1768_v37  ;;  %v2074_v60 = vadd.f32 %v4937_v18, %v5907_v36  ;;  %v1303_v38 = vadd.f32 %v4940_v61, %v5908_v46  ;;  %v5912_v53 = vld [vmem:[#allocation68_spill] sm:$0xff]  ;;  %v5913_v36 = vld [vmem:[#allocation69_spill] sm:$0xff]  ;;  %v5914_v46 = vld [vmem:[#allocation70_spill] sm:$0xff] }
 0x1c0   : > { %v1437_v48 = vmin.f32 %v1297_v10, %v1298_v11  ;;  %v5064_v2 = vmin.f32 %v1336_v57, %v1297_v10  ;;  %v5066_v42 = vmin.f32 %v1373_v23, %v1298_v11  ;;  %v5068_v19 = vmin.f32 %v2112_v49, %v2073_v39  ;;  %v763_v49 = vpop.permute.xlu0 %762 }
 0x1c1   : > { %v2209_v45 = vmin.f32 %v2073_v39, %v2074_v60  ;;  %v5070_v62 = vmin.f32 %v2149_v34, %v2074_v60  ;;  %v1304_v14 = vadd.f32 %v4944_v51, %v5909_v50  ;;  %v2079_v18 = vadd.f32 %v4952_v4, %v5910_v28 }
 0x1c2   : > { %v2080_v61 = vadd.f32 %v4954_v32, %v5911_v31  ;;  %v5078_v22 = vmin.f32 %v1339_v12, %v1303_v38  ;;  %v989_v57 = vsub.f32 %v751_v44, %v5811_v58  ;;  %v990_v23 = vsub.f32 %v751_v44, %v5812_v59 }
 0x1c3   : > { %v2273_v13 = vmin.f32 %v1437_v48, %v2209_v45  ;;  %v5082_v47 = vmin.f32 %v1376_v7, %v1304_v14  ;;  %v1440_v34 = vmin.f32 %v1303_v38, %v1304_v14  ;;  %v5084_v27 = vmin.f32 %v2115_v33, %v2079_v18  ;;  %v5916_v45 = vld [vmem:[#allocation122_spill] sm:$0xff]  ;;  %v5917_v14 = vld [vmem:[#allocation123_spill] sm:$0xff] }
 0x1c4   : > { %v5086_v51 = vmin.f32 %v2152_v56, %v2080_v61  ;;  %v2212_v9 = vmin.f32 %v2079_v18, %v2080_v61  ;;  %v5088_v4 = vmul.f32 %v989_v57, %v989_v57  ;;  %v5090_v25 = vmul.f32 %v990_v23, %v990_v23  ;;  %v759_v18 = vpop.permute.xlu1 %758  ;;  %v5918_v57 = vld [vmem:[#allocation84_spill] sm:$0xff] }
 0x1c5   : > { %2393 = vmin.xlane.f32.xlu0 %v2273_v13  ;;  %v1765_v32 = vsub.f32 %v751_v44, %v5813_v43  ;;  %v1766_v12 = vsub.f32 %v751_v44, %v5814_v30  ;;  %v995_v24 = vsub.f32 %v763_v49, %v5811_v58  ;;  %v996_v7 = vsub.f32 %v763_v49, %v5812_v59  ;;  %v5919_v13 = vld [vmem:[#allocation85_spill] sm:$0xff] }
 0x1c6   : > { %v2276_v35 = vmin.f32 %v1440_v34, %v2212_v9  ;;  %v1771_v33 = vsub.f32 %v763_v49, %v5813_v43  ;;  %v1772_v56 = vsub.f32 %v763_v49, %v5814_v30  ;;  %v1301_v37 = vadd.f32 %v4984_v1, %v5912_v53  ;;  %v5915_v1 = vld [vmem:[#allocation71_spill] sm:$0xff]  ;;  %v5922_v53 = vld [vmem:[#allocation78_spill] sm:$0xff] }
 0x1c7   : > { %v5100_v3 = vmul.f32 %v1765_v32, %v1765_v32  ;;  %v5102_v10 = vmul.f32 %v1766_v12, %v1766_v12  ;;  %v5104_v40 = vmul.f32 %v995_v24, %v995_v24  ;;  %v5106_v11 = vmul.f32 %v996_v7, %v996_v7  ;;  %v5920_v24 = vld [vmem:[#allocation76_spill] sm:$0xff] }
 0x1c8   : > { %2399 = vmin.xlane.f32.xlu1 %v2276_v35  ;;  %v5108_v52 = vmul.f32 %v1771_v33, %v1771_v33  ;;  %v5110_v39 = vmul.f32 %v1772_v56, %v1772_v56  ;;  %v1302_v60 = vadd.f32 %v4986_v21, %v5913_v36  ;;  %v2077_v38 = vadd.f32 %v4996_v55, %v5914_v46  ;;  %v5921_v35 = vld [vmem:[#allocation77_spill] sm:$0xff]  ;;  %v5923_v36 = vld [vmem:[#allocation79_spill] sm:$0xff] }
 0x1c9   : > { %v2078_v44 = vadd.f32 %v4998_v8, %v5915_v1  ;;  %v1340_v48 = vmin.f32 %v5064_v2, %v1301_v37  ;;  %v1307_v50 = vadd.f32 %v5000_v41, %v5916_v45  ;;  %v1308_v28 = vadd.f32 %v5002_v20, %v5917_v14  ;;  %v5924_v1 = vld [vmem:[#allocation124_spill] sm:$0xff] }
 0x1ca   : > { %v1439_v31 = vmin.f32 %v1301_v37, %v1302_v60  ;;  %v1377_v61 = vmin.f32 %v5066_v42, %v1302_v60  ;;  %v2116_v21 = vmin.f32 %v5068_v19, %v2077_v38  ;;  %v2083_v55 = vadd.f32 %v5004_v26, %v5918_v57 }
 0x1cb   : > { %v2211_v23 = vmin.f32 %v2077_v38, %v2078_v44  ;;  %v2153_v8 = vmin.f32 %v5070_v62, %v2078_v44  ;;  %v1380_v2 = vmin.f32 %v5082_v47, %v1308_v28  ;;  %v1442_v49 = vmin.f32 %v1307_v50, %v1308_v28  ;;  %v5925_v44 = vld [vmem:[#allocation125_spill] sm:$0xff] }
 0x1cc   : > { %v2084_v41 = vadd.f32 %v5006_v17, %v5919_v13  ;;  %v2119_v20 = vmin.f32 %v5084_v27, %v2083_v55  ;;  %v1343_v34 = vmin.f32 %v5078_v22, %v1307_v50  ;;  %v993_v42 = vsub.f32 %v759_v18, %v5811_v58  ;;  %v767_v50 = vpop.permute.xlu1 %766 }
 0x1cd   : > { %v2275_v9 = vmin.f32 %v1439_v31, %v2211_v23  ;;  %v994_v19 = vsub.f32 %v759_v18, %v5812_v59  ;;  %v1769_v26 = vsub.f32 %v759_v18, %v5813_v43  ;;  %v1770_v32 = vsub.f32 %v759_v18, %v5814_v30  ;;  %v5926_v18 = vld [vmem:[#allocation126_spill] sm:$0xff] }
 0x1ce   : > { %v2156_v62 = vmin.f32 %v5086_v51, %v2084_v41  ;;  %v2214_v47 = vmin.f32 %v2083_v55, %v2084_v41  ;;  %v1249_v12 = vmul.f32 %v993_v42, %v993_v42  ;;  %v1305_v17 = vadd.f32 %v5034_v54, %v5920_v24  ;;  %v5928_v41 = vld [vmem:[#allocation80_spill] sm:$0xff] }
 0x1cf   : > { %2397 = vmin.xlane.f32.xlu0 %v2275_v9  ;;  %v1250_v27 = vmul.f32 %v994_v19, %v994_v19  ;;  %v2025_v7 = vmul.f32 %v1769_v26, %v1769_v26  ;;  %v2026_v22 = vmul.f32 %v1770_v32, %v1770_v32  ;;  %v1306_v33 = vadd.f32 %v5037_v63, %v5921_v35  ;;  %v5930_v19 = vld [vmem:[#allocation82_spill] sm:$0xff]  ;;  %v5931_v32 = vld [vmem:[#allocation83_spill] sm:$0xff]  ;;  %v5932_v24 = vld [vmem:[#allocation128_spill] sm:$0xff] }
 0x1d0   : > { %v2278_v56 = vmin.f32 %v1442_v49, %v2214_v47  ;;  %v2081_v37 = vadd.f32 %v5039_v16, %v5922_v53  ;;  %v2082_v60 = vadd.f32 %v5041_v15, %v5923_v36  ;;  %v1342_v51 = vmin.f32 %v1340_v48, %v1305_v17  ;;  %v5927_v48 = vld [vmem:[#allocation127_spill] sm:$0xff]  ;;  %v5936_v36 = vld [vmem:[#allocation86_spill] sm:$0xff] }
 0x1d1   : > { %v1441_v46 = vmin.f32 %v1305_v17, %v1306_v33  ;;  %v1379_v38 = vmin.f32 %v1377_v61, %v1306_v33  ;;  %v1311_v54 = vadd.f32 %v5044_v0, %v5924_v1  ;;  %v1312_v45 = vadd.f32 %v5048_v29, %v5925_v44  ;;  %v5933_v17 = vld [vmem:[#allocation94_spill] sm:$0xff]  ;;  %v5934_v35 = vld [vmem:[#allocation95_spill] sm:$0xff] }
 0x1d2   : > { %2403 = vmin.xlane.f32.xlu1 %v2278_v56  ;;  %v2213_v14 = vmin.f32 %v2081_v37, %v2082_v60  ;;  %v2118_v63 = vmin.f32 %v2116_v21, %v2081_v37  ;;  %v2155_v28 = vmin.f32 %v2153_v8, %v2082_v60  ;;  %v2087_v16 = vadd.f32 %v5056_v6, %v5926_v18 }
 0x1d3   : > { %v5152_v31 = vmin.f32 %v1380_v2, %v1312_v45  ;;  %v1444_v15 = vmin.f32 %v1311_v54, %v1312_v45  ;;  %v2088_v61 = vadd.f32 %v5058_v5, %v5927_v48  ;;  %v5156_v57 = vmin.f32 %v1343_v34, %v1311_v54  ;;  %v5929_v34 = vld [vmem:[#allocation81_spill] sm:$0xff]  ;;  %v5937_v54 = vld [vmem:[#allocation87_spill] sm:$0xff] }
 0x1d4   : > { %v2277_v0 = vmin.f32 %v1441_v46, %v2213_v14  ;;  %v5158_v55 = vmin.f32 %v2119_v20, %v2087_v16  ;;  %v997_v29 = vsub.f32 %v767_v50, %v5811_v58  ;;  %v998_v23 = vsub.f32 %v767_v50, %v5812_v59 }
 0x1d5   : > { %v2158_v21 = vmin.f32 %v2156_v62, %v2088_v61  ;;  %v2216_v8 = vmin.f32 %v2087_v16, %v2088_v61  ;;  %v1773_v49 = vsub.f32 %v767_v50, %v5813_v43  ;;  %v1774_v6 = vsub.f32 %v767_v50, %v5814_v30  ;;  %v5939_v50 = vld [vmem:[#allocation89_spill] sm:$0xff] }
 0x1d6   : > { %2401 = vmin.xlane.f32.xlu0 %v2277_v0  ;;  %v1253_v2 = vmul.f32 %v997_v29, %v997_v29  ;;  %v1254_v13 = vmul.f32 %v998_v23, %v998_v23  ;;  %v1309_v5 = vadd.f32 %v5088_v4, %v5928_v41  ;;  %v1310_v20 = vadd.f32 %v5090_v25, %v5929_v34  ;;  %v5943_v29 = vld [vmem:[#allocation7_spill] sm:$0xff] }
 0x1d7   : > { %v2280_v42 = vmin.f32 %v1444_v15, %v2216_v8  ;;  %v2029_v9 = vmul.f32 %v1773_v49, %v1773_v49  ;;  %v2030_v58 = vmul.f32 %v1774_v6, %v1774_v6  ;;  %v2085_v59 = vadd.f32 %v5100_v3, %v5930_v19  ;;  %v5935_v3 = vld [vmem:[#allocation96_spill] sm:$0xff] }
 0x1d8   : > { %v1443_v26 = vmin.f32 %v1309_v5, %v1310_v20  ;;  %v2086_v43 = vadd.f32 %v5102_v10, %v5931_v32  ;;  %v1344_v30 = vmin.f32 %v1342_v51, %v1309_v5  ;;  %v1381_v62 = vmin.f32 %v1379_v38, %v1310_v20 }
 0x1d9   : > { %2407 = vmin.xlane.f32.xlu1 %v2280_v42  ;;  %v2120_v47 = vmin.f32 %v2118_v63, %v2085_v59  ;;  %v1315_v4 = vadd.f32 %v5104_v40, %v5932_v24  ;;  %v1316_v25 = vadd.f32 %v5106_v11, %v5933_v17  ;;  %v2091_v33 = vadd.f32 %v5108_v52, %v5934_v35  ;;  %v5938_v52 = vld [vmem:[#allocation88_spill] sm:$0xff] }
 0x1da   : > { %v2215_v56 = vmin.f32 %v2085_v59, %v2086_v43  ;;  %v2157_v53 = vmin.f32 %v2155_v28, %v2086_v43  ;;  %v2092_v37 = vadd.f32 %v5110_v39, %v5935_v3  ;;  %v1313_v10 = vadd.f32 %v1249_v12, %v5936_v36  ;;  %v5940_v39 = vld [vmem:[#allocation4_spill] sm:$0xff] }
 0x1db   : > { %v1384_v60 = vmin.f32 %v5152_v31, %v1316_v25  ;;  %v1446_v51 = vmin.f32 %v1315_v4, %v1316_v25  ;;  %v2123_v46 = vmin.f32 %v5158_v55, %v2091_v33  ;;  %v1347_v40 = vmin.f32 %v5156_v57, %v1315_v4  ;;  %v5941_v31 = vld [vmem:[#allocation5_spill] sm:$0xff]  ;;  %v5942_v55 = vld [vmem:[#allocation6_spill] sm:$0xff] }
 0x1dc   : > { %v2279_v38 = vmin.f32 %v1443_v26, %v2215_v56  ;;  %v2160_v1 = vmin.f32 %v2158_v21, %v2092_v37  ;;  %v2218_v11 = vmin.f32 %v2091_v33, %v2092_v37  ;;  %v1314_v44 = vadd.f32 %v1250_v27, %v5937_v54 }
 0x1dd   : > { %v2089_v45 = vadd.f32 %v2025_v7, %v5938_v52  ;;  %v2090_v14 = vadd.f32 %v2026_v22, %v5939_v50  ;;  %v1346_v63 = vmin.f32 %v1344_v30, %v1313_v10  ;;  %v1317_v28 = vadd.f32 %v1253_v2, %v5940_v39 }
 0x1de   : > { %2405 = vmin.xlane.f32.xlu0 %v2279_v38  ;;  %v2282_v12 = vmin.f32 %v1446_v51, %v2218_v11  ;;  %v1445_v18 = vmin.f32 %v1313_v10, %v1314_v44  ;;  %v1383_v16 = vmin.f32 %v1381_v62, %v1314_v44  ;;  %v1318_v15 = vadd.f32 %v1254_v13, %v5941_v31 }
 0x1df   : > { %v2217_v48 = vmin.f32 %v2089_v45, %v2090_v14  ;;  %v2122_v61 = vmin.f32 %v2120_v47, %v2089_v45  ;;  %v2159_v57 = vmin.f32 %v2157_v53, %v2090_v14  ;;  %v2093_v27 = vadd.f32 %v2029_v9, %v5942_v55 }
 0x1e0   : > { %2411 = vmin.xlane.f32.xlu1 %v2282_v12  ;;  %v1447_v0 = vmin.f32 %v1317_v28, %v1318_v15  ;;  %v2094_v7 = vadd.f32 %v2030_v58, %v5943_v29  ;;  %v1348_v22 = vmin.f32 %v1346_v63, %v1317_v28  ;;  %v1385_v21 = vmin.f32 %v1383_v16, %v1318_v15 }
 0x1e1   : > { %v2281_v23 = vmin.f32 %v1445_v18, %v2217_v48  ;;  %v2124_v49 = vmin.f32 %v2122_v61, %v2093_v27  ;;  %v3275_v26 = vmov 1966171168   ;;  %v5945_v12 = vlaneseq }
 0x1e2   : > { %v2219_v8 = vmin.f32 %v2093_v27, %v2094_v7  ;;  %v2161_v6 = vmin.f32 %v2159_v57, %v2094_v7  ;;  %v1349_v2 = vmin.f32 %v1347_v40, %v1348_v22  ;;  %v1386_v41 = vmin.f32 %v1384_v60, %v1385_v21 }
 0x1e3   : > { %2409 = vmin.xlane.f32.xlu0 %v2281_v23  ;;  %v2125_v13 = vmin.f32 %v2123_v46, %v2124_v49  ;;  %v1397_v9 = vunpack.c.l.s4 %v3275_v26  ;;  %vm1413_vm0 = vcmp.lt.s32.totalorder %v5945_v12, 256 }
 0x1e4   : > { %v2283_v5 = vmin.f32 %v1447_v0, %v2219_v8  ;;  %v2162_v34 = vmin.f32 %v2160_v1, %v2161_v6  ;;  %v1350_v20 = vrot.slane %v1349_v2, 4  ;;  %v1387_v42 = vrot.slane %v1386_v41, 4  ;;  %v5944_v1 = vld [vmem:[#allocation3_spill] sm:$0xff] }
 0x1e5   : > { %v2126_v19 = vrot.slane %v2125_v13, 4  ;;  %v1398_v25 = vunpack.c.0.s8 %v1397_v9 }
 0x1e6   : > { %v2163_v59 = vrot.slane %v2162_v34, 4  ;;  %v1351_v58 = vmin.f32 %v1349_v2, %v1350_v20  ;;  %v1388_v32 = vmin.f32 %v1386_v41, %v1387_v42 }
 0x1e7   : > { %2413 = vmin.xlane.f32.xlu0 %v2283_v5  ;;  %v2127_v43 = vmin.f32 %v2125_v13, %v2126_v19  ;;  %v1401_v11 = vsub.s32 %v1398_v25, %v5944_v1 }
 0x1e8   : > { %v2164_v30 = vmin.f32 %v2162_v34, %v2163_v59  ;;  %v1352_v62 = vrot.slane %v1351_v58, 2  ;;  %v1389_v47 = vrot.slane %v1388_v32, 2 }
 0x1e9   : > { %v2128_v24 = vrot.slane %v2127_v43, 2 }
 0x1ea   : > { %v2165_v4 = vrot.slane %v2164_v30, 2  ;;  %v2352_v17 = vpop.xlane.xlu0 %2351  ;;  %v1353_v35 = vmin.f32 %v1351_v58, %v1352_v62  ;;  %v1390_v33 = vmin.f32 %v1388_v32, %v1389_v47 }
 0x1eb   : > { %v2354_v56 = vpop.xlane.xlu1 %2353  ;;  %v2415_v53 = vmax.f32 %v2352_v17, 1e-05  ;;  %v2129_v3 = vmin.f32 %v2127_v43, %v2128_v24 }
 0x1ec   : > { %v2166_v37 = vmin.f32 %v2164_v30, %v2165_v4  ;;  %v2416_v36 = vmax.f32 %v2354_v56, 1e-05  ;;  %v1354_v10 = vrot.slane %v1353_v35, 1  ;;  %v1391_v60 = vrot.slane %v1390_v33, 1 }
 0x1ed   : > { %v2479_v51 = vadd.f32 2.0, %v2415_v53  ;;  %v2130_v46 = vrot.slane %v2129_v3, 1  ;;  %v2447_v22 = vadd.f32 1.0, %v2415_v53 }
 0x1ee   : > { %v2167_v40 = vrot.slane %v2166_v37, 1  ;;  %v2480_v38 = vadd.f32 2.0, %v2416_v36  ;;  %v1355_v54 = vmin.f32 %v1353_v35, %v1354_v10  ;;  %v1392_v44 = vmin.f32 %v1390_v33, %v1391_v60 }
 0x1ef   : > { %v2511_v52 = vmul.f32 %v2479_v51, %v2415_v53  ;;  %v2131_v45 = vmin.f32 %v2129_v3, %v2130_v46  ;;  %v2448_v13 = vadd.f32 1.0, %v2416_v36 }
 0x1f0   : > { %v2168_v50 = vmin.f32 %v2166_v37, %v2167_v40  ;;  %v2512_v14 = vmul.f32 %v2480_v38, %v2416_v36  ;;  %v1395_v63 = vcombine.low %v1355_v54, %v1392_v44 }
 0x1f1   : > { %3120 = vrsqrt.f32 %v2511_v52  ;;  %vm2545_vm1 = vcmp.eq.f32.partialorder %v2511_v52, inf  ;;  %vm2547_vm2 = vcmp.eq.f32.partialorder %v2511_v52, 0.0  ;;  %v2548_v49 = vand.u32 2147483648, %v2511_v52 }
 0x1f2   : > { %v2171_v39 = vcombine.low %v2131_v45, %v2168_v50  ;;  %3122 = vrsqrt.f32 %v2512_v14  ;;  %v1402_v28 = vrot.slane %v1395_v63, %v1401_v11  ;;  %vm2552_vm3 = vcmp.eq.f32.partialorder %v2512_v14, inf }
 0x1f3   : > { %v2555_v2 = vand.u32 2147483648, %v2512_v14  ;;  %vm2554_vm4 = vcmp.eq.f32.partialorder %v2512_v14, 0.0 }
 0x1f4   : > { %v2178_v18 = vrot.slane %v2171_v39, %v1401_v11  ;;  %v2360_v16 = vpop.xlane.xlu1 %2359  ;;  %v2356_v31 = vpop.xlane.xlu0 %2355  ;;  %v1409_v15 = vrot.slane %v1402_v28, %v1401_v11 }
 0x1f5   : > { %v2419_v48 = vmax.f32 %v2360_v16, 1e-05  ;;  %v2417_v61 = vmax.f32 %v2356_v31, 1e-05 }
 0x1f6   : > { %v2185_v57 = vrot.slane %v2178_v18, %v1401_v11  ;;  %1415 = vst.msk [vmem:[%s283_s27] sm:$0x3] %vm1413_vm0, %v1409_v15 }
 0x1f7   : > { %v2483_v0 = vadd.f32 2.0, %v2419_v48  ;;  %v2481_v55 = vadd.f32 2.0, %v2417_v61  ;;  %v2451_v24 = vadd.f32 1.0, %v2419_v48  ;;  %v2449_v37 = vadd.f32 1.0, %v2417_v61 }
 0x1f8   : > { %2187 = vst.msk [vmem:[%s283_s27 + $0x2] sm:$0x3] %vm1413_vm0, %v2185_v57 }
 0x1f9   : > { %v2515_v27 = vmul.f32 %v2483_v0, %v2419_v48  ;;  %v2513_v29 = vmul.f32 %v2481_v55, %v2417_v61 }
 0x1fb   : > { %v3121_v7 = vpop.eup %3120  ;;  %3124 = vrsqrt.f32 %v2515_v27  ;;  %vm2573_vm5 = vcmp.eq.f32.partialorder %v2515_v27, inf  ;;  %vm2575_vm6 = vcmp.eq.f32.partialorder %v2515_v27, 0.0  ;;  %v2576_v25 = vand.u32 2147483648, %v2515_v27 }
 0x1fc   : > { %v3123_v23 = vpop.eup %3122  ;;  %v2544_v21 = vmul.f32 %v3121_v7, %v2511_v52  ;;  %3126 = vrsqrt.f32 %v2513_v29  ;;  %vm2559_vm7 = vcmp.eq.f32.partialorder %v2513_v29, inf  ;;  %v2562_v56 = vand.u32 2147483648, %v2513_v29 }
 0x1fd   : > { %v2551_v8 = vmul.f32 %v3123_v23, %v2512_v14  ;;  %v2358_v6 = vpop.xlane.xlu0 %2357  ;;  %vm2561_vm8 = vcmp.eq.f32.partialorder %v2513_v29, 0.0 }
 0x1fe   : > { %v2546_v41 = vsel %vm2545_vm1, %v2511_v52, %v2544_v21  ;;  %v2418_v5 = vmax.f32 %v2358_v6, 1e-05 }
 0x1ff   : > { %v2553_v34 = vsel %vm2552_vm3, %v2512_v14, %v2551_v8  ;;  %v2549_v20 = vsel %vm2547_vm2, %v2548_v49, %v2546_v41 }
 0x200   : > { %v2556_v42 = vsel %vm2554_vm4, %v2555_v2, %v2553_v34  ;;  %v2767_v19 = vadd.f32 %v2549_v20, %v2447_v22  ;;  %v2364_v59 = vpop.xlane.xlu1 %2363  ;;  %v2482_v26 = vadd.f32 2.0, %v2418_v5  ;;  %v2450_v18 = vadd.f32 1.0, %v2418_v5 }
 0x201   : > { %v2768_v9 = vadd.f32 %v2556_v42, %v2448_v13  ;;  %v2421_v58 = vmax.f32 %v2364_v59, 1e-05 }
 0x202   : > { %3128 = vlog2.f32 %v2767_v19  ;;  %v2514_v32 = vmul.f32 %v2482_v26, %v2418_v5 }
 0x203   : > { %3130 = vlog2.f32 %v2768_v9  ;;  %v2485_v43 = vadd.f32 2.0, %v2421_v58 }
 0x204   : > { %3132 = vrsqrt.f32 %v2514_v32  ;;  %vm2566_vm10 = vcmp.eq.f32.partialorder %v2514_v32, inf  ;;  %v2569_v39 = vand.u32 2147483648, %v2514_v32  ;;  %vm2568_vm11 = vcmp.eq.f32.partialorder %v2514_v32, 0.0 }
 0x205   : > { %v3125_v30 = vpop.eup %3124  ;;  %v2517_v62 = vmul.f32 %v2485_v43, %v2421_v58 }
 0x206   : > { %v3127_v47 = vpop.eup %3126  ;;  %v2572_v4 = vmul.f32 %v3125_v30, %v2515_v27  ;;  %v2362_v17 = vpop.xlane.xlu0 %2361 }
 0x207   : > { %v2558_v35 = vmul.f32 %v3127_v47, %v2513_v29  ;;  %3134 = vrsqrt.f32 %v2517_v62  ;;  %v5197_v53 = vmax.f32 %v2362_v17, 1e-05  ;;  %vm2587_vm12 = vcmp.eq.f32.partialorder %v2517_v62, inf }
 0x208   : > { %v2574_v33 = vsel %vm2573_vm5, %v2515_v27, %v2572_v4  ;;  %v2590_v61 = vand.u32 2147483648, %v2517_v62  ;;  %v2453_v27 = vadd.f32 1.0, %v2421_v58  ;;  %vm2589_vm13 = vcmp.eq.f32.partialorder %v2517_v62, 0.0 }
 0x209   : > { %v2577_v3 = vsel %vm2575_vm6, %v2576_v25, %v2574_v33  ;;  %v2560_v36 = vsel %vm2559_vm7, %v2513_v29, %v2558_v35  ;;  %v2368_v10 = vpop.xlane.xlu1 %2367  ;;  %v2484_v38 = vadd.f32 2.0, %v5197_v53  ;;  %v2452_v19 = vadd.f32 1.0, %v5197_v53 }
 0x20a   : > { %v2771_v60 = vadd.f32 %v2577_v3, %v2451_v24  ;;  %v2563_v51 = vsel %vm2561_vm8, %v2562_v56, %v2560_v36  ;;  %v2423_v46 = vmax.f32 %v2368_v10, 1e-05 }
 0x20b   : > { %v2769_v40 = vadd.f32 %v2563_v51, %v2449_v37  ;;  %v2516_v52 = vmul.f32 %v2484_v38, %v5197_v53 }
 0x20c   : > { %v3129_v1 = vpop.eup %3128  ;;  %3136 = vlog2.f32 %v2771_v60  ;;  %v2487_v11 = vadd.f32 2.0, %v2423_v46  ;;  %v2455_v42 = vadd.f32 1.0, %v2423_v46 }
 0x20d   : > { %v3131_v54 = vpop.eup %3130  ;;  %v2800_v44 = vmul.f32 0.6931472, %v3129_v1  ;;  %3138 = vlog2.f32 %v2769_v40  ;;  %vm2580_vm14 = vcmp.eq.f32.partialorder %v2516_v52, inf  ;;  %v2583_v9 = vand.u32 2147483648, %v2516_v52 }
 0x20e   : > { %v3133_v45 = vpop.eup %3132  ;;  %v2802_v50 = vmul.f32 0.6931472, %v3131_v54  ;;  %v2519_v14 = vmul.f32 %v2487_v11, %v2423_v46  ;;  %3140 = vrsqrt.f32 %v2516_v52  ;;  %vm2582_vm0 = vcmp.eq.f32.partialorder %v2516_v52, 0.0 }
 0x20f   : > { %2864 = vst.msk [vmem:[%s5205_s30] sm:$0xff] %vm2863_vm9, %v2800_v44  ;;  %v2565_v63 = vmul.f32 %v3133_v45, %v2514_v32 }
 0x210   : > { %2865 = vst.msk [vmem:[%s5205_s30 + $0x8] sm:$0xff] %vm2863_vm9, %v2802_v50  ;;  %3142 = vrsqrt.f32 %v2519_v14  ;;  %v2366_v28 = vpop.xlane.xlu0 %2365  ;;  %vm2601_vm15 = vcmp.eq.f32.partialorder %v2519_v14, inf  ;;  %vm2603_vm1 = vcmp.eq.f32.partialorder %v2519_v14, 0.0 }
 0x211   : > { %v3135_v12 = vpop.eup %3134  ;;  %v2567_v16 = vsel %vm2566_vm10, %v2514_v32, %v2565_v63  ;;  %v5212_v31 = vmax.f32 %v2366_v28, 1e-05  ;;  %v2604_v32 = vand.u32 2147483648, %v2519_v14 }
 0x212   : > { %v2586_v15 = vmul.f32 %v3135_v12, %v2517_v62  ;;  %v2570_v48 = vsel %vm2568_vm11, %v2569_v39, %v2567_v16 }
 0x213   : > { %v2770_v57 = vadd.f32 %v2570_v48, %v2450_v18  ;;  %v2372_v0 = vpop.xlane.xlu1 %2371  ;;  %v2486_v55 = vadd.f32 2.0, %v5212_v31  ;;  %v2454_v1 = vadd.f32 1.0, %v5212_v31 }
 0x214   : > { %v2588_v29 = vsel %vm2587_vm12, %v2517_v62, %v2586_v15  ;;  %v5215_v7 = vmax.f32 %v2372_v0, 1e-05 }
 0x215   : > { %v2591_v23 = vsel %vm2589_vm13, %v2590_v61, %v2588_v29  ;;  %3144 = vlog2.f32 %v2770_v57  ;;  %v2518_v22 = vmul.f32 %v2486_v55, %v5212_v31 }
 0x216   : > { %v3137_v21 = vpop.eup %3136  ;;  %v2773_v8 = vadd.f32 %v2591_v23, %v2453_v27  ;;  %v2489_v49 = vadd.f32 2.0, %v5215_v7  ;;  %v2457_v39 = vadd.f32 1.0, %v5215_v7 }
 0x217   : > { %v3139_v6 = vpop.eup %3138  ;;  %v2808_v2 = vmul.f32 0.6931472, %v3137_v21  ;;  %3146 = vrsqrt.f32 %v2518_v22  ;;  %vm2594_vm2 = vcmp.eq.f32.partialorder %v2518_v22, inf  ;;  %v2597_v46 = vand.u32 2147483648, %v2518_v22 }
 0x218   : > { %v2804_v41 = vmul.f32 0.6931472, %v3139_v6  ;;  %3148 = vlog2.f32 %v2773_v8  ;;  %v5220_v5 = vmul.f32 %v2489_v49, %v5215_v7  ;;  %v3141_v13 = vpop.eup %3140  ;;  %vm2596_vm3 = vcmp.eq.f32.partialorder %v2518_v22, 0.0 }
 0x219   : > { %2868 = vst.msk [vmem:[%s5205_s30 + $0x20] sm:$0xff] %vm2863_vm9, %v2808_v2  ;;  %v2370_v34 = vpop.xlane.xlu0 %2369  ;;  %v2579_v59 = vmul.f32 %v3141_v13, %v2516_v52 }
 0x21a   : > { %v3143_v20 = vpop.eup %3142  ;;  %2866 = vst.msk [vmem:[%s5205_s30 + $0x10] sm:$0xff] %vm2863_vm9, %v2804_v41  ;;  %3150 = vrsqrt.f32 %v5220_v5  ;;  %v5228_v58 = vmax.f32 %v2370_v34, 1e-05  ;;  %vm2615_vm4 = vcmp.eq.f32.partialorder %v5220_v5, inf  ;;  %v2618_v45 = vand.u32 2147483648, %v5220_v5 }
 0x21b   : > { %v2600_v26 = vmul.f32 %v3143_v20, %v2519_v14  ;;  %v2581_v43 = vsel %vm2580_vm14, %v2516_v52, %v2579_v59  ;;  %vm2617_vm5 = vcmp.eq.f32.partialorder %v5220_v5, 0.0 }
 0x21c   : > { %v2376_v30 = vpop.xlane.xlu1 %2375  ;;  %v2584_v47 = vsel %vm2582_vm0, %v2583_v9, %v2581_v43  ;;  %v2488_v25 = vadd.f32 2.0, %v5228_v58 }
 0x21d   : > { %v2602_v62 = vsel %vm2601_vm15, %v2519_v14, %v2600_v26  ;;  %v2427_v24 = vmax.f32 %v2376_v30, 1e-05  ;;  %v2772_v17 = vadd.f32 %v2584_v47, %v2452_v19 }
 0x21e   : > { %v2605_v4 = vsel %vm2603_vm1, %v2604_v32, %v2602_v62  ;;  %v5232_v3 = vmul.f32 %v2488_v25, %v5228_v58 }
 0x21f   : > { %v3145_v35 = vpop.eup %3144  ;;  %v2775_v33 = vadd.f32 %v2605_v4, %v2455_v42  ;;  %v2491_v56 = vadd.f32 2.0, %v2427_v24  ;;  %3152 = vlog2.f32 %v2772_v17  ;;  %v2459_v23 = vadd.f32 1.0, %v2427_v24 }
 0x220   : > { %v2806_v53 = vmul.f32 0.6931472, %v3145_v35  ;;  %vm2608_vm6 = vcmp.eq.f32.partialorder %v5232_v3, inf  ;;  %v2611_v49 = vand.u32 2147483648, %v5232_v3  ;;  %vm2610_vm8 = vcmp.eq.f32.partialorder %v5232_v3, 0.0 }
 0x221   : > { %v3147_v37 = vpop.eup %3146  ;;  %3154 = vlog2.f32 %v2775_v33  ;;  %v5234_v36 = vmul.f32 %v2491_v56, %v2427_v24 }
 0x222   : > { %v3149_v10 = vpop.eup %3148  ;;  %2867 = vst.msk [vmem:[%s5205_s30 + $0x18] sm:$0xff] %vm2863_vm9, %v2806_v53  ;;  %v2593_v60 = vmul.f32 %v3147_v37, %v2518_v22  ;;  %3156 = vrsqrt.f32 %v5232_v3 }
 0x223   : > { %v2812_v51 = vmul.f32 0.6931472, %v3149_v10  ;;  %3158 = vrsqrt.f32 %v5234_v36  ;;  %v2374_v40 = vpop.xlane.xlu0 %2373  ;;  %vm2629_vm7 = vcmp.eq.f32.partialorder %v5234_v36, inf  ;;  %v2632_v2 = vand.u32 2147483648, %v5234_v36 }
 0x224   : > { %v3151_v38 = vpop.eup %3150  ;;  %v2595_v11 = vsel %vm2594_vm2, %v2518_v22, %v2593_v60  ;;  %v5241_v54 = vmax.f32 %v2374_v40, 1e-05  ;;  %v2456_v22 = vadd.f32 1.0, %v5228_v58  ;;  %vm2631_vm10 = vcmp.eq.f32.partialorder %v5234_v36, 0.0 }
 0x225   : > { %2870 = vst.msk [vmem:[%s5205_s30 + $0x30] sm:$0xff] %vm2863_vm9, %v2812_v51  ;;  %v2614_v44 = vmul.f32 %v3151_v38, %v5220_v5  ;;  %v2598_v52 = vsel %vm2596_vm3, %v2597_v46, %v2595_v11 }
 0x226   : > { %v2774_v50 = vadd.f32 %v2598_v52, %v2454_v1  ;;  %v2380_v14 = vpop.xlane.xlu1 %2379  ;;  %v2490_v63 = vadd.f32 2.0, %v5241_v54  ;;  %v2458_v33 = vadd.f32 1.0, %v5241_v54 }
 0x227   : > { %v2616_v28 = vsel %vm2615_vm4, %v5220_v5, %v2614_v44  ;;  %v5252_v12 = vmax.f32 %v2380_v14, 1e-05 }
 0x228   : > { %v2619_v18 = vsel %vm2617_vm5, %v2618_v45, %v2616_v28  ;;  %3160 = vlog2.f32 %v2774_v50  ;;  %v2522_v16 = vmul.f32 %v2490_v63, %v5241_v54 }
 0x229   : > { %v2777_v31 = vadd.f32 %v2619_v18, %v2457_v39  ;;  %v2493_v15 = vadd.f32 2.0, %v5252_v12  ;;  %v3153_v48 = vpop.eup %3152  ;;  %v2461_v46 = vadd.f32 1.0, %v5252_v12 }
 0x22a   : > { %3162 = vrsqrt.f32 %v2522_v16  ;;  %v2810_v57 = vmul.f32 0.6931472, %v3153_v48  ;;  %vm2622_vm11 = vcmp.eq.f32.partialorder %v2522_v16, inf  ;;  %v2625_v17 = vand.u32 2147483648, %v2522_v16 }
 0x22b   : > { %v3155_v61 = vpop.eup %3154  ;;  %3164 = vlog2.f32 %v2777_v31  ;;  %v5257_v0 = vmul.f32 %v2493_v15, %v5252_v12  ;;  %vm2624_vm12 = vcmp.eq.f32.partialorder %v2522_v16, 0.0 }
 0x22c   : > { %v3157_v55 = vpop.eup %3156  ;;  %v2816_v27 = vmul.f32 0.6931472, %v3155_v61  ;;  %v2378_v29 = vpop.xlane.xlu0 %2377  ;;  %2869 = vst.msk [vmem:[%s5205_s30 + $0x28] sm:$0xff] %vm2863_vm9, %v2810_v57 }
 0x22d   : > { %v3159_v7 = vpop.eup %3158  ;;  %v2607_v21 = vmul.f32 %v3157_v55, %v5232_v3  ;;  %3166 = vrsqrt.f32 %v5257_v0  ;;  %v5269_v6 = vmax.f32 %v2378_v29, 1e-05  ;;  %vm2643_vm13 = vcmp.eq.f32.partialorder %v5257_v0, inf }
 0x22e   : > { %2872 = vst.msk [vmem:[%s5205_s30 + $0x40] sm:$0xff] %vm2863_vm9, %v2816_v27  ;;  %v2628_v8 = vmul.f32 %v3159_v7, %v5234_v36  ;;  %vm2645_vm14 = vcmp.eq.f32.partialorder %v5257_v0, 0.0 }
 0x22f   : > { %v2609_v41 = vsel %vm2608_vm6, %v5232_v3, %v2607_v21  ;;  %v2384_v5 = vpop.xlane.xlu1 %2383  ;;  %v2492_v59 = vadd.f32 2.0, %v5269_v6 }
 0x230   : > { %v2630_v13 = vsel %vm2629_vm7, %v5234_v36, %v2628_v8  ;;  %v2612_v34 = vsel %vm2610_vm8, %v2611_v49, %v2609_v41  ;;  %v2431_v20 = vmax.f32 %v2384_v5, 1e-05  ;;  %v2646_v36 = vand.u32 2147483648, %v5257_v0 }
 0x231   : > { %v2633_v42 = vsel %vm2631_vm10, %v2632_v2, %v2630_v13  ;;  %v2776_v19 = vadd.f32 %v2612_v34, %v2456_v22  ;;  %v5279_v43 = vmul.f32 %v2492_v59, %v5269_v6 }
 0x232   : > { %v3161_v26 = vpop.eup %3160  ;;  %v2779_v9 = vadd.f32 %v2633_v42, %v2459_v23  ;;  %v2495_v58 = vadd.f32 2.0, %v2431_v20  ;;  %v2463_v18 = vadd.f32 1.0, %v2431_v20 }
 0x233   : > { %v2814_v32 = vmul.f32 0.6931472, %v3161_v26  ;;  %3168 = vlog2.f32 %v2776_v19  ;;  %vm2636_vm15 = vcmp.eq.f32.partialorder %v5279_v43, inf  ;;  %v2639_v48 = vand.u32 2147483648, %v5279_v43 }
 0x234   : > { %v3163_v30 = vpop.eup %3162  ;;  %3170 = vlog2.f32 %v2779_v9  ;;  %v5281_v62 = vmul.f32 %v2495_v58, %v2431_v20  ;;  %vm2638_vm1 = vcmp.eq.f32.partialorder %v5279_v43, 0.0 }
 0x235   : > { %v3165_v47 = vpop.eup %3164  ;;  %2871 = vst.msk [vmem:[%s5205_s30 + $0x38] sm:$0xff] %vm2863_vm9, %v2814_v32  ;;  %v2621_v24 = vmul.f32 %v3163_v30, %v2522_v16  ;;  %3172 = vrsqrt.f32 %v5279_v43 }
 0x236   : > { %v2820_v4 = vmul.f32 0.6931472, %v3165_v47  ;;  %3174 = vrsqrt.f32 %v5281_v62  ;;  %v2382_v25 = vpop.xlane.xlu0 %2381  ;;  %vm2657_vm0 = vcmp.eq.f32.partialorder %v5281_v62, inf  ;;  %v2660_v57 = vand.u32 2147483648, %v5281_v62 }
 0x237   : > { %v3167_v35 = vpop.eup %3166  ;;  %v2623_v56 = vsel %vm2622_vm11, %v2522_v16, %v2621_v24  ;;  %v5288_v53 = vmax.f32 %v2382_v25, 1e-05  ;;  %v2460_v16 = vadd.f32 1.0, %v5269_v6  ;;  %vm2659_vm2 = vcmp.eq.f32.partialorder %v5281_v62, 0.0 }
 0x238   : > { %2874 = vst.msk [vmem:[%s5205_s30 + $0x50] sm:$0xff] %vm2863_vm9, %v2820_v4  ;;  %v2642_v3 = vmul.f32 %v3167_v35, %v5257_v0  ;;  %v2626_v37 = vsel %vm2624_vm12, %v2625_v17, %v2623_v56 }
 0x239   : > { %v2778_v10 = vadd.f32 %v2626_v37, %v2458_v33  ;;  %v2388_v60 = vpop.xlane.xlu1 %2387  ;;  %v2494_v51 = vadd.f32 2.0, %v5288_v53  ;;  %v2462_v9 = vadd.f32 1.0, %v5288_v53 }
 0x23a   : > { %v2644_v40 = vsel %vm2643_vm13, %v5257_v0, %v2642_v3  ;;  %v5299_v38 = vmax.f32 %v2388_v60, 1e-05 }
 0x23b   : > { %v2647_v1 = vsel %vm2645_vm14, %v2646_v36, %v2644_v40  ;;  %3176 = vlog2.f32 %v2778_v10  ;;  %v2526_v11 = vmul.f32 %v2494_v51, %v5288_v53 }
 0x23c   : > { %v2781_v54 = vadd.f32 %v2647_v1, %v2461_v46  ;;  %v2497_v44 = vadd.f32 2.0, %v5299_v38  ;;  %v2465_v17 = vadd.f32 1.0, %v5299_v38 }
 0x23d   : > { %v3169_v52 = vpop.eup %3168  ;;  %3178 = vrsqrt.f32 %v2526_v11  ;;  %vm2650_vm3 = vcmp.eq.f32.partialorder %v2526_v11, inf  ;;  %v2653_v19 = vand.u32 2147483648, %v2526_v11  ;;  %vm2652_vm4 = vcmp.eq.f32.partialorder %v2526_v11, 0.0 }
 0x23e   : > { %v3171_v45 = vpop.eup %3170  ;;  %v2818_v50 = vmul.f32 0.6931472, %v3169_v52  ;;  %3180 = vlog2.f32 %v2781_v54  ;;  %v5304_v14 = vmul.f32 %v2497_v44, %v5299_v38 }
 0x23f   : > { %v3173_v63 = vpop.eup %3172  ;;  %v2824_v39 = vmul.f32 0.6931472, %v3171_v45  ;;  %v2386_v28 = vpop.xlane.xlu0 %2385 }
 0x240   : > { %v3175_v12 = vpop.eup %3174  ;;  %2873 = vst.msk [vmem:[%s5205_s30 + $0x48] sm:$0xff] %vm2863_vm9, %v2818_v50  ;;  %v2635_v31 = vmul.f32 %v3173_v63, %v5279_v43  ;;  %3182 = vrsqrt.f32 %v5304_v14  ;;  %v5316_v61 = vmax.f32 %v2386_v28, 1e-05  ;;  %vm2671_vm5 = vcmp.eq.f32.partialorder %v5304_v14, inf }
 0x241   : > { %2876 = vst.msk [vmem:[%s5205_s30 + $0x60] sm:$0xff] %vm2863_vm9, %v2824_v39  ;;  %v2656_v15 = vmul.f32 %v3175_v12, %v5281_v62  ;;  %vm2673_vm6 = vcmp.eq.f32.partialorder %v5304_v14, 0.0 }
 0x242   : > { %v2637_v0 = vsel %vm2636_vm15, %v5279_v43, %v2635_v31  ;;  %v2392_v55 = vpop.xlane.xlu1 %2391  ;;  %v2496_v21 = vadd.f32 2.0, %v5316_v61 }
 0x243   : > { %v2658_v27 = vsel %vm2657_vm0, %v5281_v62, %v2656_v15  ;;  %v2640_v29 = vsel %vm2638_vm1, %v2639_v48, %v2637_v0  ;;  %v2435_v7 = vmax.f32 %v2392_v55, 1e-05  ;;  %v2674_v62 = vand.u32 2147483648, %v5304_v14 }
 0x244   : > { %v2661_v23 = vsel %vm2659_vm2, %v2660_v57, %v2658_v27  ;;  %v2780_v22 = vadd.f32 %v2640_v29, %v2460_v16  ;;  %v5326_v41 = vmul.f32 %v2496_v21, %v5316_v61 }
 0x245   : > { %v3177_v8 = vpop.eup %3176  ;;  %v2783_v49 = vadd.f32 %v2661_v23, %v2463_v18  ;;  %v2499_v6 = vadd.f32 2.0, %v2435_v7  ;;  %v2467_v1 = vadd.f32 1.0, %v2435_v7 }
 0x246   : > { %v2822_v2 = vmul.f32 0.6931472, %v3177_v8  ;;  %3184 = vlog2.f32 %v2780_v22  ;;  %vm2664_vm7 = vcmp.eq.f32.partialorder %v5326_v41, inf  ;;  %v2667_v52 = vand.u32 2147483648, %v5326_v41 }
 0x247   : > { %v3179_v5 = vpop.eup %3178  ;;  %3186 = vlog2.f32 %v2783_v49  ;;  %v5328_v13 = vmul.f32 %v2499_v6, %v2435_v7  ;;  %vm2666_vm10 = vcmp.eq.f32.partialorder %v5326_v41, 0.0 }
 0x248   : > { %v3181_v34 = vpop.eup %3180  ;;  %2875 = vst.msk [vmem:[%s5205_s30 + $0x58] sm:$0xff] %vm2863_vm9, %v2822_v2  ;;  %v2649_v20 = vmul.f32 %v3179_v5, %v2526_v11  ;;  %3188 = vrsqrt.f32 %v5326_v41 }
 0x249   : > { %v2828_v42 = vmul.f32 0.6931472, %v3181_v34  ;;  %3190 = vrsqrt.f32 %v5328_v13  ;;  %v2390_v59 = vpop.xlane.xlu0 %2389  ;;  %vm2685_vm8 = vcmp.eq.f32.partialorder %v5328_v13, inf  ;;  %v2688_v50 = vand.u32 2147483648, %v5328_v13 }
 0x24a   : > { %v3183_v26 = vpop.eup %3182  ;;  %v2651_v58 = vsel %vm2650_vm3, %v2526_v11, %v2649_v20  ;;  %v5335_v32 = vmax.f32 %v2390_v59, 1e-05  ;;  %v2464_v11 = vadd.f32 1.0, %v5316_v61  ;;  %vm2687_vm11 = vcmp.eq.f32.partialorder %v5328_v13, 0.0 }
 0x24b   : > { %2878 = vst.msk [vmem:[%s5205_s30 + $0x70] sm:$0xff] %vm2863_vm9, %v2828_v42  ;;  %v2670_v43 = vmul.f32 %v3183_v26, %v5304_v14  ;;  %v2654_v30 = vsel %vm2652_vm4, %v2653_v19, %v2651_v58 }
 0x24c   : > { %v2782_v47 = vadd.f32 %v2654_v30, %v2462_v9  ;;  %v2396_v24 = vpop.xlane.xlu1 %2395  ;;  %v2498_v4 = vadd.f32 2.0, %v5335_v32  ;;  %v2466_v49 = vadd.f32 1.0, %v5335_v32 }
 0x24d   : > { %v2672_v25 = vsel %vm2671_vm5, %v5304_v14, %v2670_v43  ;;  %v5346_v35 = vmax.f32 %v2396_v24, 1e-05 }
 0x24e   : > { %v2675_v33 = vsel %vm2673_vm6, %v2674_v62, %v2672_v25  ;;  %3192 = vlog2.f32 %v2782_v47  ;;  %v2530_v56 = vmul.f32 %v2498_v4, %v5335_v32 }
 0x24f   : > { %v2785_v53 = vadd.f32 %v2675_v33, %v2465_v17  ;;  %v2501_v3 = vadd.f32 2.0, %v5346_v35  ;;  %v2469_v19 = vadd.f32 1.0, %v5346_v35 }
 0x250   : > { %v3185_v37 = vpop.eup %3184  ;;  %3194 = vrsqrt.f32 %v2530_v56  ;;  %vm2678_vm12 = vcmp.eq.f32.partialorder %v2530_v56, inf  ;;  %v2681_v22 = vand.u32 2147483648, %v2530_v56  ;;  %vm2680_vm13 = vcmp.eq.f32.partialorder %v2530_v56, 0.0 }
 0x251   : > { %v3187_v36 = vpop.eup %3186  ;;  %v2826_v10 = vmul.f32 0.6931472, %v3185_v37  ;;  %3196 = vlog2.f32 %v2785_v53  ;;  %v5351_v60 = vmul.f32 %v2501_v3, %v5346_v35 }
 0x252   : > { %v3189_v51 = vpop.eup %3188  ;;  %v2832_v46 = vmul.f32 0.6931472, %v3187_v36  ;;  %v2394_v40 = vpop.xlane.xlu0 %2393 }
 0x253   : > { %v3191_v38 = vpop.eup %3190  ;;  %2877 = vst.msk [vmem:[%s5205_s30 + $0x68] sm:$0xff] %vm2863_vm9, %v2826_v10  ;;  %v2663_v54 = vmul.f32 %v3189_v51, %v5326_v41  ;;  %3198 = vrsqrt.f32 %v5351_v60  ;;  %v2436_v45 = vmax.f32 %v2394_v40, 1e-05  ;;  %vm2699_vm14 = vcmp.eq.f32.partialorder %v5351_v60, inf }
 0x254   : > { %2880 = vst.msk [vmem:[%s5205_s30 + $0x80] sm:$0xff] %vm2863_vm9, %v2832_v46  ;;  %v2684_v44 = vmul.f32 %v3191_v38, %v5328_v13  ;;  %vm2701_vm15 = vcmp.eq.f32.partialorder %v5351_v60, 0.0 }
 0x255   : > { %v2665_v14 = vsel %vm2664_vm7, %v5326_v41, %v2663_v54  ;;  %v2400_v63 = vpop.xlane.xlu1 %2399  ;;  %v2500_v31 = vadd.f32 2.0, %v2436_v45  ;;  %v2468_v33 = vadd.f32 1.0, %v2436_v45 }
 0x256   : > { %v2686_v39 = vsel %vm2685_vm8, %v5328_v13, %v2684_v44  ;;  %v2668_v28 = vsel %vm2666_vm10, %v2667_v52, %v2665_v14  ;;  %v2439_v12 = vmax.f32 %v2400_v63, 1e-05  ;;  %v2702_v13 = vand.u32 2147483648, %v5351_v60 }
 0x257   : > { %v2689_v18 = vsel %vm2687_vm11, %v2688_v50, %v2686_v39  ;;  %v2784_v16 = vadd.f32 %v2668_v28, %v2464_v11  ;;  %v5369_v0 = vmul.f32 %v2500_v31, %v2436_v45 }
 0x258   : > { %v3193_v15 = vpop.eup %3192  ;;  %v2787_v48 = vadd.f32 %v2689_v18, %v2467_v1  ;;  %v2503_v61 = vadd.f32 2.0, %v2439_v12  ;;  %v2471_v53 = vadd.f32 1.0, %v2439_v12 }
 0x259   : > { %v2830_v57 = vmul.f32 0.6931472, %v3193_v15  ;;  %3200 = vlog2.f32 %v2784_v16  ;;  %vm2692_vm0 = vcmp.eq.f32.partialorder %v5369_v0, inf  ;;  %vm2694_vm1 = vcmp.eq.f32.partialorder %v5369_v0, 0.0 }
 0x25a   : > { %v3195_v55 = vpop.eup %3194  ;;  %3202 = vlog2.f32 %v2787_v48  ;;  %v5371_v27 = vmul.f32 %v2503_v61, %v2439_v12  ;;  %v2695_v10 = vand.u32 2147483648, %v5369_v0 }
 0x25b   : > { %v3197_v29 = vpop.eup %3196  ;;  %2879 = vst.msk [vmem:[%s5205_s30 + $0x78] sm:$0xff] %vm2863_vm9, %v2830_v57  ;;  %v2677_v7 = vmul.f32 %v3195_v55, %v2530_v56  ;;  %3204 = vrsqrt.f32 %v5369_v0 }
 0x25c   : > { %v2836_v23 = vmul.f32 0.6931472, %v3197_v29  ;;  %3206 = vrsqrt.f32 %v5371_v27  ;;  %v2398_v21 = vpop.xlane.xlu0 %2397  ;;  %vm2713_vm2 = vcmp.eq.f32.partialorder %v5371_v27, inf  ;;  %v2716_v51 = vand.u32 2147483648, %v5371_v27 }
 0x25d   : > { %v3199_v8 = vpop.eup %3198  ;;  %v2679_v6 = vsel %vm2678_vm12, %v2530_v56, %v2677_v7  ;;  %v5378_v2 = vmax.f32 %v2398_v21, 1e-05  ;;  %vm2715_vm3 = vcmp.eq.f32.partialorder %v5371_v27, 0.0 }
 0x25e   : > { %2882 = vst.msk [vmem:[%s5205_s30 + $0x90] sm:$0xff] %vm2863_vm9, %v2836_v23  ;;  %v2698_v41 = vmul.f32 %v3199_v8, %v5351_v60  ;;  %v2682_v5 = vsel %vm2680_vm13, %v2681_v22, %v2679_v6 }
 0x25f   : > { %v2786_v34 = vadd.f32 %v2682_v5, %v2466_v49  ;;  %v2404_v20 = vpop.xlane.xlu1 %2403  ;;  %v2502_v42 = vadd.f32 2.0, %v5378_v2 }
 0x260   : > { %v2700_v59 = vsel %vm2699_vm14, %v5351_v60, %v2698_v41  ;;  %v5389_v26 = vmax.f32 %v2404_v20, 1e-05 }
 0x261   : > { %v2703_v9 = vsel %vm2701_vm15, %v2702_v13, %v2700_v59  ;;  %3208 = vlog2.f32 %v2786_v34  ;;  %v5392_v58 = vmul.f32 %v2502_v42, %v5378_v2 }
 0x262   : > { %v2789_v32 = vadd.f32 %v2703_v9, %v2469_v19  ;;  %v2505_v43 = vadd.f32 2.0, %v5389_v26  ;;  %v2473_v7 = vadd.f32 1.0, %v5389_v26 }
 0x263   : > { %v3201_v30 = vpop.eup %3200  ;;  %3210 = vrsqrt.f32 %v5392_v58  ;;  %v2402_v62 = vpop.xlane.xlu0 %2401  ;;  %vm2706_vm4 = vcmp.eq.f32.partialorder %v5392_v58, inf  ;;  %v2709_v48 = vand.u32 2147483648, %v5392_v58  ;;  %vm2708_vm5 = vcmp.eq.f32.partialorder %v5392_v58, 0.0 }
 0x264   : > { %v3203_v47 = vpop.eup %3202  ;;  %v2834_v24 = vmul.f32 0.6931472, %v3201_v30  ;;  %3212 = vlog2.f32 %v2789_v32  ;;  %v5397_v4 = vmul.f32 %v2505_v43, %v5389_v26  ;;  %v5399_v17 = vmax.f32 %v2402_v62, 1e-05 }
 0x265   : > { %v3205_v25 = vpop.eup %3204  ;;  %v2840_v35 = vmul.f32 0.6931472, %v3203_v47 }
 0x266   : > { %v3207_v56 = vpop.eup %3206  ;;  %2881 = vst.msk [vmem:[%s5205_s30 + $0x88] sm:$0xff] %vm2863_vm9, %v2834_v24  ;;  %v2691_v3 = vmul.f32 %v3205_v25, %v5369_v0  ;;  %3214 = vrsqrt.f32 %v5397_v4  ;;  %v2408_v37 = vpop.xlane.xlu1 %2407  ;;  %v2504_v40 = vadd.f32 2.0, %v5399_v17  ;;  %vm2727_vm6 = vcmp.eq.f32.partialorder %v5397_v4, inf }
 0x267   : > { %2884 = vst.msk [vmem:[%s5205_s30 + $0xa0] sm:$0xff] %vm2863_vm9, %v2840_v35  ;;  %v2712_v36 = vmul.f32 %v3207_v56, %v5371_v27  ;;  %v5411_v60 = vmax.f32 %v2408_v37, 1e-05  ;;  %v2730_v8 = vand.u32 2147483648, %v5397_v4  ;;  %vm2729_vm7 = vcmp.eq.f32.partialorder %v5397_v4, 0.0 }
 0x268   : > { %v2693_v46 = vsel %vm2692_vm0, %v5369_v0, %v2691_v3  ;;  %v5424_v14 = vmul.f32 %v2504_v40, %v5399_v17  ;;  %v2470_v0 = vadd.f32 1.0, %v5378_v2  ;;  %v2472_v43 = vadd.f32 1.0, %v5399_v17 }
 0x269   : > { %v2714_v38 = vsel %vm2713_vm2, %v5371_v27, %v2712_v36  ;;  %v2696_v1 = vsel %vm2694_vm1, %v2695_v10, %v2693_v46  ;;  %v2507_v11 = vadd.f32 2.0, %v5411_v60  ;;  %v2475_v62 = vadd.f32 1.0, %v5411_v60 }
 0x26a   : > { %v2717_v54 = vsel %vm2715_vm3, %v2716_v51, %v2714_v38  ;;  %v2788_v44 = vadd.f32 %v2696_v1, %v2468_v33  ;;  %vm2720_vm10 = vcmp.eq.f32.partialorder %v5424_v14, inf  ;;  %v2723_v33 = vand.u32 2147483648, %v5424_v14 }
 0x26b   : > { %v3209_v52 = vpop.eup %3208  ;;  %v2791_v45 = vadd.f32 %v2717_v54, %v2471_v53  ;;  %v5421_v50 = vmul.f32 %v2507_v11, %v5411_v60  ;;  %v2406_v63 = vpop.xlane.xlu0 %2405  ;;  %vm2722_vm12 = vcmp.eq.f32.partialorder %v5424_v14, 0.0 }
 0x26c   : > { %v2838_v39 = vmul.f32 0.6931472, %v3209_v52  ;;  %3216 = vlog2.f32 %v2788_v44  ;;  %v5435_v61 = vmax.f32 %v2406_v63, 1e-05 }
 0x26d   : > { %v3211_v28 = vpop.eup %3210  ;;  %3218 = vlog2.f32 %v2791_v45  ;;  %v2412_v12 = vpop.xlane.xlu1 %2411  ;;  %vm2741_vm8 = vcmp.eq.f32.partialorder %v5421_v50, inf  ;;  %v2744_v25 = vand.u32 2147483648, %v5421_v50  ;;  %vm2743_vm11 = vcmp.eq.f32.partialorder %v5421_v50, 0.0 }
 0x26e   : > { %v3213_v18 = vpop.eup %3212  ;;  %2883 = vst.msk [vmem:[%s5205_s30 + $0x98] sm:$0xff] %vm2863_vm9, %v2838_v39  ;;  %v2705_v16 = vmul.f32 %v3211_v28, %v5392_v58  ;;  %3220 = vrsqrt.f32 %v5421_v50  ;;  %v5431_v31 = vmax.f32 %v2412_v12, 1e-05  ;;  %v2506_v21 = vadd.f32 2.0, %v5435_v61 }
 0x26f   : > { %v2844_v15 = vmul.f32 0.6931472, %v3213_v18  ;;  %3222 = vrsqrt.f32 %v5424_v14  ;;  %v2474_v63 = vadd.f32 1.0, %v5435_v61 }
 0x270   : > { %v3215_v57 = vpop.eup %3214  ;;  %v2707_v55 = vsel %vm2706_vm4, %v5392_v58, %v2705_v16  ;;  %v2509_v27 = vadd.f32 2.0, %v5431_v31  ;;  %v2410_v29 = vpop.xlane.xlu0 %2409  ;;  %v5454_v41 = vmul.f32 %v2506_v21, %v5435_v61  ;;  %v2477_v38 = vadd.f32 1.0, %v5431_v31 }
 0x271   : > { %2886 = vst.msk [vmem:[%s5205_s30 + $0xb0] sm:$0xff] %vm2863_vm9, %v2844_v15  ;;  %v2726_v23 = vmul.f32 %v3215_v57, %v5397_v4  ;;  %v2710_v22 = vsel %vm2708_vm5, %v2709_v48, %v2707_v55  ;;  %v5456_v5 = vmax.f32 %v2410_v29, 1e-05 }
 0x272   : > { %v2790_v49 = vadd.f32 %v2710_v22, %v2470_v0  ;;  %v5449_v6 = vmul.f32 %v2509_v27, %v5431_v31  ;;  %vm2734_vm15 = vcmp.eq.f32.partialorder %v5454_v41, inf  ;;  %vm2736_vm0 = vcmp.eq.f32.partialorder %v5454_v41, 0.0 }
 0x273   : > { %v2728_v2 = vsel %vm2727_vm6, %v5397_v4, %v2726_v23  ;;  %v2508_v26 = vadd.f32 2.0, %v5456_v5  ;;  %v2476_v57 = vadd.f32 1.0, %v5456_v5 }
 0x274   : > { %v2731_v13 = vsel %vm2729_vm7, %v2730_v8, %v2728_v2  ;;  %3224 = vlog2.f32 %v2790_v49  ;;  %v2414_v34 = vpop.xlane.xlu0 %2413  ;;  %vm2755_vm13 = vcmp.eq.f32.partialorder %v5449_v6, inf  ;;  %vm2757_vm14 = vcmp.eq.f32.partialorder %v5449_v6, 0.0 }
 0x275   : > { %v2793_v20 = vadd.f32 %v2731_v13, %v2473_v7  ;;  %3226 = vrsqrt.f32 %v5449_v6  ;;  %v5461_v9 = vmax.f32 %v2414_v34, 1e-05  ;;  %v2540_v24 = vmul.f32 %v2508_v26, %v5456_v5 }
 0x276   : > { %v3217_v42 = vpop.eup %3216  ;;  %3228 = vrsqrt.f32 %v5454_v41  ;;  %v2758_v54 = vand.u32 2147483648, %v5449_v6 }
 0x277   : > { %v3219_v19 = vpop.eup %3218  ;;  %v2842_v59 = vmul.f32 0.6931472, %v3217_v42  ;;  %3230 = vlog2.f32 %v2793_v20  ;;  %v2510_v4 = vadd.f32 2.0, %v5461_v9  ;;  %vm2748_vm1 = vcmp.eq.f32.partialorder %v2540_v24, inf }
 0x278   : > { %v3221_v58 = vpop.eup %3220  ;;  %v2848_v32 = vmul.f32 0.6931472, %v3219_v19  ;;  %3232 = vrsqrt.f32 %v2540_v24  ;;  %v2751_v15 = vand.u32 2147483648, %v2540_v24  ;;  %vm2750_vm2 = vcmp.eq.f32.partialorder %v2540_v24, 0.0 }
 0x279   : > { %v3223_v30 = vpop.eup %3222  ;;  %2885 = vst.msk [vmem:[%s5205_s30 + $0xa8] sm:$0xff] %vm2863_vm9, %v2842_v59  ;;  %v2740_v47 = vmul.f32 %v3221_v58, %v5421_v50  ;;  %v2542_v3 = vmul.f32 %v2510_v4, %v5461_v9  ;;  %v2478_v8 = vadd.f32 1.0, %v5461_v9 }
 0x27a   : > { %2888 = vst.msk [vmem:[%s5205_s30 + $0xc0] sm:$0xff] %vm2863_vm9, %v2848_v32  ;;  %v2719_v35 = vmul.f32 %v3223_v30, %v5424_v14 }
 0x27b   : > { %v2742_v17 = vsel %vm2741_vm8, %v5421_v50, %v2740_v47  ;;  %3234 = vrsqrt.f32 %v2542_v3  ;;  %v2737_v50 = vand.u32 2147483648, %v5454_v41  ;;  %vm2762_vm3 = vcmp.eq.f32.partialorder %v2542_v3, inf }
 0x27c   : > { %v2745_v56 = vsel %vm2743_vm11, %v2744_v25, %v2742_v17  ;;  %v2721_v53 = vsel %vm2720_vm10, %v5424_v14, %v2719_v35  ;;  %v2765_v22 = vand.u32 2147483648, %v2542_v3  ;;  %vm2764_vm4 = vcmp.eq.f32.partialorder %v2542_v3, 0.0 }
 0x27d   : > { %v2795_v37 = vadd.f32 %v2745_v56, %v2475_v62  ;;  %v2724_v36 = vsel %vm2722_vm12, %v2723_v33, %v2721_v53 }
 0x27e   : > { %v3225_v10 = vpop.eup %3224  ;;  %v2792_v60 = vadd.f32 %v2724_v36, %v2472_v43 }
 0x27f   : > { %v3227_v51 = vpop.eup %3226  ;;  %v2846_v46 = vmul.f32 0.6931472, %v3225_v10  ;;  %3236 = vlog2.f32 %v2795_v37 }
 0x280   : > { %v3229_v40 = vpop.eup %3228  ;;  %3238 = vlog2.f32 %v2792_v60  ;;  %v2754_v1 = vmul.f32 %v3227_v51, %v5449_v6 }
 0x281   : > { %v3231_v11 = vpop.eup %3230  ;;  %2887 = vst.msk [vmem:[%s5205_s30 + $0xb8] sm:$0xff] %vm2863_vm9, %v2846_v46  ;;  %v2733_v44 = vmul.f32 %v3229_v40, %v5454_v41 }
 0x282   : > { %v2852_v52 = vmul.f32 0.6931472, %v3231_v11  ;;  %v2756_v45 = vsel %vm2755_vm13, %v5449_v6, %v2754_v1  ;;  %v3233_v18 = vpop.eup %3232 }
 0x283   : > { %v2759_v14 = vsel %vm2757_vm14, %v2758_v54, %v2756_v45  ;;  %v2735_v39 = vsel %vm2734_vm15, %v5454_v41, %v2733_v44  ;;  %v2747_v31 = vmul.f32 %v3233_v18, %v2540_v24 }
 0x284   : > { %2890 = vst.msk [vmem:[%s5205_s30 + $0xd0] sm:$0xff] %vm2863_vm9, %v2852_v52  ;;  %v2797_v28 = vadd.f32 %v2759_v14, %v2477_v38  ;;  %v2738_v12 = vsel %vm2736_vm0, %v2737_v50, %v2735_v39 }
 0x285   : > { %v2794_v16 = vadd.f32 %v2738_v12, %v2474_v63  ;;  %v3235_v48 = vpop.eup %3234  ;;  %v2749_v61 = vsel %vm2748_vm1, %v2540_v24, %v2747_v31 }
 0x286   : > { %3240 = vlog2.f32 %v2797_v28  ;;  %v2752_v55 = vsel %vm2750_vm2, %v2751_v15, %v2749_v61  ;;  %v2761_v27 = vmul.f32 %v3235_v48, %v2542_v3 }
 0x287   : > { %3242 = vlog2.f32 %v2794_v16  ;;  %v2796_v23 = vadd.f32 %v2752_v55, %v2476_v57 }
 0x288   : > { %v2763_v49 = vsel %vm2762_vm3, %v2542_v3, %v2761_v27 }
 0x289   : > { %v3237_v0 = vpop.eup %3236  ;;  %3244 = vlog2.f32 %v2796_v23  ;;  %v2766_v6 = vsel %vm2764_vm4, %v2765_v22, %v2763_v49 }
 0x28a   : > { %v3239_v29 = vpop.eup %3238  ;;  %v2856_v7 = vmul.f32 0.6931472, %v3237_v0  ;;  %v2798_v2 = vadd.f32 %v2766_v6, %v2478_v8 }
 0x28b   : > { %v2850_v21 = vmul.f32 0.6931472, %v3239_v29 }
 0x28c   : > { %2892 = vst.msk [vmem:[%s5205_s30 + $0xe0] sm:$0xff] %vm2863_vm9, %v2856_v7  ;;  %3246 = vlog2.f32 %v2798_v2 }
 0x28d   : > { %2889 = vst.msk [vmem:[%s5205_s30 + $0xc8] sm:$0xff] %vm2863_vm9, %v2850_v21 }
 0x290   : > { %v3241_v41 = vpop.eup %3240 }
 0x291   : > { %v3243_v5 = vpop.eup %3242  ;;  %v2860_v13 = vmul.f32 0.6931472, %v3241_v41 }
 0x292   : > { %v2854_v34 = vmul.f32 0.6931472, %v3243_v5 }
 0x293   : > { %2894 = vst.msk [vmem:[%s5205_s30 + $0xf0] sm:$0xff] %vm2863_vm9, %v2860_v13  ;;  %v3245_v20 = vpop.eup %3244 }
 0x294   : > { %2891 = vst.msk [vmem:[%s5205_s30 + $0xd8] sm:$0xff] %vm2863_vm9, %v2854_v34  ;;  %v2858_v42 = vmul.f32 0.6931472, %v3245_v20 }
 0x296   : > { %v3247_v19 = vpop.eup %3246  ;;  %2893 = vst.msk [vmem:[%s5205_s30 + $0xe8] sm:$0xff] %vm2863_vm9, %v2858_v42 }
 0x297   : > { %v2862_v59 = vmul.f32 0.6931472, %v3247_v19 }
 0x299   : > { %2895 = vst.msk [vmem:[%s5205_s30 + $0xf8] sm:$0xff] %vm2863_vm9, %v2862_v59 }
 0x29a PF: > { %s14_s14 = sadd.s32 1, %s3270_s14   ;;  %s5946_s12 = smov %s3266_s13 }
 0x29b   : > { %p11_p5 = scmp.ge.s32.totalorder %s14_s14, 4   ;;  %s5947_s13 = smov %s5949_s15 }
 0x29d   :  { %13 = sbr.rel (!%p11_p5) target bundleno = 2 (0x2), region = 86 }

</bundles_post_ra>
